<compile_context>
chip_gen: v5e
topology: v5e:2x2
jax: 0.10.0
libtpu: 0.0.40
codegen_flags: <defaults>
</compile_context>

<pallas_src>
import numpy as np
import jax
import jax.numpy as jnp
from jax import lax
from jax.experimental import pallas as pl
from jax.experimental.pallas import tpu as pltpu


# ----------------------------- config ---------------------------------------
class Config:
    bert_dim = 128     # small stand-in for 768 (kept a multiple of 128 -> lane-dense)
    latent_dim = 16
    n_clusters = 8
    hidden = 512       # hardcoded 512 inside the reference AutoEncoder
    vocab = 32


TILE_N = 128           # rows per grid step (v5e-safe; use 256 on v6e/v7x)


# --------------------------- fused Pallas kernel -----------------------------
def heclus_kernel(x_ref, pos_ref,
                  w1_ref, b1_ref, w2_ref, b2_ref, w3_ref, b3_ref, w4_ref, b4_ref,
                  bow_ref, vids_ref, cent_ref,
                  xrec_ref, co_ref, avg_ref, p_ref,
                  accz_ref, freq_ref):
    i = pl.program_id(0)
    tile_n = x_ref.shape[0]
    u_pad = accz_ref.shape[0]
    vocab = bow_ref.shape[1]
    bsz = bow_ref.shape[0]

    @pl.when(i == 0)
    def _init():
        accz_ref[...] = jnp.zeros_like(accz_ref)
        freq_ref[...] = jnp.zeros_like(freq_ref)

    # ---------------- AutoEncoder (bf16 MXU, f32 accumulate / elementwise) ----
    xb = x_ref[...].astype(jnp.bfloat16)
    h1 = jnp.maximum(
        jnp.dot(xb, w1_ref[...], preferred_element_type=jnp.float32)
        + b1_ref[...].astype(jnp.float32), 0.0)
    zr = (jnp.dot(h1.astype(jnp.bfloat16), w2_ref[...],
                  preferred_element_type=jnp.float32)
          + b2_ref[...].astype(jnp.float32))
    # F.normalize(z, dim=-1): x * rsqrt(max(sum x^2, eps^2)) == x / max(||x||, eps)
    z = zr * lax.rsqrt(jnp.maximum(jnp.sum(zr * zr, axis=-1, keepdims=True), 1e-24))
    h2 = jnp.maximum(
        jnp.dot(z.astype(jnp.bfloat16), w3_ref[...],
                preferred_element_type=jnp.float32)
        + b3_ref[...].astype(jnp.float32), 0.0)
    xrec_ref[...] = (jnp.dot(h2.astype(jnp.bfloat16), w4_ref[...],
                             preferred_element_type=jnp.float32)
                     + b4_ref[...].astype(jnp.float32))

    # ------------- index_add aggregation (one-hot built on-chip) -------------
    pos = pos_ref[...]                                           # (1, tile_n) int32; -1 = padding
    u_iota = lax.broadcasted_iota(jnp.int32, (u_pad, tile_n), 0)
    onehot_t = (u_iota == pos).astype(jnp.float32)               # (u_pad, tile_n)
    accz_ref[...] += jnp.dot(onehot_t.astype(jnp.bfloat16), z.astype(jnp.bfloat16),
                             preferred_element_type=jnp.float32)
    freq_ref[...] += jnp.sum(onehot_t, axis=1, keepdims=True)    # (u_pad, 1) counts

    # ----------- tail: avg, co-occurrence matrix, cluster assignment ---------
    @pl.when(i == pl.num_programs(0) - 1)
    def _tail():
        freq = freq_ref[...]
        avg = accz_ref[...] / jnp.maximum(freq, 1.0)             # padded ids have freq 0
        avg_ref[...] = avg

        # bow column selection built on-chip from the unique-id row (no trans DMA)
        vids = vids_ref[...]                                     # (1, u_pad) int32; -1 = padding
        v_iota = lax.broadcasted_iota(jnp.int32, (vocab, u_pad), 0)
        sel = (v_iota == vids).astype(jnp.float32)               # (vocab, u_pad)
        bow_m = jnp.dot(bow_ref[...].astype(jnp.bfloat16), sel.astype(jnp.bfloat16),
                        preferred_element_type=jnp.float32)      # (bsz, u_pad), exact counts
        nz_f = (bow_m != 0).astype(jnp.float32)
        nz_b = nz_f.astype(jnp.bfloat16)
        p_ij = lax.dot_general(nz_b, nz_b, (((0,), (0,)), ((), ())),
                               preferred_element_type=jnp.float32) / bsz
        p_i_row = jnp.sum(nz_f, axis=0, keepdims=True) / bsz     # (1, u_pad)
        # (1,U) row -> (U,1) column via iota-select + lane reduce
        # (no XLU transpose and no 1-column MXU matmul).
        r_io = lax.broadcasted_iota(jnp.int32, (u_pad, u_pad), 0)
        c_io = lax.broadcasted_iota(jnp.int32, (u_pad, u_pad), 1)
        p_i_col = jnp.sum(jnp.where(r_io == c_io, p_i_row, 0.0),
                          axis=1, keepdims=True)                 # (u_pad, 1)
        # guard only activates for padded ids (true p_i >= 1/bsz)
        co_ref[...] = p_ij / jnp.maximum(p_i_col * p_i_row, 1e-12)

        # KmeansBatch.assign_cluster (soft probabilities; argmax by caller)
        cent = cent_ref[...]
        cn = cent * lax.rsqrt(
            jnp.maximum(jnp.sum(cent * cent, axis=-1, keepdims=True), 1e-24))
        sim = lax.dot_general(avg.astype(jnp.bfloat16), cn.astype(jnp.bfloat16),
                              (((1,), (1,)), ((), ())),
                              preferred_element_type=jnp.float32)  # (u_pad, k)
        m = jnp.max(sim, axis=-1, keepdims=True)
        e = jnp.exp(sim - m)
        p_ref[...] = e * pl.reciprocal(jnp.sum(e, axis=-1, keepdims=True), approx=True)


def heclus_pallas(x_pad, pos_row, bow, vids_row, centers, ae_params, *, tile_n):
    n_pad, d = x_pad.shape
    u_pad = vids_row.shape[1]
    latent = ae_params[2].shape[1]        # w2: (hidden, latent)
    k = centers.shape[0]
    grid = (n_pad // tile_n,)

    def full(shape):                      # whole-array block, resident across steps
        return pl.BlockSpec(shape, lambda i: (0, 0))

    in_specs = (
        [pl.BlockSpec((tile_n, d), lambda i: (i, 0)),     # x row tile
         pl.BlockSpec((1, tile_n), lambda i: (0, i))]     # valid_pos_ids row tile
        + [full(p.shape) for p in ae_params]              # w1..b4 (bf16)
        + [full(bow.shape), full(vids_row.shape), full(centers.shape)]
    )
    out_shape = (
        jax.ShapeDtypeStruct((n_pad, d), jnp.float32),        # x_rec
        jax.ShapeDtypeStruct((u_pad, u_pad), jnp.float32),    # co-occurrence
        jax.ShapeDtypeStruct((u_pad, latent), jnp.float32),   # avg latent embs
        jax.ShapeDtypeStruct((u_pad, k), jnp.float32),        # soft cluster probs
    )
    out_specs = (
        pl.BlockSpec((tile_n, d), lambda i: (i, 0)),
        full((u_pad, u_pad)),
        full((u_pad, latent)),
        full((u_pad, k)),
    )
    return pl.pallas_call(
        heclus_kernel,
        out_shape=out_shape,
        grid=grid,
        in_specs=in_specs,
        out_specs=out_specs,
        scratch_shapes=[pltpu.VMEM((u_pad, latent), jnp.float32),   # sum_z accumulator
                        pltpu.VMEM((u_pad, 1), jnp.float32)],       # freq accumulator
        compiler_params=pltpu.CompilerParams(
            # the row axis carries the sum_z/freq accumulation + the last-step
            # tail, so it must be "arbitrary" (fusion trades the v7x 2-TC split
            # of the AE for zero z HBM round-trip and one launch).
            dimension_semantics=("arbitrary",),
            vmem_limit_bytes=32 * 1024 * 1024),
    )(x_pad, pos_row, *ae_params, bow, vids_row, centers)


# ----------------------------- model state ----------------------------------
def init_state(cfg: Config, key):
    ks = jax.random.split(key, 12)
    scale = 0.1
    # AutoEncoder params, stored (in, out), kept in bf16 for the MXU (f32 accum in-kernel)
    def bf(a):
        return a.astype(jnp.bfloat16)
    w1 = bf(scale * jax.random.normal(ks[0], (cfg.bert_dim, cfg.hidden), jnp.float32))
    b1 = bf(scale * jax.random.normal(ks[1], (1, cfg.hidden), jnp.float32))
    w2 = bf(scale * jax.random.normal(ks[2], (cfg.hidden, cfg.latent_dim), jnp.float32))
    b2 = bf(scale * jax.random.normal(ks[3], (1, cfg.latent_dim), jnp.float32))
    w3 = bf(scale * jax.random.normal(ks[4], (cfg.latent_dim, cfg.hidden), jnp.float32))
    b3 = bf(scale * jax.random.normal(ks[5], (1, cfg.hidden), jnp.float32))
    w4 = bf(scale * jax.random.normal(ks[6], (cfg.hidden, cfg.bert_dim), jnp.float32))
    b4 = bf(scale * jax.random.normal(ks[7], (1, cfg.bert_dim), jnp.float32))
    state = {
        "ae_params": (w1, b1, w2, b2, w3, b3, w4, b4),
        # TODO(synk): pretrained 'bert-base-uncased' is not reproducible in a
        # self-contained kernel; replaced by a deterministic embedding lookup.
        "bert_embed": jax.random.normal(ks[8], (cfg.vocab, cfg.bert_dim), jnp.float32),
        # assumes KmeansBatch.init_cluster has been run: deterministic centers
        "kmeans_centers": jax.random.normal(ks[9], (cfg.n_clusters, cfg.latent_dim),
                                            jnp.float32),
        "kmeans_count": 50.0 * np.ones(cfg.n_clusters),
        "vocab_weights": jax.random.uniform(ks[10], (cfg.vocab,), jnp.float32) + 0.5,
    }
    return state


# ----------------------------- forward pass ----------------------------------
def he_clus_forward(state, cfg, input_ids, attention_mask, valid_pos, bow,
                    train=True, tile_n=TILE_N):
    ids_np = np.asarray(input_ids)
    vp_np = np.asarray(valid_pos)
    valid_mask = vp_np != 0

    # BERT stand-in (host glue): deterministic embedding lookup; attention_mask unused.
    emb_np = np.asarray(state["bert_embed"])
    bert_embs_np = emb_np[ids_np][valid_mask].astype(np.float32)       # (N, D)
    n, d = bert_embs_np.shape

    # host glue: unique valid ids + index bookkeeping (python set in reference)
    valid_ids = ids_np[valid_mask]
    valid_ids_set = sorted(set(int(v) for v in valid_ids))
    u = len(valid_ids_set)
    id_to_pos = {t: i for i, t in enumerate(valid_ids_set)}
    valid_pos_ids = np.array([id_to_pos[int(t)] for t in valid_ids], np.int32)

    # pad to TPU-friendly shapes (rows -> tile multiple, unique ids -> 128 lanes)
    n_pad = ((n + tile_n - 1) // tile_n) * tile_n
    u_pad = ((u + 127) // 128) * 128
    x_pad = np.zeros((n_pad, d), np.float32)
    x_pad[:n] = bert_embs_np
    pos_row = np.full((1, n_pad), -1, np.int32)        # -1 -> all-zero one-hot row
    pos_row[0, :n] = valid_pos_ids
    vids_row = np.full((1, u_pad), -1, np.int32)       # -1 -> all-zero bow selection col
    vids_row[0, :u] = np.asarray(valid_ids_set, np.int32)

    # fused Pallas kernel
    xrec_pad, co_pad, avg_pad, p_pad = heclus_pallas(
        jnp.asarray(x_pad), jnp.asarray(pos_row),
        jnp.asarray(bow, jnp.float32), jnp.asarray(vids_row),
        jnp.asarray(state["kmeans_centers"], jnp.float32),
        state["ae_params"], tile_n=tile_n)

    bert_embs = jnp.asarray(bert_embs_np)
    bert_embs_rec = xrec_pad[:n]
    co_matrix = co_pad[:u, :u]
    avg_latent_embs = avg_pad[:u]
    p_soft = p_pad[:u]
    cluster_ids = jnp.argmax(p_soft, axis=1)

    if train:
        # KmeansBatch.update_cluster: stateful sequential host-side update
        centers = np.asarray(state["kmeans_centers"]).copy()
        count = state["kmeans_count"]
        vw = np.asarray(state["vocab_weights"])
        cids = np.asarray(cluster_ids)
        avg_np = np.asarray(avg_latent_embs)
        valid_arr = np.asarray(valid_ids_set, dtype=np.int64)
        elem_count = np.bincount(cids, minlength=cfg.n_clusters)
        for k in range(cfg.n_clusters):
            if elem_count[k] == 0:
                continue
            weights = vw[valid_arr[cids == k]]
            embs = avg_np[cids == k]
            for i in range(embs.shape[0]):
                count[k] += 1
                eta = 1.0 / count[k] * weights[i]
                centers[k] = (1 - eta) * centers[k] + eta * embs[i]
        state["kmeans_centers"] = jnp.asarray(centers)

    return valid_ids_set, co_matrix, bert_embs, bert_embs_rec, avg_latent_embs, cluster_ids


# --------------------------------- main --------------------------------------
if __name__ == "__main__":
    cfg = Config()
    key = jax.random.PRNGKey(0)
    k_state, k_ids, k_pos = jax.random.split(key, 3)

    B, S = 2, 8
    state = init_state(cfg, k_state)

    input_ids = jax.random.randint(k_ids, (B, S), 0, cfg.vocab, dtype=jnp.int32)
    attention_mask = jnp.ones((B, S), jnp.int32)
    valid_pos = jax.random.randint(k_pos, (B, S), 0, 2, dtype=jnp.int32)
    valid_pos = valid_pos.at[:, 0].set(1)   # guarantee at least one valid token per doc

    # bag-of-words built from the token ids (documents are the rows)
    ids_np = np.asarray(input_ids)
    bow_np = np.zeros((B, cfg.vocab), np.float32)
    for b in range(B):
        np.add.at(bow_np[b], ids_np[b], 1.0)
    bow = jnp.asarray(bow_np)

    outs = he_clus_forward(state, cfg, input_ids, attention_mask, valid_pos, bow,
                           train=True)
    (valid_ids_set, co_matrix, bert_embs, bert_embs_rec,
     avg_latent_embs, cluster_ids) = outs

    jax.block_until_ready((co_matrix, bert_embs, bert_embs_rec,
                           avg_latent_embs, cluster_ids))
    print("KERNEL_OK")
</pallas_src>

<mosaic_0001>
module attributes {stable_mosaic.version = 11 : i64} {
  func.func @heclus_kernel(%arg0: i32, %arg1: memref<128x128xf32, #tpu.memory_space<vmem>>, %arg2: memref<1x128xi32, #tpu.memory_space<vmem>>, %arg3: memref<128x512xbf16, #tpu.memory_space<vmem>>, %arg4: memref<1x512xbf16, #tpu.memory_space<vmem>>, %arg5: memref<512x16xbf16, #tpu.memory_space<vmem>>, %arg6: memref<1x16xbf16, #tpu.memory_space<vmem>>, %arg7: memref<16x512xbf16, #tpu.memory_space<vmem>>, %arg8: memref<1x512xbf16, #tpu.memory_space<vmem>>, %arg9: memref<512x128xbf16, #tpu.memory_space<vmem>>, %arg10: memref<1x128xbf16, #tpu.memory_space<vmem>>, %arg11: memref<2x32xf32, #tpu.memory_space<vmem>>, %arg12: memref<1x128xi32, #tpu.memory_space<vmem>>, %arg13: memref<8x16xf32, #tpu.memory_space<vmem>>, %arg14: memref<128x128xf32, #tpu.memory_space<vmem>>, %arg15: memref<128x128xf32, #tpu.memory_space<vmem>>, %arg16: memref<128x16xf32, #tpu.memory_space<vmem>>, %arg17: memref<128x8xf32, #tpu.memory_space<vmem>>, %arg18: memref<128x16xf32, #tpu.memory_space<vmem>>, %arg19: memref<128x1xf32, #tpu.memory_space<vmem>>) attributes {dimension_semantics = [#tpu.dimension_semantics<arbitrary>], iteration_bounds = array<i64: 1>, scalar_prefetch = 0 : i64, scratch_operands = 2 : i64, tpu.core_type = #tpu.core_type<tc>, window_params = [{transform_indices = @transform_0, window_bounds = array<i64: 128, 128>}, {transform_indices = @transform_1, window_bounds = array<i64: 1, 128>}, {pipeline_mode = #tpu.pipeline_mode<synchronous>, transform_indices = @transform_2, window_bounds = array<i64: 128, 512>}, {pipeline_mode = #tpu.pipeline_mode<synchronous>, transform_indices = @transform_3, window_bounds = array<i64: 1, 512>}, {pipeline_mode = #tpu.pipeline_mode<synchronous>, transform_indices = @transform_4, window_bounds = array<i64: 512, 16>}, {pipeline_mode = #tpu.pipeline_mode<synchronous>, transform_indices = @transform_5, window_bounds = array<i64: 1, 16>}, {pipeline_mode = #tpu.pipeline_mode<synchronous>, transform_indices = @transform_6, window_bounds = array<i64: 16, 512>}, {pipeline_mode = #tpu.pipeline_mode<synchronous>, transform_indices = @transform_7, window_bounds = array<i64: 1, 512>}, {pipeline_mode = #tpu.pipeline_mode<synchronous>, transform_indices = @transform_8, window_bounds = array<i64: 512, 128>}, {pipeline_mode = #tpu.pipeline_mode<synchronous>, transform_indices = @transform_9, window_bounds = array<i64: 1, 128>}, {pipeline_mode = #tpu.pipeline_mode<synchronous>, transform_indices = @transform_10, window_bounds = array<i64: 2, 32>}, {pipeline_mode = #tpu.pipeline_mode<synchronous>, transform_indices = @transform_11, window_bounds = array<i64: 1, 128>}, {pipeline_mode = #tpu.pipeline_mode<synchronous>, transform_indices = @transform_12, window_bounds = array<i64: 8, 16>}, {transform_indices = @transform_13, window_bounds = array<i64: 128, 128>}, {pipeline_mode = #tpu.pipeline_mode<synchronous>, transform_indices = @transform_14, window_bounds = array<i64: 128, 128>}, {pipeline_mode = #tpu.pipeline_mode<synchronous>, transform_indices = @transform_15, window_bounds = array<i64: 128, 16>}, {pipeline_mode = #tpu.pipeline_mode<synchronous>, transform_indices = @transform_16, window_bounds = array<i64: 128, 8>}]} {
    %c0_i32 = arith.constant 0 : i32
    %0 = arith.cmpi eq, %arg0, %c0_i32 : i32
    %1 = arith.extui %0 : i1 to i32
    %c0_i32_0 = arith.constant 0 : i32
    %2 = arith.cmpi ne, %1, %c0_i32_0 : i32
    scf.if %2 {
      %cst_41 = arith.constant 0.000000e+00 : f32
      %65 = vector.broadcast %cst_41 : f32 to vector<128x16xf32>
      %c0_42 = arith.constant 0 : index
      %c0_43 = arith.constant 0 : index
      %66 = vector.load %arg18[%c0_42, %c0_43] : memref<128x16xf32, #tpu.memory_space<vmem>>, vector<128x16xf32>
      tpu.vector_store %arg18[%c0_42, %c0_43], %65 {strides = array<i32>} : memref<128x16xf32, #tpu.memory_space<vmem>>, vector<128x16xf32>,
      %cst_44 = arith.constant 0.000000e+00 : f32
      %67 = vector.broadcast %cst_44 : f32 to vector<128x1xf32>
      %c0_45 = arith.constant 0 : index
      %c0_46 = arith.constant 0 : index
      %68 = vector.load %arg19[%c0_45, %c0_46] : memref<128x1xf32, #tpu.memory_space<vmem>>, vector<128x1xf32>
      tpu.vector_store %arg19[%c0_45, %c0_46], %67 {strides = array<i32>} : memref<128x1xf32, #tpu.memory_space<vmem>>, vector<128x1xf32>,
    } else {
    }
    %c0 = arith.constant 0 : index
    %c0_1 = arith.constant 0 : index
    %3 = vector.load %arg1[%c0, %c0_1] : memref<128x128xf32, #tpu.memory_space<vmem>>, vector<128x128xf32>
    %4 = arith.truncf %3 : vector<128x128xf32> to vector<128x128xbf16>
    %c0_2 = arith.constant 0 : index
    %c0_3 = arith.constant 0 : index
    %5 = vector.load %arg3[%c0_2, %c0_3] : memref<128x512xbf16, #tpu.memory_space<vmem>>, vector<128x512xbf16>
    %cst = arith.constant dense<0.000000e+00> : vector<128x512xf32>
    %6 = tpu.matmul %4, %5, %cst {dimension_numbers = #tpu.dot_dimension_numbers<[1], [0], [0], [1], [0, 0, 1, 1], [], []>} : vector<128x128xbf16>, vector<128x512xbf16>, vector<128x512xf32> -> vector<128x512xf32>
    %c0_4 = arith.constant 0 : index
    %c0_5 = arith.constant 0 : index
    %7 = vector.load %arg4[%c0_4, %c0_5] : memref<1x512xbf16, #tpu.memory_space<vmem>>, vector<1x512xbf16>
    %8 = arith.extf %7 : vector<1x512xbf16> to vector<1x512xf32>
    %9 = vector.broadcast %8 : vector<1x512xf32> to vector<128x512xf32>
    %10 = arith.addf %6, %9 : vector<128x512xf32>
    %cst_6 = arith.constant 0.000000e+00 : f32
    %11 = vector.broadcast %cst_6 : f32 to vector<128x512xf32>
    %12 = arith.maximumf %10, %11 : vector<128x512xf32>
    %13 = arith.truncf %12 : vector<128x512xf32> to vector<128x512xbf16>
    %c0_7 = arith.constant 0 : index
    %c0_8 = arith.constant 0 : index
    %14 = vector.load %arg5[%c0_7, %c0_8] : memref<512x16xbf16, #tpu.memory_space<vmem>>, vector<512x16xbf16>
    %cst_9 = arith.constant dense<0.000000e+00> : vector<128x16xf32>
    %15 = tpu.matmul %13, %14, %cst_9 {dimension_numbers = #tpu.dot_dimension_numbers<[1], [0], [0], [1], [0, 0, 1, 1], [], []>} : vector<128x512xbf16>, vector<512x16xbf16>, vector<128x16xf32> -> vector<128x16xf32>
    %c0_10 = arith.constant 0 : index
    %c0_11 = arith.constant 0 : index
    %16 = vector.load %arg6[%c0_10, %c0_11] : memref<1x16xbf16, #tpu.memory_space<vmem>>, vector<1x16xbf16>
    %17 = arith.extf %16 : vector<1x16xbf16> to vector<1x16xf32>
    %18 = vector.broadcast %17 : vector<1x16xf32> to vector<128x16xf32>
    %19 = arith.addf %15, %18 : vector<128x16xf32>
    %20 = arith.mulf %19, %19 : vector<128x16xf32>
    %cst_12 = arith.constant dense<0.000000e+00> : vector<128xf32>
    %21 = vector.multi_reduction <add>, %20, %cst_12 [1] : vector<128x16xf32> to vector<128xf32>
    %22 = vector.shape_cast %21 : vector<128xf32> to vector<128x1xf32>
    %cst_13 = arith.constant 1.000000e-24 : f32
    %23 = vector.broadcast %cst_13 : f32 to vector<128x1xf32>
    %24 = arith.maximumf %22, %23 : vector<128x1xf32>
    %25 = math.rsqrt %24 : vector<128x1xf32>
    %26 = vector.broadcast %25 : vector<128x1xf32> to vector<128x16xf32>
    %27 = arith.mulf %19, %26 : vector<128x16xf32>
    %28 = arith.truncf %27 : vector<128x16xf32> to vector<128x16xbf16>
    %c0_14 = arith.constant 0 : index
    %c0_15 = arith.constant 0 : index
    %29 = vector.load %arg7[%c0_14, %c0_15] : memref<16x512xbf16, #tpu.memory_space<vmem>>, vector<16x512xbf16>
    %cst_16 = arith.constant dense<0.000000e+00> : vector<128x512xf32>
    %30 = tpu.matmul %28, %29, %cst_16 {dimension_numbers = #tpu.dot_dimension_numbers<[1], [0], [0], [1], [0, 0, 1, 1], [], []>} : vector<128x16xbf16>, vector<16x512xbf16>, vector<128x512xf32> -> vector<128x512xf32>
    %c0_17 = arith.constant 0 : index
    %c0_18 = arith.constant 0 : index
    %31 = vector.load %arg8[%c0_17, %c0_18] : memref<1x512xbf16, #tpu.memory_space<vmem>>, vector<1x512xbf16>
    %32 = arith.extf %31 : vector<1x512xbf16> to vector<1x512xf32>
    %33 = vector.broadcast %32 : vector<1x512xf32> to vector<128x512xf32>
    %34 = arith.addf %30, %33 : vector<128x512xf32>
    %cst_19 = arith.constant 0.000000e+00 : f32
    %35 = vector.broadcast %cst_19 : f32 to vector<128x512xf32>
    %36 = arith.maximumf %34, %35 : vector<128x512xf32>
    %37 = arith.truncf %36 : vector<128x512xf32> to vector<128x512xbf16>
    %c0_20 = arith.constant 0 : index
    %c0_21 = arith.constant 0 : index
    %38 = vector.load %arg9[%c0_20, %c0_21] : memref<512x128xbf16, #tpu.memory_space<vmem>>, vector<512x128xbf16>
    %cst_22 = arith.constant dense<0.000000e+00> : vector<128x128xf32>
    %39 = tpu.matmul %37, %38, %cst_22 {dimension_numbers = #tpu.dot_dimension_numbers<[1], [0], [0], [1], [0, 0, 1, 1], [], []>} : vector<128x512xbf16>, vector<512x128xbf16>, vector<128x128xf32> -> vector<128x128xf32>
    %c0_23 = arith.constant 0 : index
    %c0_24 = arith.constant 0 : index
    %40 = vector.load %arg10[%c0_23, %c0_24] : memref<1x128xbf16, #tpu.memory_space<vmem>>, vector<1x128xbf16>
    %41 = arith.extf %40 : vector<1x128xbf16> to vector<1x128xf32>
    %42 = vector.broadcast %41 : vector<1x128xf32> to vector<128x128xf32>
    %43 = arith.addf %39, %42 : vector<128x128xf32>
    %c0_25 = arith.constant 0 : index
    %c0_26 = arith.constant 0 : index
    %44 = vector.load %arg14[%c0_25, %c0_26] : memref<128x128xf32, #tpu.memory_space<vmem>>, vector<128x128xf32>
    tpu.vector_store %arg14[%c0_25, %c0_26], %43 {strides = array<i32>} : memref<128x128xf32, #tpu.memory_space<vmem>>, vector<128x128xf32>,
    %c0_27 = arith.constant 0 : index
    %c0_28 = arith.constant 0 : index
    %45 = vector.load %arg2[%c0_27, %c0_28] : memref<1x128xi32, #tpu.memory_space<vmem>>, vector<1x128xi32>
    %46 = tpu.iota {dimensions = array<i32: 0>} : vector<128x128xi32>
    %47 = vector.broadcast %45 : vector<1x128xi32> to vector<128x128xi32>
    %48 = arith.cmpi eq, %46, %47 : vector<128x128xi32>
    %49 = arith.extui %48 : vector<128x128xi1> to vector<128x128xi32>
    %50 = arith.sitofp %49 : vector<128x128xi32> to vector<128x128xf32>
    %c0_29 = arith.constant 0 : index
    %c0_30 = arith.constant 0 : index
    %51 = vector.load %arg18[%c0_29, %c0_30] : memref<128x16xf32, #tpu.memory_space<vmem>>, vector<128x16xf32>
    %52 = arith.truncf %50 : vector<128x128xf32> to vector<128x128xbf16>
    %53 = arith.truncf %27 : vector<128x16xf32> to vector<128x16xbf16>
    %cst_31 = arith.constant dense<0.000000e+00> : vector<128x16xf32>
    %54 = tpu.matmul %52, %53, %cst_31 {dimension_numbers = #tpu.dot_dimension_numbers<[1], [0], [0], [1], [0, 0, 1, 1], [], []>} : vector<128x128xbf16>, vector<128x16xbf16>, vector<128x16xf32> -> vector<128x16xf32>
    %55 = arith.addf %51, %54 : vector<128x16xf32>
    %c0_32 = arith.constant 0 : index
    %c0_33 = arith.constant 0 : index
    %56 = vector.load %arg18[%c0_32, %c0_33] : memref<128x16xf32, #tpu.memory_space<vmem>>, vector<128x16xf32>
    tpu.vector_store %arg18[%c0_32, %c0_33], %55 {strides = array<i32>} : memref<128x16xf32, #tpu.memory_space<vmem>>, vector<128x16xf32>,
    %c0_34 = arith.constant 0 : index
    %c0_35 = arith.constant 0 : index
    %57 = vector.load %arg19[%c0_34, %c0_35] : memref<128x1xf32, #tpu.memory_space<vmem>>, vector<128x1xf32>
    %cst_36 = arith.constant dense<0.000000e+00> : vector<128xf32>
    %58 = vector.multi_reduction <add>, %50, %cst_36 [1] : vector<128x128xf32> to vector<128xf32>
    %59 = vector.shape_cast %58 : vector<128xf32> to vector<128x1xf32>
    %60 = arith.addf %57, %59 : vector<128x1xf32>
    %c0_37 = arith.constant 0 : index
    %c0_38 = arith.constant 0 : index
    %61 = vector.load %arg19[%c0_37, %c0_38] : memref<128x1xf32, #tpu.memory_space<vmem>>, vector<128x1xf32>
    tpu.vector_store %arg19[%c0_37, %c0_38], %60 {strides = array<i32>} : memref<128x1xf32, #tpu.memory_space<vmem>>, vector<128x1xf32>,
    %c0_i32_39 = arith.constant 0 : i32
    %62 = arith.cmpi eq, %arg0, %c0_i32_39 : i32
    %63 = arith.extui %62 : i1 to i32
    %c0_i32_40 = arith.constant 0 : i32
    %64 = arith.cmpi ne, %63, %c0_i32_40 : i32
    scf.if %64 {
      %c0_41 = arith.constant 0 : index
      %c0_42 = arith.constant 0 : index
      %65 = vector.load %arg19[%c0_41, %c0_42] : memref<128x1xf32, #tpu.memory_space<vmem>>, vector<128x1xf32>
      %c0_43 = arith.constant 0 : index
      %c0_44 = arith.constant 0 : index
      %66 = vector.load %arg18[%c0_43, %c0_44] : memref<128x16xf32, #tpu.memory_space<vmem>>, vector<128x16xf32>
      %cst_45 = arith.constant 1.000000e+00 : f32
      %67 = vector.broadcast %cst_45 : f32 to vector<128x1xf32>
      %68 = arith.maximumf %65, %67 : vector<128x1xf32>
      %69 = vector.broadcast %68 : vector<128x1xf32> to vector<128x16xf32>
      %70 = arith.divf %66, %69 : vector<128x16xf32>
      %c0_46 = arith.constant 0 : index
      %c0_47 = arith.constant 0 : index
      %71 = vector.load %arg16[%c0_46, %c0_47] : memref<128x16xf32, #tpu.memory_space<vmem>>, vector<128x16xf32>
      tpu.vector_store %arg16[%c0_46, %c0_47], %70 {strides = array<i32>} : memref<128x16xf32, #tpu.memory_space<vmem>>, vector<128x16xf32>,
      %c0_48 = arith.constant 0 : index
      %c0_49 = arith.constant 0 : index
      %72 = vector.load %arg12[%c0_48, %c0_49] : memref<1x128xi32, #tpu.memory_space<vmem>>, vector<1x128xi32>
      %73 = tpu.iota {dimensions = array<i32: 0>} : vector<32x128xi32>
      %74 = vector.broadcast %72 : vector<1x128xi32> to vector<32x128xi32>
      %75 = arith.cmpi eq, %73, %74 : vector<32x128xi32>
      %76 = arith.extui %75 : vector<32x128xi1> to vector<32x128xi32>
      %77 = arith.sitofp %76 : vector<32x128xi32> to vector<32x128xf32>
      %c0_50 = arith.constant 0 : index
      %c0_51 = arith.constant 0 : index
      %78 = vector.load %arg11[%c0_50, %c0_51] : memref<2x32xf32, #tpu.memory_space<vmem>>, vector<2x32xf32>
      %79 = arith.truncf %78 : vector<2x32xf32> to vector<2x32xbf16>
      %80 = arith.truncf %77 : vector<32x128xf32> to vector<32x128xbf16>
      %cst_52 = arith.constant dense<0.000000e+00> : vector<2x128xf32>
      %81 = tpu.matmul %79, %80, %cst_52 {dimension_numbers = #tpu.dot_dimension_numbers<[1], [0], [0], [1], [0, 0, 1, 1], [], []>} : vector<2x32xbf16>, vector<32x128xbf16>, vector<2x128xf32> -> vector<2x128xf32>
      %cst_53 = arith.constant 0.000000e+00 : f32
      %82 = vector.broadcast %cst_53 : f32 to vector<2x128xf32>
      %83 = arith.cmpf one, %81, %82 : vector<2x128xf32>
      %84 = arith.extui %83 : vector<2x128xi1> to vector<2x128xi32>
      %85 = arith.sitofp %84 : vector<2x128xi32> to vector<2x128xf32>
      %86 = arith.truncf %85 : vector<2x128xf32> to vector<2x128xbf16>
      %cst_54 = arith.constant dense<0.000000e+00> : vector<128x128xf32>
      %87 = tpu.matmul %86, %86, %cst_54 {dimension_numbers = #tpu.dot_dimension_numbers<[0], [0], [1], [1], [0, 1, 1, 1], [], []>} : vector<2x128xbf16>, vector<2x128xbf16>, vector<128x128xf32> -> vector<128x128xf32>
      %cst_55 = arith.constant 2.000000e+00 : f32
      %88 = vector.broadcast %cst_55 : f32 to vector<128x128xf32>
      %89 = arith.divf %87, %88 : vector<128x128xf32>
      %cst_56 = arith.constant dense<0.000000e+00> : vector<128xf32>
      %90 = vector.multi_reduction <add>, %85, %cst_56 [0] : vector<2x128xf32> to vector<128xf32>
      %91 = vector.shape_cast %90 : vector<128xf32> to vector<1x128xf32>
      %cst_57 = arith.constant 2.000000e+00 : f32
      %92 = vector.broadcast %cst_57 : f32 to vector<1x128xf32>
      %93 = arith.divf %91, %92 : vector<1x128xf32>
      %94 = tpu.iota {dimensions = array<i32: 0>} : vector<128x128xi32>
      %95 = tpu.iota {dimensions = array<i32: 1>} : vector<128x128xi32>
      %96 = arith.cmpi eq, %94, %95 : vector<128x128xi32>
      %cst_58 = arith.constant 0.000000e+00 : f32
      %97 = vector.shape_cast %93 : vector<1x128xf32> to vector<1x128xf32>
      %98 = vector.broadcast %97 : vector<1x128xf32> to vector<128x128xf32>
      %99 = vector.broadcast %cst_58 : f32 to vector<128x128xf32>
      %100 = arith.select %96, %98, %99 : vector<128x128xi1>, vector<128x128xf32>
      %cst_59 = arith.constant dense<0.000000e+00> : vector<128xf32>
      %101 = vector.multi_reduction <add>, %100, %cst_59 [1] : vector<128x128xf32> to vector<128xf32>
      %102 = vector.shape_cast %101 : vector<128xf32> to vector<128x1xf32>
      %103 = vector.broadcast %102 : vector<128x1xf32> to vector<128x128xf32>
      %104 = vector.broadcast %93 : vector<1x128xf32> to vector<128x128xf32>
      %105 = arith.mulf %103, %104 : vector<128x128xf32>
      %cst_60 = arith.constant 9.99999996E-13 : f32
      %106 = vector.broadcast %cst_60 : f32 to vector<128x128xf32>
      %107 = arith.maximumf %105, %106 : vector<128x128xf32>
      %108 = arith.divf %89, %107 : vector<128x128xf32>
      %c0_61 = arith.constant 0 : index
      %c0_62 = arith.constant 0 : index
      %109 = vector.load %arg15[%c0_61, %c0_62] : memref<128x128xf32, #tpu.memory_space<vmem>>, vector<128x128xf32>
      tpu.vector_store %arg15[%c0_61, %c0_62], %108 {strides = array<i32>} : memref<128x128xf32, #tpu.memory_space<vmem>>, vector<128x128xf32>,
      %c0_63 = arith.constant 0 : index
      %c0_64 = arith.constant 0 : index
      %110 = vector.load %arg13[%c0_63, %c0_64] : memref<8x16xf32, #tpu.memory_space<vmem>>, vector<8x16xf32>
      %111 = arith.mulf %110, %110 : vector<8x16xf32>
      %cst_65 = arith.constant dense<0.000000e+00> : vector<8xf32>
      %112 = vector.multi_reduction <add>, %111, %cst_65 [1] : vector<8x16xf32> to vector<8xf32>
      %113 = vector.shape_cast %112 : vector<8xf32> to vector<8x1xf32>
      %cst_66 = arith.constant 1.000000e-24 : f32
      %114 = vector.broadcast %cst_66 : f32 to vector<8x1xf32>
      %115 = arith.maximumf %113, %114 : vector<8x1xf32>
      %116 = math.rsqrt %115 : vector<8x1xf32>
      %117 = vector.broadcast %116 : vector<8x1xf32> to vector<8x16xf32>
      %118 = arith.mulf %110, %117 : vector<8x16xf32>
      %119 = arith.truncf %70 : vector<128x16xf32> to vector<128x16xbf16>
      %120 = arith.truncf %118 : vector<8x16xf32> to vector<8x16xbf16>
      %cst_67 = arith.constant dense<0.000000e+00> : vector<128x8xf32>
      %121 = tpu.matmul %119, %120, %cst_67 {dimension_numbers = #tpu.dot_dimension_numbers<[1], [1], [0], [0], [0, 0, 1, 0], [], []>} : vector<128x16xbf16>, vector<8x16xbf16>, vector<128x8xf32> -> vector<128x8xf32>
      %cst_68 = arith.constant dense<0xFF800000> : vector<128xf32>
      %122 = vector.multi_reduction <maximumf>, %121, %cst_68 [1] : vector<128x8xf32> to vector<128xf32>
      %123 = vector.shape_cast %122 : vector<128xf32> to vector<128x1xf32>
      %124 = vector.broadcast %123 : vector<128x1xf32> to vector<128x8xf32>
      %125 = arith.subf %121, %124 : vector<128x8xf32>
      %126 = math.exp %125 : vector<128x8xf32>
      %cst_69 = arith.constant dense<0.000000e+00> : vector<128xf32>
      %127 = vector.multi_reduction <add>, %126, %cst_69 [1] : vector<128x8xf32> to vector<128xf32>
      %128 = vector.shape_cast %127 : vector<128xf32> to vector<128x1xf32>
      %129 = tpu.reciprocal %128 {approx = true} : vector<128x1xf32> -> vector<128x1xf32>
      %130 = vector.broadcast %129 : vector<128x1xf32> to vector<128x8xf32>
      %131 = arith.mulf %126, %130 : vector<128x8xf32>
      %c0_70 = arith.constant 0 : index
      %c0_71 = arith.constant 0 : index
      %132 = vector.load %arg17[%c0_70, %c0_71] : memref<128x8xf32, #tpu.memory_space<vmem>>, vector<128x8xf32>
      tpu.vector_store %arg17[%c0_70, %c0_71], %131 {strides = array<i32>} : memref<128x8xf32, #tpu.memory_space<vmem>>, vector<128x8xf32>,
    } else {
    }
    return
  }
  func.func @transform_0(%arg0: i32) -> (i32, i32) {
    %c0_i32 = arith.constant 0 : i32
    %c0_i32_0 = arith.constant 0 : i32
    return %arg0, %c0_i32 : i32, i32
  }
  func.func @transform_1(%arg0: i32) -> (i32, i32) {
    %c0_i32 = arith.constant 0 : i32
    %c0_i32_0 = arith.constant 0 : i32
    return %c0_i32, %arg0 : i32, i32
  }
  func.func @transform_2(%arg0: i32) -> (i32, i32) {
    %c0_i32 = arith.constant 0 : i32
    %c0_i32_0 = arith.constant 0 : i32
    %c0_i32_1 = arith.constant 0 : i32
    return %c0_i32, %c0_i32_0 : i32, i32
  }
  func.func @transform_3(%arg0: i32) -> (i32, i32) {
    %c0_i32 = arith.constant 0 : i32
    %c0_i32_0 = arith.constant 0 : i32
    %c0_i32_1 = arith.constant 0 : i32
    return %c0_i32, %c0_i32_0 : i32, i32
  }
  func.func @transform_4(%arg0: i32) -> (i32, i32) {
    %c0_i32 = arith.constant 0 : i32
    %c0_i32_0 = arith.constant 0 : i32
    %c0_i32_1 = arith.constant 0 : i32
    return %c0_i32, %c0_i32_0 : i32, i32
  }
  func.func @transform_5(%arg0: i32) -> (i32, i32) {
    %c0_i32 = arith.constant 0 : i32
    %c0_i32_0 = arith.constant 0 : i32
    %c0_i32_1 = arith.constant 0 : i32
    return %c0_i32, %c0_i32_0 : i32, i32
  }
  func.func @transform_6(%arg0: i32) -> (i32, i32) {
    %c0_i32 = arith.constant 0 : i32
    %c0_i32_0 = arith.constant 0 : i32
    %c0_i32_1 = arith.constant 0 : i32
    return %c0_i32, %c0_i32_0 : i32, i32
  }
  func.func @transform_7(%arg0: i32) -> (i32, i32) {
    %c0_i32 = arith.constant 0 : i32
    %c0_i32_0 = arith.constant 0 : i32
    %c0_i32_1 = arith.constant 0 : i32
    return %c0_i32, %c0_i32_0 : i32, i32
  }
  func.func @transform_8(%arg0: i32) -> (i32, i32) {
    %c0_i32 = arith.constant 0 : i32
    %c0_i32_0 = arith.constant 0 : i32
    %c0_i32_1 = arith.constant 0 : i32
    return %c0_i32, %c0_i32_0 : i32, i32
  }
  func.func @transform_9(%arg0: i32) -> (i32, i32) {
    %c0_i32 = arith.constant 0 : i32
    %c0_i32_0 = arith.constant 0 : i32
    %c0_i32_1 = arith.constant 0 : i32
    return %c0_i32, %c0_i32_0 : i32, i32
  }
  func.func @transform_10(%arg0: i32) -> (i32, i32) {
    %c0_i32 = arith.constant 0 : i32
    %c0_i32_0 = arith.constant 0 : i32
    %c0_i32_1 = arith.constant 0 : i32
    return %c0_i32, %c0_i32_0 : i32, i32
  }
  func.func @transform_11(%arg0: i32) -> (i32, i32) {
    %c0_i32 = arith.constant 0 : i32
    %c0_i32_0 = arith.constant 0 : i32
    %c0_i32_1 = arith.constant 0 : i32
    return %c0_i32, %c0_i32_0 : i32, i32
  }
  func.func @transform_12(%arg0: i32) -> (i32, i32) {
    %c0_i32 = arith.constant 0 : i32
    %c0_i32_0 = arith.constant 0 : i32
    %c0_i32_1 = arith.constant 0 : i32
    return %c0_i32, %c0_i32_0 : i32, i32
  }
  func.func @transform_13(%arg0: i32) -> (i32, i32) {
    %c0_i32 = arith.constant 0 : i32
    %c0_i32_0 = arith.constant 0 : i32
    return %arg0, %c0_i32 : i32, i32
  }
  func.func @transform_14(%arg0: i32) -> (i32, i32) {
    %c0_i32 = arith.constant 0 : i32
    %c0_i32_0 = arith.constant 0 : i32
    %c0_i32_1 = arith.constant 0 : i32
    return %c0_i32, %c0_i32_0 : i32, i32
  }
  func.func @transform_15(%arg0: i32) -> (i32, i32) {
    %c0_i32 = arith.constant 0 : i32
    %c0_i32_0 = arith.constant 0 : i32
    %c0_i32_1 = arith.constant 0 : i32
    return %c0_i32, %c0_i32_0 : i32, i32
  }
  func.func @transform_16(%arg0: i32) -> (i32, i32) {
    %c0_i32 = arith.constant 0 : i32
    %c0_i32_0 = arith.constant 0 : i32
    %c0_i32_1 = arith.constant 0 : i32
    return %c0_i32, %c0_i32_0 : i32, i32
  }
}

</mosaic_0001>

<bundles_post_ra>
// kernel: tpu_custom_call.1
= control target key start
LH: loop header
LB: loop body
LE: loop exit
PB: predicated region body
PF: predicated region fallthrough
CT: control target
= control target key end

     0   :  { %s7235_s0 = inlined_call_operand.hbm [shape: f32[128,128], index: 0, kind: input, shape index: {}]   ;;  %s7236_s1 = inlined_call_operand.vmem [shape: s32[1,128], index: 1, kind: input, shape index: {}]   ;;  %s7237_s2 = inlined_call_operand.vmem [shape: bf16[128,512], index: 2, kind: input, shape index: {}]   ;;  %s7238_s3 = inlined_call_operand.hbm [shape: bf16[1,512], index: 3, kind: input, shape index: {}]   ;;  %s7239_s4 = inlined_call_operand.vmem [shape: bf16[512,16], index: 4, kind: input, shape index: {}]   ;;  %s7240_s5 = inlined_call_operand.hbm [shape: bf16[1,16], index: 5, kind: input, shape index: {}]   ;;  %s7241_s6 = inlined_call_operand.vmem [shape: bf16[16,512], index: 6, kind: input, shape index: {}]   ;;  %s7242_s7 = inlined_call_operand.hbm [shape: bf16[1,512], index: 7, kind: input, shape index: {}]   ;;  %s7243_s8 = inlined_call_operand.hbm [shape: bf16[512,128], index: 8, kind: input, shape index: {}]   ;;  %s7244_s9 = inlined_call_operand.hbm [shape: bf16[1,128], index: 9, kind: input, shape index: {}]   ;;  %s7245_s10 = inlined_call_operand.vmem [shape: f32[2,32], index: 10, kind: input, shape index: {}]   ;;  %s7246_s11 = inlined_call_operand.hbm [shape: s32[1,128], index: 11, kind: input, shape index: {}]   ;;  %s7247_s12 = inlined_call_operand.vmem [shape: f32[8,16], index: 12, kind: input, shape index: {}]   ;;  %s7248_s13 = inlined_call_operand.hbm [shape: f32[128,128], index: 13, kind: output, shape index: {0}]   ;;  %s7249_s14 = inlined_call_operand.hbm [shape: f32[128,128], index: 14, kind: output, shape index: {1}]   ;;  %s7250_s15 = inlined_call_operand.vmem [shape: f32[128,16], index: 15, kind: output, shape index: {2}]   ;;  %s7251_s16 = inlined_call_operand.vmem [shape: f32[128,8], index: 16, kind: output, shape index: {3}]  }
   0x1   :  { %7254 = sst [smem:[#allocation25_spill]] %s7235_s0 }
   0x2   :  { %22 = vsyncpa [#allocation5], 0 }
   0x3   :  { %23 = vsyncpa [#allocation8], 0 }
   0x4   :  { %24 = vsyncpa [#allocation11], 0 }
   0x5   :  { %25 = vsyncpa [#allocation14], 0 }
   0x6   :  { %26 = vsyncpa [#allocation6], 0  ;;  %s50_s23 = sshll.u32 %s7238_s3, 4  ;;  %s51_s23 = int_to_ptr.hbm [resolvable:$true] %s50_s23 }
   0x7   :  { %27 = vsyncpa [#allocation18], 0  ;;  %s4789_s24 = smov [#allocation7]   ;;  %s76_s28 = sshll.u32 %s7242_s7, 4  ;;  %s77_s28 = int_to_ptr.hbm [resolvable:$true] %s76_s28 }
   0x8   :  { %s52_s25 = sshll.u32 %s4789_s24, 4  ;;  %s4790_s29 = smov [#allocation10]   ;;  %s53_s25 = int_to_ptr.vmem [resolvable:$true] %s52_s25 }
   0x9   :  { %55 = dma.hbm_to_vmem [thread:$0]  %s51_s23, 64, %s53_s25, [#allocation8]  }
   0xa   :  { %s78_s30 = sshll.u32 %s4790_s29, 4  ;;  %s100_s18 = sshll.u32 %s7244_s9, 4  ;;  %s79_s30 = int_to_ptr.vmem [resolvable:$true] %s78_s30  ;;  %s101_s18 = int_to_ptr.hbm [resolvable:$true] %s100_s18 }
   0xb   :  { %81 = dma.hbm_to_vmem [thread:$0]  %s77_s28, 64, %s79_s30, [#allocation11]  }
   0xc   :  { %s7255_s20 = sld [smem:[#allocation25_spill]]  ;;  %s4791_s22 = smov [#allocation13]  }
   0xd   :  { %s102_s24 = sshll.u32 %s4791_s22, 4  ;;  %s4792_s7 = smov [#allocation4]   ;;  %s103_s24 = int_to_ptr.vmem [resolvable:$true] %s102_s24 }
   0xe   :  { %105 = dma.hbm_to_vmem [thread:$0]  %s101_s18, 16, %s103_s24, [#allocation14]  }
   0xf   :  { %s34_s23 = sshll.u32 %s4792_s7, 4  ;;  %s4793_s25 = smov 128   ;;  %s35_s23 = int_to_ptr.vmem [resolvable:$true] %s34_s23 }
  0x10   :  { %s4794_s26 = smov 8   ;;  %s63_s28 = sshll.u32 %s7240_s5, 4  ;;  %s64_s28 = int_to_ptr.hbm [resolvable:$true] %s63_s28 }
  0x11   :  { %s4795_s29 = smov [#allocation9]   ;;  %s86_s18 = sshll.u32 %s7243_s8, 4  ;;  %s87_s18 = int_to_ptr.hbm [resolvable:$true] %s86_s18 }
  0x12   :  { %s32_s21 = sshll.u32 %s7255_s20, 4  ;;  %s65_s30 = sshll.u32 %s4795_s29, 4  ;;  %s33_s21 = int_to_ptr.hbm [resolvable:$true] %s32_s21  ;;  %s66_s30 = int_to_ptr.vmem [resolvable:$true] %s65_s30 }
  0x13   :  { %40 = dma.hbm_to_vmem [thread:$0]  %s33_s21, 2048, %s35_s23, [#allocation5], %s4793_s25, %s4793_s25, %s4794_s26  }
  0x14   :  { %68 = dma.hbm_to_vmem [thread:$0]  %s64_s28, 16, %s66_s30, [#allocation8]  }
  0x15   :  { %s4796_s3 = smov [#allocation12]   ;;  %s4797_s20 = smov 64  }
  0x16   :  { %s88_s19 = sshll.u32 %s4796_s3, 4  ;;  %s4798_s22 = smov 4   ;;  %s89_s19 = int_to_ptr.vmem [resolvable:$true] %s88_s19 }
  0x17   :  { %94 = dma.hbm_to_vmem [thread:$0]  %s87_s18, 4096, %s89_s19, [#allocation11], %s4797_s20, %s4797_s20, %s4798_s22  }
  0x18   :  { %s113_s5 = sshll.u32 %s7246_s11, 4  ;;  %s4799_s7 = smov [#allocation15]   ;;  %s114_s5 = int_to_ptr.hbm [resolvable:$true] %s113_s5 }
  0x19   :  { %s115_s23 = sshll.u32 %s4799_s7, 4  ;;  %s116_s23 = int_to_ptr.vmem [resolvable:$true] %s115_s23 }
  0x1a   :  { %118 = dma.hbm_to_vmem [thread:$0]  %s114_s5, 16, %s116_s23, [#allocation14]  }
  0x1b   :  { %4777 = dma.done.wait [#allocation5], 2048  }
  0x1c   :  { %4778 = vsyncadd [#allocation5], 4294965248 }
  0x1d   :  { %4779 = dma.done.wait [#allocation8], 80  }
  0x1e   :  { %4780 = vsyncadd [#allocation8], 4294967216 }
  0x1f   :  { %4781 = dma.done.wait [#allocation11], 4160  }
  0x20   :  { %4782 = vsyncadd [#allocation11], 4294963136 }
  0x21   :  { %4783 = dma.done.wait [#allocation14], 32  }
  0x22   :  { %4784 = vsyncadd [#allocation14], 4294967264  ;;  %v3873_v0 = vld [vmem:[%s7237_s2 + $0xe0] sm:$0xf]  ;;  %v4279_v1 = vld [vmem:[%s7237_s2 + $0xec] sm:$0xf0] }
  0x23   :  { %v3857_v2 = vld [vmem:[%s7237_s2 + $0xc0] sm:$0xf]  ;;  %v3874_v3 = vor.u32 %v4279_v1, %v3873_v0  ;;  %v4275_v4 = vld [vmem:[%s7237_s2 + $0xcc] sm:$0xf0]  ;;  %v189_v25 = vld [vmem:[#allocation4 + $0x8] sm:$0xff]  ;;  %vm154_vm0 = vcmask 130048  }
  0x24   :  { %v3858_v5 = vor.u32 %v4275_v4, %v3857_v2  ;;  %v3841_v6 = vld [vmem:[%s7237_s2 + $0xa0] sm:$0xf]  ;;  %v4271_v7 = vld [vmem:[%s7237_s2 + $0xac] sm:$0xf0]  ;;  %v193_v27 = vld [vmem:[#allocation4 + $0x28] sm:$0xff]  ;;  %s4805_s28 = smov [#allocation17]  }
  0x25   :  { %419 = vmatpush.bf16.msra.mxu0 %v3874_v3  ;;  %4349 = vmatpush.bf16.msra.mxu1 %v3874_v3  ;;  %v3842_v8 = vor.u32 %v4271_v7, %v3841_v6  ;;  %v3825_v9 = vld [vmem:[%s7237_s2 + $0x80] sm:$0xf]  ;;  %v4267_v10 = vld [vmem:[%s7237_s2 + $0x8c] sm:$0xf0]  ;;  %v4277_v30 = vld [vmem:[%s7237_s2 + $0xe4] sm:$0xf] }
  0x26   :  { %v3826_v11 = vor.u32 %v4267_v10, %v3825_v9  ;;  %v3809_v12 = vld [vmem:[%s7237_s2 + $0x60] sm:$0xf]  ;;  %v4263_v13 = vld [vmem:[%s7237_s2 + $0x6c] sm:$0xf0]  ;;  %v3875_v31 = vld [vmem:[%s7237_s2 + $0xf0] sm:$0xf0] }
  0x27   :  { %v3810_v14 = vor.u32 %v4263_v13, %v3809_v12  ;;  %v3793_v15 = vld [vmem:[%s7237_s2 + $0x40] sm:$0xf]  ;;  %v4259_v16 = vld [vmem:[%s7237_s2 + $0x4c] sm:$0xf0]  ;;  %v3878_v32 = vor.u32 %v4277_v30, %v3875_v31  ;;  %v191_v34 = vld [vmem:[#allocation4 + $0x18] sm:$0xff]  ;;  %s3728_s11 = sshll.u32 %s4805_s28, 4  ;;  %s3729_s11 = int_to_ptr.vmem [resolvable:$true] %s3728_s11 }
  0x28   :  { %v3794_v17 = vor.u32 %v4259_v16, %v3793_v15  ;;  %v3777_v18 = vld [vmem:[%s7237_s2 + $0x20] sm:$0xf]  ;;  %v4255_v19 = vld [vmem:[%s7237_s2 + $0x2c] sm:$0xf0]  ;;  %v195_v36 = vld [vmem:[#allocation4 + $0x38] sm:$0xff]  ;;  %s3730_s30 = sshll.u32 %s7249_s14, 4  ;;  %s3731_s30 = int_to_ptr.hbm [resolvable:$true] %s3730_s30 }
  0x29   :  { %420 = vmatpush.bf16.msra.mxu0 %v3858_v5  ;;  %4350 = vmatpush.bf16.msra.mxu1 %v3858_v5  ;;  %v3778_v20 = vor.u32 %v4255_v19, %v3777_v18  ;;  %v3761_v21 = vld [vmem:[%s7237_s2] sm:$0xf]  ;;  %v4251_v22 = vld [vmem:[%s7237_s2 + $0xc] sm:$0xf0]  ;;  %v3881_v39 = vld [vmem:[%s7237_s2 + $0xe8] sm:$0xf] }
  0x2a   :  { %v188_v23 = vld [vmem:[#allocation4] sm:$0xff]  ;;  %v3762_v24 = vor.u32 %v4251_v22, %v3761_v21  ;;  %v190_v33 = vld [vmem:[#allocation4 + $0x10] sm:$0xff]  ;;  %v4280_v40 = vld [vmem:[%s7237_s2 + $0xf4] sm:$0xf0] }
  0x2b   :  { %v192_v26 = vld [vmem:[#allocation4 + $0x20] sm:$0xff]  ;;  %v4963_v28 = vpack.c.bf16 %v189_v25, %v188_v23  ;;  %v194_v35 = vld [vmem:[#allocation4 + $0x30] sm:$0xff]  ;;  %v4975_v37 = vpack.c.bf16 %v191_v34, %v190_v33  ;;  %v3882_v42 = vor.u32 %v4280_v40, %v3881_v39  ;;  %v4278_v44 = vld [vmem:[%s7237_s2 + $0xec] sm:$0xf] }
  0x2c   :  { %v4965_v29 = vpack.c.bf16 %v193_v27, %v192_v26  ;;  %v4977_v38 = vpack.c.bf16 %v195_v36, %v194_v35  ;;  %v4273_v41 = vld [vmem:[%s7237_s2 + $0xc4] sm:$0xf]  ;;  %v3859_v43 = vld [vmem:[%s7237_s2 + $0xd0] sm:$0xf0]  ;;  %v3883_v45 = vld [vmem:[%s7237_s2 + $0xf8] sm:$0xf0] }
  0x2d   :  { %421 = vmatpush.bf16.msra.mxu0 %v3842_v8  ;;  %4351 = vmatpush.bf16.msra.mxu1 %v3842_v8  ;;  %v3862_v46 = vor.u32 %v4273_v41, %v3859_v43  ;;  %v3886_v47 = vor.u32 %v4278_v44, %v3883_v45  ;;  %v3865_v48 = vld [vmem:[%s7237_s2 + $0xc8] sm:$0xf]  ;;  %v4276_v49 = vld [vmem:[%s7237_s2 + $0xd4] sm:$0xf0]  ;;  %v4274_v50 = vld [vmem:[%s7237_s2 + $0xcc] sm:$0xf] }
  0x2e   :  { %517 = vmatpush.bf16.msra.mxu2 %v3882_v42  ;;  %v3866_v51 = vor.u32 %v4276_v49, %v3865_v48  ;;  %v3867_v52 = vld [vmem:[%s7237_s2 + $0xd8] sm:$0xf0]  ;;  %v3849_v54 = vld [vmem:[%s7237_s2 + $0xa8] sm:$0xf]  ;;  %v4272_v55 = vld [vmem:[%s7237_s2 + $0xb4] sm:$0xf0] }
  0x2f   :  { %566 = vmatpush.bf16.msra.mxu3 %v3886_v47  ;;  %v3870_v53 = vor.u32 %v4274_v50, %v3867_v52  ;;  %v3850_v56 = vor.u32 %v4272_v55, %v3849_v54  ;;  %v196_v57 = vld [vmem:[#allocation4 + $0x40] sm:$0xff]  ;;  %v197_v58 = vld [vmem:[#allocation4 + $0x48] sm:$0xff]  ;;  %v3851_v61 = vld [vmem:[%s7237_s2 + $0xb8] sm:$0xf0] }
  0x30   :  { %v5017_v59 = vpack.c.bf16 %v197_v58, %v196_v57  ;;  %v4270_v60 = vld [vmem:[%s7237_s2 + $0xac] sm:$0xf]  ;;  %v3833_v63 = vld [vmem:[%s7237_s2 + $0x88] sm:$0xf]  ;;  %v4268_v0 = vld [vmem:[%s7237_s2 + $0x94] sm:$0xf0] }
  0x31   :  { %422 = vmatpush.bf16.msra.mxu0 %v3826_v11  ;;  %4352 = vmatpush.bf16.msra.mxu1 %v3826_v11  ;;  %v3854_v62 = vor.u32 %v4270_v60, %v3851_v61  ;;  %v4269_v1 = vld [vmem:[%s7237_s2 + $0xa4] sm:$0xf]  ;;  %v3834_v2 = vor.u32 %v4268_v0, %v3833_v63  ;;  %v3843_v3 = vld [vmem:[%s7237_s2 + $0xb0] sm:$0xf0]  ;;  %v4266_v4 = vld [vmem:[%s7237_s2 + $0x8c] sm:$0xf] }
  0x32   :  { %518 = vmatpush.bf16.msra.mxu2 %v3866_v51  ;;  %v3835_v5 = vld [vmem:[%s7237_s2 + $0x98] sm:$0xf0]  ;;  %v3846_v6 = vor.u32 %v4269_v1, %v3843_v3  ;;  %v3817_v8 = vld [vmem:[%s7237_s2 + $0x68] sm:$0xf]  ;;  %v4264_v9 = vld [vmem:[%s7237_s2 + $0x74] sm:$0xf0] }
  0x33   :  { %567 = vmatpush.bf16.msra.mxu3 %v3870_v53  ;;  %v3838_v7 = vor.u32 %v4266_v4, %v3835_v5  ;;  %v4262_v10 = vld [vmem:[%s7237_s2 + $0x6c] sm:$0xf]  ;;  %v3818_v11 = vor.u32 %v4264_v9, %v3817_v8  ;;  %v3819_v12 = vld [vmem:[%s7237_s2 + $0x78] sm:$0xf0]  ;;  %v3801_v13 = vld [vmem:[%s7237_s2 + $0x48] sm:$0xf] }
  0x34   :  { %v4265_v15 = vld [vmem:[%s7237_s2 + $0x84] sm:$0xf]  ;;  %v3827_v16 = vld [vmem:[%s7237_s2 + $0x90] sm:$0xf0]  ;;  %v4258_v19 = vld [vmem:[%s7237_s2 + $0x4c] sm:$0xf] }
  0x35   :  { %423 = vmatpush.bf16.msra.mxu0 %v3810_v14  ;;  %4353 = vmatpush.bf16.msra.mxu1 %v3810_v14  ;;  %v4260_v14 = vld [vmem:[%s7237_s2 + $0x54] sm:$0xf0]  ;;  %v3830_v18 = vor.u32 %v4265_v15, %v3827_v16  ;;  %v3785_v22 = vld [vmem:[%s7237_s2 + $0x28] sm:$0xf]  ;;  %v4261_v31 = vld [vmem:[%s7237_s2 + $0x64] sm:$0xf] }
  0x36   :  { %519 = vmatpush.bf16.msra.mxu2 %v3850_v56  ;;  %v3802_v21 = vor.u32 %v4260_v14, %v3801_v13  ;;  %v4256_v23 = vld [vmem:[%s7237_s2 + $0x34] sm:$0xf0]  ;;  %v4254_v33 = vld [vmem:[%s7237_s2 + $0x2c] sm:$0xf]  ;;  %v3787_v35 = vld [vmem:[%s7237_s2 + $0x38] sm:$0xf0] }
  0x37   :  { %568 = vmatpush.bf16.msra.mxu3 %v3854_v62  ;;  %v199_v25 = vld [vmem:[#allocation4 + $0x58] sm:$0xff]  ;;  %v3786_v27 = vor.u32 %v4256_v23, %v3785_v22  ;;  %v3790_v36 = vor.u32 %v4254_v33, %v3787_v35  ;;  %v3769_v39 = vld [vmem:[%s7237_s2 + $0x8] sm:$0xf]  ;;  %v4257_v41 = vld [vmem:[%s7237_s2 + $0x44] sm:$0xf] }
  0x38   :  { %v4252_v40 = vld [vmem:[%s7237_s2 + $0x14] sm:$0xf0]  ;;  %v3795_v43 = vld [vmem:[%s7237_s2 + $0x50] sm:$0xf0]  ;;  %v4250_v44 = vld [vmem:[%s7237_s2 + $0xc] sm:$0xf] }
  0x39   :  { %424 = vmatpush.bf16.msra.mxu0 %v3794_v17  ;;  %4354 = vmatpush.bf16.msra.mxu1 %v3794_v17  ;;  %v3822_v17 = vor.u32 %v4262_v10, %v3819_v12  ;;  %v3770_v42 = vor.u32 %v4252_v40, %v3769_v39  ;;  %v3771_v45 = vld [vmem:[%s7237_s2 + $0x18] sm:$0xf0]  ;;  %v4253_v48 = vld [vmem:[%s7237_s2 + $0x24] sm:$0xf]  ;;  %v3779_v49 = vld [vmem:[%s7237_s2 + $0x30] sm:$0xf0] }
  0x3a   :  { %520 = vmatpush.bf16.msra.mxu2 %v3834_v2  ;;  %v3774_v47 = vor.u32 %v4250_v44, %v3771_v45  ;;  %v3782_v50 = vor.u32 %v4253_v48, %v3779_v49  ;;  %v4249_v51 = vld [vmem:[%s7237_s2 + $0x4] sm:$0xf]  ;;  %v3763_v52 = vld [vmem:[%s7237_s2 + $0x10] sm:$0xf0]  ;;  %v201_v54 = vld [vmem:[#allocation4 + $0x68] sm:$0xff] }
  0x3b   :  { %569 = vmatpush.bf16.msra.mxu3 %v3838_v7  ;;  %v200_v53 = vld [vmem:[#allocation4 + $0x60] sm:$0xff]  ;;  %v3766_v55 = vor.u32 %v4249_v51, %v3763_v52  ;;  %v4288_v57 = vld [vmem:[%s7239_s4 + $0x38] sm:$0xff]  ;;  %v202_v58 = vld [vmem:[#allocation4 + $0x70] sm:$0xff] }
  0x3c   :  { %v5127_v56 = vpack.c.bf16 %v201_v54, %v200_v53  ;;  %v203_v60 = vld [vmem:[#allocation4 + $0x78] sm:$0xff]  ;;  %v4287_v62 = vld [vmem:[%s7239_s4 + $0x30] sm:$0xff]  ;;  %v4286_v63 = vld [vmem:[%s7239_s4 + $0x28] sm:$0xff] }
  0x3d   :  { %425 = vmatpush.bf16.msra.mxu0 %v3778_v20  ;;  %4355 = vmatpush.bf16.msra.mxu1 %v3778_v20  ;;  %v3803_v20 = vld [vmem:[%s7237_s2 + $0x58] sm:$0xf0]  ;;  %v5135_v61 = vpack.c.bf16 %v203_v60, %v202_v58  ;;  %v4285_v0 = vld [vmem:[%s7239_s4 + $0x20] sm:$0xff]  ;;  %v4283_v2 = vld [vmem:[%s7239_s4 + $0x10] sm:$0xff] }
  0x3e   :  { %521 = vmatpush.bf16.msra.mxu2 %v3818_v11  ;;  %v3806_v26 = vor.u32 %v4258_v19, %v3803_v20  ;;  %v4284_v1 = vld [vmem:[%s7239_s4 + $0x18] sm:$0xff]  ;;  %v4282_v3 = vld [vmem:[%s7239_s4 + $0x8] sm:$0xff]  ;;  %v4281_v4 = vld [vmem:[%s7239_s4] sm:$0xff] }
  0x3f   :  { %570 = vmatpush.bf16.msra.mxu3 %v3822_v17  ;;  %v4304_v5 = vld [vmem:[%s7239_s4 + $0xb8] sm:$0xff]  ;;  %v4303_v9 = vld [vmem:[%s7239_s4 + $0xb0] sm:$0xff]  ;;  %v4302_v20 = vld [vmem:[%s7239_s4 + $0xa8] sm:$0xff] }
  0x40   :  { %v4296_v7 = vld [vmem:[%s7239_s4 + $0x78] sm:$0xff]  ;;  %v4295_v19 = vld [vmem:[%s7239_s4 + $0x70] sm:$0xff]  ;;  %v4294_v33 = vld [vmem:[%s7239_s4 + $0x68] sm:$0xff] }
  0x41   :  { %426 = vmatpush.bf16.msra.mxu0 %v3762_v24  ;;  %4356 = vmatpush.bf16.msra.mxu1 %v3762_v24  ;;  %v198_v24 = vld [vmem:[#allocation4 + $0x50] sm:$0xff]  ;;  %v4293_v44 = vld [vmem:[%s7239_s4 + $0x60] sm:$0xff]  ;;  %v4300_v45 = vld [vmem:[%s7239_s4 + $0x98] sm:$0xff] }
  0x42   :  { %522 = vmatpush.bf16.msra.mxu2 %v3802_v21  ;;  %v5080_v30 = vpack.c.bf16 %v199_v25, %v198_v24  ;;  %v5238_v52 = vld [vmem:[%s7239_s4 + $0xe0] sm:$0xff]  ;;  %v4292_v53 = vld [vmem:[%s7239_s4 + $0x58] sm:$0xff]  ;;  %v4291_v60 = vld [vmem:[%s7239_s4 + $0x50] sm:$0xff] }
  0x43   :  { %571 = vmatpush.bf16.msra.mxu3 %v3806_v26 }
  0x44   :  { %427 = vmatmul.bf16.vlgmr.msra.gmra.mxu0 %v4963_v28  ;;  %437 = vmatmul.bf16.vlgmr.msra.gmra.mxu1 %v4965_v29 }
  0x45   :  { %468 = vmatpush.bf16.msrb.mxu1 %v3878_v32  ;;  %v3811_v32 = vld [vmem:[%s7237_s2 + $0x70] sm:$0xf0]  ;;  %970 = vmatpush.bf16.msrb.mxu0 %v4288_v57 }
  0x46   :  { %523 = vmatpush.bf16.msra.mxu2 %v3786_v27  ;;  %v3814_v34 = vor.u32 %v4261_v31, %v3811_v32  ;;  %v5205_v32 = vld [vmem:[%s7239_s4 + $0xf0] sm:$0xff] }
  0x47   :  { %572 = vmatpush.bf16.msra.mxu3 %v3790_v36  ;;  %v4299_v57 = vld [vmem:[%s7239_s4 + $0x90] sm:$0xff] }
  0x49   :  { %469 = vmatpush.bf16.msrb.mxu1 %v3862_v46  ;;  %v3798_v46 = vor.u32 %v4257_v41, %v3795_v43  ;;  %971 = vmatpush.bf16.msrb.mxu0 %v4287_v62  ;;  %v5222_v43 = vld [vmem:[%s7239_s4 + $0xe8] sm:$0xff] }
  0x4a   :  { %524 = vmatpush.bf16.msra.mxu2 %v3770_v42 }
  0x4b   :  { %573 = vmatpush.bf16.msra.mxu3 %v3774_v47 }
  0x4d   :  { %470 = vmatpush.bf16.msrb.mxu1 %v3846_v6  ;;  %525 = vmatmul.bf16.vlgmr.msra.gmra.mxu2 %v4963_v28 }
  0x4e   :  { %574 = vmatmul.bf16.vlgmr.msra.gmra.mxu3 %v4963_v28  ;;  %972 = vmatpush.bf16.msrb.mxu0 %v4286_v63 }
  0x4f   :  { %4357 = vmatpush.bf16.msrb.mxu2 %v4304_v5 }
  0x51   :  { %471 = vmatpush.bf16.msrb.mxu1 %v3830_v18  ;;  %v5188_v18 = vld [vmem:[%s7239_s4 + $0xf8] sm:$0xff] }
  0x52   :  { %973 = vmatpush.bf16.msrb.mxu0 %v4285_v0  ;;  %4365 = vmatpush.bf16.msrb.mxu3 %v5188_v18 }
  0x53   :  { %4358 = vmatpush.bf16.msrb.mxu2 %v4303_v9 }
  0x54   :  { %432 = vmatmul.bf16.gmra.mxu0 %v4975_v37  ;;  %442 = vmatmul.bf16.gmra.mxu1 %v4977_v38 }
  0x55   :  { %472 = vmatpush.bf16.msrb.mxu1 %v3814_v34  ;;  %v4301_v34 = vld [vmem:[%s7239_s4 + $0xa0] sm:$0xff] }
  0x56   :  { %974 = vmatpush.bf16.msrb.mxu0 %v4284_v1  ;;  %4366 = vmatpush.bf16.msrb.mxu3 %v5205_v32  ;;  %v4290_v1 = vld [vmem:[%s7239_s4 + $0x48] sm:$0xff] }
  0x57   :  { %4359 = vmatpush.bf16.msrb.mxu2 %v4302_v20 }
  0x59   :  { %473 = vmatpush.bf16.msrb.mxu1 %v3798_v46 }
  0x5a   :  { %975 = vmatpush.bf16.msrb.mxu0 %v4283_v2  ;;  %4367 = vmatpush.bf16.msrb.mxu3 %v5222_v43 }
  0x5b   :  { %4360 = vmatpush.bf16.msrb.mxu2 %v4301_v34 }
  0x5d   :  { %474 = vmatpush.bf16.msrb.mxu1 %v3782_v50  ;;  %530 = vmatmul.bf16.gmra.mxu2 %v4975_v37 }
  0x5e   :  { %579 = vmatmul.bf16.gmra.mxu3 %v4975_v37  ;;  %976 = vmatpush.bf16.msrb.mxu0 %v4282_v3 }
  0x5f   :  { %4361 = vmatpush.bf16.msrb.mxu2 %v4300_v45  ;;  %4368 = vmatpush.bf16.msrb.mxu3 %v5238_v52 }
  0x61   :  { %475 = vmatpush.bf16.msrb.mxu1 %v3766_v55 }
  0x62   :  { %977 = vmatpush.bf16.msrb.mxu0 %v4281_v4 }
  0x63   :  { %4362 = vmatpush.bf16.msrb.mxu2 %v4299_v57 }
  0x64   :  { %447 = vmatmul.bf16.gmra.mxu1 %v5017_v59 }
  0x65   :  { %1019 = vmatpush.bf16.msra.mxu1 %v4296_v7 }
  0x66   :  { %1068 = vmatpush.bf16.msra.mxu0 %v4304_v5 }
  0x69   :  { %1020 = vmatpush.bf16.msra.mxu1 %v4295_v19  ;;  %v5299_v19 = vld [vmem:[%s7239_s4 + $0xc8] sm:$0xff] }
  0x6a   :  { %1069 = vmatpush.bf16.msra.mxu0 %v4303_v9 }
  0x6d   :  { %535 = vmatmul.bf16.gmra.mxu2 %v4965_v29  ;;  %1021 = vmatpush.bf16.msra.mxu1 %v4294_v33 }
  0x6e   :  { %584 = vmatmul.bf16.gmra.mxu3 %v4965_v29  ;;  %1070 = vmatpush.bf16.msra.mxu0 %v4302_v20 }
  0x71   :  { %1022 = vmatpush.bf16.msra.mxu1 %v4293_v44 }
  0x72   :  { %1071 = vmatpush.bf16.msra.mxu0 %v4301_v34 }
  0x74   :  { %452 = vmatmul.bf16.gmra.mxu1 %v5080_v30 }
  0x75   :  { %1023 = vmatpush.bf16.msra.mxu1 %v4292_v53 }
  0x76   :  { %1072 = vmatpush.bf16.msra.mxu0 %v4300_v45 }
  0x79   :  { %1024 = vmatpush.bf16.msra.mxu1 %v4291_v60 }
  0x7a   :  { %1073 = vmatpush.bf16.msra.mxu0 %v4299_v57 }
  0x7d   :  { %540 = vmatmul.bf16.gmra.mxu2 %v4977_v38  ;;  %1025 = vmatpush.bf16.msra.mxu1 %v4290_v1 }
  0x7e   :  { %589 = vmatmul.bf16.gmra.mxu3 %v4977_v38 }
  0x84   :  { %457 = vmatmul.bf16.gmra.mxu1 %v5127_v56 }
  0x8d   :  { %545 = vmatmul.bf16.gmra.mxu2 %v5017_v59 }
  0x8e   :  { %594 = vmatmul.bf16.gmra.mxu3 %v5017_v59 }
  0x94   :  { %462 = vmatmul.bf16.gmra.mxu1 %v5135_v61 }
  0x9d   :  { %550 = vmatmul.bf16.gmra.mxu2 %v5080_v30 }
  0x9e   :  { %599 = vmatmul.bf16.gmra.mxu3 %v5080_v30 }
  0xa4   :  { %476 = vmatmul.bf16.vlgmr.msrb.gmra.mxu1 %v4963_v28  ;;  %v244_v28 = vld [vmem:[#allocation7] sm:$0xf] }
  0xa5   :  { %v5169_v6 = vunpack.c.l.bf16 %v244_v28  ;;  %v4289_v28 = vld [vmem:[%s7239_s4 + $0x40] sm:$0xff] }
  0xa6   :  { %1026 = vmatpush.bf16.msra.mxu1 %v4289_v28 }
  0xa7   :  { %v247_v8 = vperm.slane %v5169_v6, 0  ;;  %v250_v7 = vperm.slane %v5169_v6, 6  ;;  %v248_v44 = vperm.slane %v5169_v6, 2 }
  0xa9   :  { %v5179_v11 = vperm.slane %v247_v8, 0  ;;  %v5276_v8 = vld [vmem:[%s7239_s4 + $0xd8] sm:$0xff] }
  0xaa   :  { %4369 = vmatpush.bf16.msrb.mxu3 %v5276_v8 }
  0xad   :  { %555 = vmatmul.bf16.gmra.mxu2 %v5127_v56 }
  0xae   :  { %604 = vmatmul.bf16.gmra.mxu3 %v5127_v56 }
  0xb4   :  { %481 = vmatmul.bf16.gmra.mxu1 %v4975_v37 }
  0xbd   :  { %560 = vmatmul.bf16.gmra.mxu2 %v5135_v61 }
  0xbe   :  { %609 = vmatmul.bf16.gmra.mxu3 %v5135_v61 }
  0xc1   :  { %v428_v10 = vpop.f32.mrf.mxu0  ;;  %v438_v37 = vpop.f32.mrf.mxu1 }
  0xc2   :  { %v429_v12 = vadd.f32 %v428_v10, %v5179_v11  ;;  %v439_v36 = vadd.f32 %v438_v37, %v5179_v11 }
  0xc4   :  { %486 = vmatmul.bf16.gmra.mxu1 %v4965_v29  ;;  %v615_v16 = vmax.f32 %v429_v12, 0.0  ;;  %v631_v41 = vmax.f32 %v439_v36, 0.0 }
  0xc9   :  { %v430_v13 = vpop.f32.mrf.mxu0  ;;  %v440_v14 = vpop.f32.mrf.mxu1 }
  0xca   :  { %v431_v15 = vadd.f32 %v430_v13, %v5179_v11  ;;  %v441_v39 = vadd.f32 %v440_v14, %v5179_v11  ;;  %v4298_v13 = vld [vmem:[%s7239_s4 + $0x88] sm:$0xff] }
  0xcb   :  { %1074 = vmatpush.bf16.msra.mxu0 %v4298_v13  ;;  %4363 = vmatpush.bf16.msrb.mxu2 %v4298_v13 }
  0xcc   :  { %v619_v17 = vmax.f32 %v431_v15, 0.0  ;;  %v635_v42 = vmax.f32 %v441_v39, 0.0  ;;  %v5286_v15 = vperm.slane %v250_v7, 0 }
  0xce   :  { %v679_v29 = vpack.c.bf16 %v619_v17, %v615_v16  ;;  %v5291_v16 = vld [vmem:[%s7239_s4 + $0xd0] sm:$0xff] }
  0xcf   :  { %4370 = vmatpush.bf16.msrb.mxu3 %v5291_v16 }
  0xd0   :  { %978 = vmatmul.bf16.vlgmr.msrb.gmra.mxu0 %v679_v29  ;;  %v5243_v54 = vpop.f32.mrf.mxu2 }
  0xd1   :  { %v433_v21 = vpop.f32.mrf.mxu0  ;;  %v443_v22 = vpop.f32.mrf.mxu1 }
  0xd2   :  { %v434_v23 = vadd.f32 %v433_v21, %v5179_v11  ;;  %v444_v47 = vadd.f32 %v443_v22, %v5179_v11 }
  0xd3   :  { %4371 = vmatpush.bf16.msrb.mxu3 %v5299_v19 }
  0xd4   :  { %491 = vmatmul.bf16.gmra.mxu1 %v4977_v38  ;;  %v623_v27 = vmax.f32 %v434_v23, 0.0  ;;  %v639_v50 = vmax.f32 %v444_v47, 0.0 }
  0xd8   :  { %v5257_v62 = vpop.f32.mrf.mxu2 }
  0xd9   :  { %v435_v24 = vpop.f32.mrf.mxu0  ;;  %v445_v25 = vpop.f32.mrf.mxu1 }
  0xda   :  { %v436_v26 = vadd.f32 %v435_v24, %v5179_v11  ;;  %v446_v48 = vadd.f32 %v445_v25, %v5179_v11 }
  0xdc   :  { %v627_v31 = vmax.f32 %v436_v26, 0.0  ;;  %v643_v51 = vmax.f32 %v446_v48, 0.0 }
  0xde   :  { %v683_v38 = vpack.c.bf16 %v627_v31, %v623_v27  ;;  %v691_v55 = vpack.c.bf16 %v643_v51, %v639_v50 }
  0xe0   :  { %983 = vmatmul.bf16.gmra.mxu0 %v683_v38  ;;  %v531_v9 = vpop.f32.mrf.mxu2  ;;  %v4305_v38 = vld [vmem:[%s7239_s4 + $0xc0] sm:$0xff] }
  0xe1   :  { %v448_v35 = vpop.f32.mrf.mxu1  ;;  %4372 = vmatpush.bf16.msrb.mxu3 %v4305_v38 }
  0xe2   :  { %v449_v63 = vadd.f32 %v448_v35, %v5179_v11 }
  0xe4   :  { %496 = vmatmul.bf16.gmra.mxu1 %v5017_v59  ;;  %v687_v59 = vpack.c.bf16 %v635_v42, %v631_v41  ;;  %v647_v4 = vmax.f32 %v449_v63, 0.0 }
  0xe8   :  { %v533_v20 = vpop.f32.mrf.mxu2 }
  0xe9   :  { %v450_v40 = vpop.f32.mrf.mxu1 }
  0xea   :  { %v451_v0 = vadd.f32 %v450_v40, %v5179_v11 }
  0xec   :  { %v651_v5 = vmax.f32 %v451_v0, 0.0 }
  0xee   :  { %v695_v10 = vpack.c.bf16 %v651_v5, %v647_v4 }
  0xf0   :  { %988 = vmatmul.bf16.gmra.mxu0 %v687_v59  ;;  %v536_v40 = vpop.f32.mrf.mxu2 }
  0xf1   :  { %v453_v46 = vpop.f32.mrf.mxu1 }
  0xf2   :  { %v454_v21 = vadd.f32 %v453_v46, %v5179_v11  ;;  %v5316_v46 = vperm.slane %v248_v44, 0 }
  0xf4   :  { %501 = vmatmul.bf16.gmra.mxu1 %v5080_v30  ;;  %v5246_v30 = vpop.f32.mrf.mxu3  ;;  %v655_v34 = vmax.f32 %v454_v21, 0.0 }
  0xf9   :  { %v455_v49 = vpop.f32.mrf.mxu1 }
  0xfa   :  { %v456_v22 = vadd.f32 %v455_v49, %v5179_v11  ;;  %v538_v49 = vpop.f32.mrf.mxu2 }
  0xfc   :  { %v5264_v2 = vpop.f32.mrf.mxu3  ;;  %v659_v35 = vmax.f32 %v456_v22, 0.0 }
  0xfe   :  { %v699_v42 = vpack.c.bf16 %v659_v35, %v655_v34 }
 0x100   :  { %993 = vmatmul.bf16.gmra.mxu0 %v691_v55 }
 0x101   :  { %v5251_v58 = vpop.f32.mrf.mxu1 }
 0x104   :  { %506 = vmatmul.bf16.gmra.mxu1 %v5127_v56  ;;  %v249_v56 = vperm.slane %v5169_v6, 4  ;;  %v580_v12 = vpop.f32.mrf.mxu3 }
 0x105   :  { %v581_v29 = vadd.f32 %v580_v12, %v5286_v15 }
 0x106   :  { %v5278_v37 = vperm.slane %v249_v56, 0  ;;  %v541_v56 = vpop.f32.mrf.mxu2 }
 0x107   :  { %v626_v31 = vmax.f32 %v581_v29, 0.0 }
 0x108   :  { %v532_v17 = vadd.f32 %v531_v9, %v5278_v37  ;;  %v534_v24 = vadd.f32 %v533_v20, %v5278_v37  ;;  %v537_v47 = vadd.f32 %v536_v40, %v5278_v37  ;;  %v539_v51 = vadd.f32 %v538_v49, %v5278_v37 }
 0x109   :  { %v5266_v3 = vpop.f32.mrf.mxu1  ;;  %v542_v12 = vadd.f32 %v541_v56, %v5278_v37 }
 0x10a   :  { %v625_v23 = vmax.f32 %v532_v17, 0.0  ;;  %v629_v25 = vmax.f32 %v534_v24, 0.0  ;;  %v461_v6 = vadd.f32 %v5266_v3, %v5179_v11  ;;  %v633_v50 = vmax.f32 %v537_v47, 0.0 }
 0x10b   :  { %v637_v53 = vmax.f32 %v539_v51, 0.0 }
 0x10c   :  { %v582_v26 = vpop.f32.mrf.mxu3  ;;  %v685_v36 = vpack.c.bf16 %v629_v25, %v625_v23  ;;  %v667_v63 = vmax.f32 %v461_v6, 0.0 }
 0x10d   :  { %v583_v33 = vadd.f32 %v582_v26, %v5286_v15  ;;  %v689_v4 = vpack.c.bf16 %v637_v53, %v633_v50 }
 0x10e   :  { %v543_v17 = vpop.f32.mrf.mxu2 }
 0x10f   :  { %v630_v39 = vmax.f32 %v583_v33, 0.0  ;;  %v544_v21 = vadd.f32 %v543_v17, %v5278_v37 }
 0x110   :  { %998 = vmatmul.bf16.gmra.mxu0 %v695_v10 }
 0x111   :  { %v5284_v14 = vpop.f32.mrf.mxu1  ;;  %v686_v41 = vpack.c.bf16 %v630_v39, %v626_v31  ;;  %v645_v22 = vmax.f32 %v544_v21, 0.0 }
 0x113   :  { %1130 = vmatmul.bf16.vlgmr.msrb.gmra.mxu3 %v686_v41 }
 0x114   :  { %511 = vmatmul.bf16.gmra.mxu1 %v5135_v61  ;;  %v4297_v61 = vld [vmem:[%s7239_s4 + $0x80] sm:$0xff]  ;;  %v585_v59 = vpop.f32.mrf.mxu3  ;;  %s3717_s4 = sshll.u32 %s7248_s13, 4  ;;  %s3718_s4 = int_to_ptr.hbm [resolvable:$true] %s3717_s4 }
 0x115   :  { %4364 = vmatpush.bf16.msrb.mxu2 %v4297_v61  ;;  %1075 = vmatpush.bf16.msra.mxu0 %v4297_v61  ;;  %v586_v48 = vadd.f32 %v585_v59, %v5286_v15 }
 0x117   :  { %v634_v60 = vmax.f32 %v586_v48, 0.0 }
 0x118   :  { %1081 = vmatmul.bf16.vlgmr.msrb.gmra.mxu2 %v685_v36 }
 0x119   :  { %v465_v27 = vpop.f32.mrf.mxu1  ;;  %1117 = vmatpush.bf16.msrb.mxu0 %v5188_v18  ;;  %v459_v18 = vadd.f32 %v5251_v58, %v5179_v11 }
 0x11a   :  { %v466_v29 = vadd.f32 %v465_v27, %v5179_v11  ;;  %v546_v27 = vpop.f32.mrf.mxu2 }
 0x11b   :  { %v663_v57 = vmax.f32 %v459_v18, 0.0  ;;  %v547_v41 = vadd.f32 %v546_v27, %v5278_v37 }
 0x11c   :  { %v587_v55 = vpop.f32.mrf.mxu3  ;;  %v675_v26 = vmax.f32 %v466_v29, 0.0 }
 0x11d   :  { %1118 = vmatpush.bf16.msrb.mxu0 %v5205_v32  ;;  %v588_v58 = vadd.f32 %v587_v55, %v5286_v15  ;;  %v703_v7 = vpack.c.bf16 %v667_v63, %v663_v57  ;;  %v649_v18 = vmax.f32 %v547_v41, 0.0 }
 0x11f   :  { %v638_v3 = vmax.f32 %v588_v58, 0.0 }
 0x120   :  { %1003 = vmatmul.bf16.gmra.mxu0 %v699_v42  ;;  %v527_v42 = vadd.f32 %v5243_v54, %v5278_v37 }
 0x121   :  { %v477_v45 = vpop.f32.mrf.mxu1  ;;  %1119 = vmatpush.bf16.msrb.mxu0 %v5222_v43  ;;  %v690_v28 = vpack.c.bf16 %v638_v3, %v634_v60 }
 0x122   :  { %v478_v32 = vadd.f32 %v477_v45, %v5316_v46  ;;  %v548_v59 = vpop.f32.mrf.mxu2  ;;  %v529_v45 = vadd.f32 %v5257_v62, %v5278_v37 }
 0x123   :  { %1135 = vmatmul.bf16.gmra.mxu3 %v690_v28  ;;  %v549_v48 = vadd.f32 %v548_v59, %v5278_v37  ;;  %v576_v28 = vadd.f32 %v5246_v30, %v5286_v15 }
 0x124   :  { %v616_v0 = vmax.f32 %v478_v32, 0.0  ;;  %v590_v9 = vpop.f32.mrf.mxu3  ;;  %v617_v32 = vmax.f32 %v527_v42, 0.0  ;;  %v621_v55 = vmax.f32 %v529_v45, 0.0 }
 0x125   :  { %1120 = vmatpush.bf16.msrb.mxu0 %v5238_v52  ;;  %v591_v13 = vadd.f32 %v590_v9, %v5286_v15  ;;  %v653_v49 = vmax.f32 %v549_v48, 0.0 }
 0x127   :  { %v642_v25 = vmax.f32 %v591_v13, 0.0 }
 0x128   :  { %1086 = vmatmul.bf16.gmra.mxu2 %v689_v4 }
 0x129   :  { %v479_v43 = vpop.f32.mrf.mxu1  ;;  %1121 = vmatpush.bf16.msrb.mxu0 %v5276_v8  ;;  %v464_v8 = vadd.f32 %v5284_v14, %v5179_v11 }
 0x12a   :  { %v480_v1 = vadd.f32 %v479_v43, %v5316_v46  ;;  %v697_v43 = vpack.c.bf16 %v653_v49, %v649_v18  ;;  %v551_v63 = vpop.f32.mrf.mxu2 }
 0x12b   :  { %v671_v24 = vmax.f32 %v464_v8, 0.0  ;;  %v552_v56 = vadd.f32 %v551_v63, %v5278_v37 }
 0x12c   :  { %v620_v5 = vmax.f32 %v480_v1, 0.0  ;;  %v592_v23 = vpop.f32.mrf.mxu3  ;;  %v681_v1 = vpack.c.bf16 %v621_v55, %v617_v32 }
 0x12d   :  { %1122 = vmatpush.bf16.msrb.mxu0 %v5291_v16  ;;  %v641_v16 = vmax.f32 %v542_v12, 0.0  ;;  %v707_v36 = vpack.c.bf16 %v675_v26, %v671_v24  ;;  %v657_v8 = vmax.f32 %v552_v56, 0.0 }
 0x12e   :  { %v680_v52 = vpack.c.bf16 %v620_v5, %v616_v0 }
 0x12f   :  { %v693_v33 = vpack.c.bf16 %v645_v22, %v641_v16 }
 0x130   :  { %1008 = vmatmul.bf16.gmra.mxu0 %v703_v7  ;;  %1027 = vmatmul.bf16.vlgmr.msra.gmra.mxu1 %v680_v52 }
 0x131   :  { %v482_v10 = vpop.f32.mrf.mxu1  ;;  %1123 = vmatpush.bf16.msrb.mxu0 %v5299_v19  ;;  %v593_v19 = vadd.f32 %v592_v23, %v5286_v15 }
 0x132   :  { %v483_v20 = vadd.f32 %v482_v10, %v5316_v46  ;;  %v553_v9 = vpop.f32.mrf.mxu2  ;;  %v578_v10 = vadd.f32 %v5264_v2, %v5286_v15 }
 0x133   :  { %v646_v34 = vmax.f32 %v593_v19, 0.0  ;;  %v554_v13 = vadd.f32 %v553_v9, %v5278_v37 }
 0x134   :  { %v624_v14 = vmax.f32 %v483_v20, 0.0  ;;  %v618_v20 = vmax.f32 %v576_v28, 0.0  ;;  %v622_v22 = vmax.f32 %v578_v10, 0.0 }
 0x135   :  { %1124 = vmatpush.bf16.msrb.mxu0 %v4305_v38  ;;  %v694_v35 = vpack.c.bf16 %v646_v34, %v642_v25  ;;  %v595_v38 = vpop.f32.mrf.mxu3  ;;  %v661_v17 = vmax.f32 %v554_v13, 0.0 }
 0x136   :  { %v596_v44 = vadd.f32 %v595_v38, %v5286_v15 }
 0x137   :  { %1140 = vmatmul.bf16.gmra.mxu3 %v694_v35 }
 0x138   :  { %1091 = vmatmul.bf16.gmra.mxu2 %v693_v33  ;;  %v650_v51 = vmax.f32 %v596_v44, 0.0 }
 0x139   :  { %v484_v61 = vpop.f32.mrf.mxu1 }
 0x13a   :  { %v485_v31 = vadd.f32 %v484_v61, %v5316_v46  ;;  %v701_v61 = vpack.c.bf16 %v661_v17, %v657_v8  ;;  %v556_v26 = vpop.f32.mrf.mxu2 }
 0x13b   :  { %v557_v27 = vadd.f32 %v556_v26, %v5278_v37 }
 0x13c   :  { %v628_v11 = vmax.f32 %v485_v31, 0.0  ;;  %v682_v31 = vpack.c.bf16 %v622_v22, %v618_v20 }
 0x13d   :  { %v597_v6 = vpop.f32.mrf.mxu3 }
 0x13e   :  { %v684_v39 = vpack.c.bf16 %v628_v11, %v624_v14  ;;  %v598_v53 = vadd.f32 %v597_v6, %v5286_v15 }
 0x140   :  { %1013 = vmatmul.bf16.gmra.mxu0 %v707_v36  ;;  %1032 = vmatmul.bf16.gmra.mxu1 %v684_v39  ;;  %v654_v60 = vmax.f32 %v598_v53, 0.0 }
 0x141   :  { %v487_v40 = vpop.f32.mrf.mxu1 }
 0x142   :  { %v488_v47 = vadd.f32 %v487_v40, %v5316_v46  ;;  %v698_v0 = vpack.c.bf16 %v654_v60, %v650_v51  ;;  %v558_v39 = vpop.f32.mrf.mxu2  ;;  %v665_v40 = vmax.f32 %v557_v27, 0.0 }
 0x143   :  { %v559_v41 = vadd.f32 %v558_v39, %v5278_v37 }
 0x144   :  { %v632_v54 = vmax.f32 %v488_v47, 0.0 }
 0x145   :  { %v600_v3 = vpop.f32.mrf.mxu3  ;;  %v669_v42 = vmax.f32 %v559_v41, 0.0 }
 0x146   :  { %v601_v7 = vadd.f32 %v600_v3, %v5286_v15 }
 0x147   :  { %1145 = vmatmul.bf16.gmra.mxu3 %v698_v0  ;;  %v705_v49 = vpack.c.bf16 %v669_v42, %v665_v40 }
 0x148   :  { %1096 = vmatmul.bf16.gmra.mxu2 %v697_v43  ;;  %v658_v21 = vmax.f32 %v601_v7, 0.0 }
 0x149   :  { %v489_v50 = vpop.f32.mrf.mxu1 }
 0x14a   :  { %v490_v57 = vadd.f32 %v489_v50, %v5316_v46  ;;  %v561_v51 = vpop.f32.mrf.mxu2 }
 0x14b   :  { %v562_v43 = vadd.f32 %v561_v51, %v5278_v37 }
 0x14c   :  { %v636_v58 = vmax.f32 %v490_v57, 0.0 }
 0x14d   :  { %v5352_v62 = vpop.f32.mrf.mxu0  ;;  %v602_v29 = vpop.f32.mrf.mxu3 }
 0x14e   :  { %v688_v4 = vpack.c.bf16 %v636_v58, %v632_v54  ;;  %v603_v30 = vadd.f32 %v602_v29, %v5286_v15 }
 0x150   :  { %1037 = vmatmul.bf16.gmra.mxu1 %v688_v4  ;;  %1076 = vmatmul.bf16.vlgmr.msra.gmra.mxu0 %v681_v1  ;;  %v662_v25 = vmax.f32 %v603_v30, 0.0  ;;  %v673_v1 = vmax.f32 %v562_v43, 0.0 }
 0x151   :  { %v492_v5 = vpop.f32.mrf.mxu1 }
 0x152   :  { %v493_v12 = vadd.f32 %v492_v5, %v5316_v46  ;;  %v702_v14 = vpack.c.bf16 %v662_v25, %v658_v21  ;;  %v563_v63 = vpop.f32.mrf.mxu2 }
 0x153   :  { %v564_v4 = vadd.f32 %v563_v63, %v5278_v37 }
 0x154   :  { %v640_v23 = vmax.f32 %v493_v12, 0.0 }
 0x155   :  { %v5357_v52 = vpop.f32.mrf.mxu0  ;;  %v605_v34 = vpop.f32.mrf.mxu3  ;;  %v677_v3 = vmax.f32 %v564_v4, 0.0 }
 0x156   :  { %v606_v36 = vadd.f32 %v605_v34, %v5286_v15 }
 0x157   :  { %1150 = vmatmul.bf16.gmra.mxu3 %v702_v14  ;;  %v709_v12 = vpack.c.bf16 %v677_v3, %v673_v1 }
 0x158   :  { %1101 = vmatmul.bf16.gmra.mxu2 %v701_v61  ;;  %v666_v45 = vmax.f32 %v606_v36, 0.0 }
 0x159   :  { %v494_v16 = vpop.f32.mrf.mxu1 }
 0x15a   :  { %v495_v24 = vadd.f32 %v494_v16, %v5316_v46 }
 0x15c   :  { %v644_v19 = vmax.f32 %v495_v24, 0.0 }
 0x15d   :  { %v5366_v2 = vpop.f32.mrf.mxu0  ;;  %v607_v44 = vpop.f32.mrf.mxu3 }
 0x15e   :  { %v692_v33 = vpack.c.bf16 %v644_v19, %v640_v23  ;;  %v608_v47 = vadd.f32 %v607_v44, %v5286_v15 }
 0x160   :  { %1042 = vmatmul.bf16.gmra.mxu1 %v692_v33  ;;  %1125 = vmatmul.bf16.vlgmr.msrb.gmra.mxu0 %v682_v31  ;;  %v670_v6 = vmax.f32 %v608_v47, 0.0 }
 0x161   :  { %v497_v11 = vpop.f32.mrf.mxu1 }
 0x162   :  { %v498_v38 = vadd.f32 %v497_v11, %v5316_v46  ;;  %v706_v53 = vpack.c.bf16 %v670_v6, %v666_v45 }
 0x164   :  { %v648_v18 = vmax.f32 %v498_v38, 0.0 }
 0x165   :  { %v5369_v35 = vpop.f32.mrf.mxu0  ;;  %v610_v54 = vpop.f32.mrf.mxu3 }
 0x166   :  { %v611_v58 = vadd.f32 %v610_v54, %v5286_v15 }
 0x167   :  { %1155 = vmatmul.bf16.gmra.mxu3 %v706_v53 }
 0x168   :  { %1106 = vmatmul.bf16.gmra.mxu2 %v705_v49  ;;  %v674_v28 = vmax.f32 %v611_v58, 0.0 }
 0x169   :  { %v499_v59 = vpop.f32.mrf.mxu1 }
 0x16a   :  { %v500_v48 = vadd.f32 %v499_v59, %v5316_v46  ;;  %v775_v59 = vld [vmem:[#allocation9] sm:$0x1] }
 0x16c   :  { %v652_v32 = vmax.f32 %v500_v48, 0.0 }
 0x16d   :  { %v5376_v50 = vpop.f32.mrf.mxu0  ;;  %v612_v5 = vpop.f32.mrf.mxu3 }
 0x16e   :  { %v696_v55 = vpack.c.bf16 %v652_v32, %v648_v18  ;;  %v613_v7 = vadd.f32 %v612_v5, %v5286_v15  ;;  %v776_v18 = vunpack.c.l.bf16 %v775_v59 }
 0x170   :  { %1047 = vmatmul.bf16.gmra.mxu1 %v696_v55  ;;  %v678_v8 = vmax.f32 %v613_v7, 0.0  ;;  %v5406_v49 = vperm.slane %v776_v18, 0 }
 0x171   :  { %v502_v57 = vpop.f32.mrf.mxu1 }
 0x172   :  { %v503_v0 = vadd.f32 %v502_v57, %v5316_v46  ;;  %v710_v29 = vpack.c.bf16 %v678_v8, %v674_v28  ;;  %v985_v6 = vadd.f32 %v5366_v2, %v5406_v49  ;;  %v987_v58 = vadd.f32 %v5369_v35, %v5406_v49 }
 0x173   :  { %v990_v28 = vadd.f32 %v5376_v50, %v5406_v49 }
 0x174   :  { %v656_v9 = vmax.f32 %v503_v0, 0.0 }
 0x175   :  { %v5379_v60 = vpop.f32.mrf.mxu0 }
 0x177   :  { %1160 = vmatmul.bf16.gmra.mxu3 %v710_v29 }
 0x178   :  { %1111 = vmatmul.bf16.gmra.mxu2 %v709_v12 }
 0x179   :  { %v504_v56 = vpop.f32.mrf.mxu1 }
 0x17a   :  { %v505_v10 = vadd.f32 %v504_v56, %v5316_v46 }
 0x17c   :  { %v660_v13 = vmax.f32 %v505_v10, 0.0 }
 0x17d   :  { %v5386_v17 = vpop.f32.mrf.mxu0 }
 0x17e   :  { %v700_v20 = vpack.c.bf16 %v660_v13, %v656_v9 }
 0x180   :  { %1052 = vmatmul.bf16.gmra.mxu1 %v700_v20  ;;  %v992_v20 = vadd.f32 %v5379_v60, %v5406_v49 }
 0x181   :  { %v507_v37 = vpop.f32.mrf.mxu1 }
 0x182   :  { %v508_v21 = vadd.f32 %v507_v37, %v5316_v46 }
 0x184   :  { %v664_v15 = vmax.f32 %v508_v21, 0.0 }
 0x185   :  { %v5388_v16 = vpop.f32.mrf.mxu0 }
 0x189   :  { %v509_v30 = vpop.f32.mrf.mxu1 }
 0x18a   :  { %v510_v22 = vadd.f32 %v509_v30, %v5316_v46 }
 0x18c   :  { %v668_v23 = vmax.f32 %v510_v22, 0.0 }
 0x18d   :  { %v5392_v24 = vpop.f32.mrf.mxu0 }
 0x18e   :  { %v704_v61 = vpack.c.bf16 %v668_v23, %v664_v15 }
 0x190   :  { %1057 = vmatmul.bf16.gmra.mxu1 %v704_v61  ;;  %v980_v61 = vadd.f32 %v5352_v62, %v5406_v49  ;;  %v995_v62 = vadd.f32 %v5386_v17, %v5406_v49 }
 0x191   :  { %v512_v25 = vpop.f32.mrf.mxu1 }
 0x192   :  { %v513_v26 = vadd.f32 %v512_v25, %v5316_v46 }
 0x194   :  { %v672_v31 = vmax.f32 %v513_v26, 0.0 }
 0x195   :  { %v5394_v19 = vpop.f32.mrf.mxu0 }
 0x196   :  { %v1131_v39 = vpop.f32.mrf.mxu3 }
 0x199   :  { %v514_v14 = vpop.f32.mrf.mxu1 }
 0x19a   :  { %v515_v33 = vadd.f32 %v514_v14, %v5316_v46 }
 0x19b   :  { %v1082_v36 = vpop.f32.mrf.mxu2 }
 0x19c   :  { %v676_v34 = vmax.f32 %v515_v33, 0.0 }
 0x19d   :  { %v5398_v11 = vpop.f32.mrf.mxu0 }
 0x19e   :  { %v708_v27 = vpack.c.bf16 %v676_v34, %v672_v31  ;;  %v1133_v44 = vpop.f32.mrf.mxu3 }
 0x1a0   :  { %1062 = vmatmul.bf16.gmra.mxu1 %v708_v27 }
 0x1a3   :  { %v1084_v40 = vpop.f32.mrf.mxu2 }
 0x1a5   :  { %v5400_v38 = vpop.f32.mrf.mxu0 }
 0x1a6   :  { %v1136_v48 = vpop.f32.mrf.mxu3 }
 0x1ab   :  { %v1087_v46 = vpop.f32.mrf.mxu2 }
 0x1ad   :  { %v5402_v41 = vpop.f32.mrf.mxu0  ;;  %v1028_v42 = vpop.f32.mrf.mxu1 }
 0x1ae   :  { %v1138_v43 = vpop.f32.mrf.mxu3  ;;  %v1029_v26 = vadd.f32 %v1028_v42, %v980_v61 }
 0x1b3   :  { %v1089_v54 = vpop.f32.mrf.mxu2 }
 0x1b5   :  { %v5404_v45 = vpop.f32.mrf.mxu0  ;;  %v1030_v47 = vpop.f32.mrf.mxu1 }
 0x1ba   :  { %v1141_v7 = vpop.f32.mrf.mxu3 }
 0x1bb   :  { %v1092_v56 = vpop.f32.mrf.mxu2 }
 0x1bd   :  { %v5410_v32 = vpop.f32.mrf.mxu0  ;;  %v1033_v51 = vpop.f32.mrf.mxu1 }
 0x1be   :  { %v1034_v53 = vadd.f32 %v1033_v51, %v985_v6 }
 0x1c0   :  { %v1083_v55 = vadd.f32 %v1082_v36, %v1034_v53 }
 0x1c2   :  { %v5412_v57 = vadd.f32 %v1131_v39, %v1083_v55  ;;  %v1143_v23 = vpop.f32.mrf.mxu3 }
 0x1c3   :  { %v1094_v50 = vpop.f32.mrf.mxu2 }
 0x1c4   :  { %v1168_v63 = vmul.f32 %v5412_v57, %v5412_v57 }
 0x1c5   :  { %v5418_v0 = vpop.f32.mrf.mxu0  ;;  %v1035_v1 = vpop.f32.mrf.mxu1 }
 0x1c6   :  { %v1036_v2 = vadd.f32 %v1035_v1, %v987_v58  ;;  %v1189_v4 = vsel %vm154_vm0, %v1168_v63, 0.0 }
 0x1c7   :  { %1190 = vadd.xlane.f32.xlu1 %v1189_v4 }
 0x1c8   :  { %v1085_v3 = vadd.f32 %v1084_v40, %v1036_v2  ;;  %v982_v40 = vadd.f32 %v5357_v52, %v5406_v49  ;;  %v1000_v2 = vadd.f32 %v5392_v24, %v5406_v49  ;;  %v1002_v24 = vadd.f32 %v5394_v19, %v5406_v49 }
 0x1ca   :  { %v5421_v5 = vadd.f32 %v1133_v44, %v1085_v3  ;;  %v1146_v44 = vpop.f32.mrf.mxu3  ;;  %v1031_v59 = vadd.f32 %v1030_v47, %v982_v40 }
 0x1cb   :  { %v1097_v39 = vpop.f32.mrf.mxu2 }
 0x1cc   :  { %v1169_v35 = vmul.f32 %v5421_v5, %v5421_v5 }
 0x1cd   :  { %v1038_v9 = vpop.f32.mrf.mxu1  ;;  %v1077_v10 = vpop.f32.mrf.mxu0 }
 0x1ce   :  { %v1039_v12 = vadd.f32 %v1038_v9, %v990_v28  ;;  %v1192_v8 = vsel %vm154_vm0, %v1169_v35, 0.0  ;;  %v1078_v31 = vadd.f32 %v1077_v10, %v1029_v26 }
 0x1cf   :  { %1193 = vadd.xlane.f32.xlu1 %v1192_v8 }
 0x1d0   :  { %v1088_v13 = vadd.f32 %v1087_v46, %v1039_v12 }
 0x1d2   :  { %v5428_v29 = vadd.f32 %v1136_v48, %v1088_v13  ;;  %v997_v48 = vadd.f32 %v5388_v16, %v5406_v49  ;;  %v1148_v16 = vpop.f32.mrf.mxu3 }
 0x1d3   :  { %v1099_v58 = vpop.f32.mrf.mxu2 }
 0x1d4   :  { %v1170_v37 = vmul.f32 %v5428_v29, %v5428_v29 }
 0x1d5   :  { %v1040_v21 = vpop.f32.mrf.mxu1  ;;  %v1079_v30 = vpop.f32.mrf.mxu0 }
 0x1d6   :  { %v1041_v15 = vadd.f32 %v1040_v21, %v992_v20  ;;  %v1195_v22 = vsel %vm154_vm0, %v1170_v37, 0.0  ;;  %v1080_v6 = vadd.f32 %v1079_v30, %v1031_v59  ;;  %v1010_v59 = vadd.f32 %v5402_v41, %v5406_v49  ;;  %v5506_v41 = vld [vmem:[%s7236_s1] ss:$0 sm:$0xff] }
 0x1d7   :  { %1196 = vadd.xlane.f32.xlu2 %v1195_v22 }
 0x1d8   :  { %v1090_v25 = vadd.f32 %v1089_v54, %v1041_v15  ;;  %v1005_v15 = vadd.f32 %v5398_v11, %v5406_v49 }
 0x1da   :  { %v5437_v14 = vadd.f32 %v1138_v43, %v1090_v25  ;;  %v1151_v20 = vpop.f32.mrf.mxu3 }
 0x1db   :  { %v1102_v12 = vpop.f32.mrf.mxu2 }
 0x1dc   :  { %v1171_v60 = vmul.f32 %v5437_v14, %v5437_v14 }
 0x1dd   :  { %v1043_v33 = vpop.f32.mrf.mxu1  ;;  %v1126_v34 = vpop.f32.mrf.mxu0 }
 0x1de   :  { %v5441_v27 = vadd.f32 %v1126_v34, %v1078_v31  ;;  %v1198_v36 = vsel %vm154_vm0, %v1171_v60, 0.0  ;;  %v1044_v18 = vadd.f32 %v1043_v33, %v995_v62  ;;  %v1007_v33 = vadd.f32 %v5400_v38, %v5406_v49 }
 0x1df   :  { %1199 = vadd.xlane.f32.xlu2 %v1198_v36 }
 0x1e0   :  { %v1166_v42 = vmul.f32 %v5441_v27, %v5441_v27  ;;  %v1093_v55 = vadd.f32 %v1092_v56, %v1044_v18 }
 0x1e2   :  { %v1183_v46 = vsel %vm154_vm0, %v1166_v42, 0.0  ;;  %v5457_v47 = vadd.f32 %v1141_v7, %v1093_v55  ;;  %v1153_v26 = vpop.f32.mrf.mxu3 }
 0x1e3   :  { %1184 = vadd.xlane.f32.xlu0 %v1183_v46  ;;  %v1104_v19 = vpop.f32.mrf.mxu2 }
 0x1e4   :  { %v1172_v35 = vmul.f32 %v5457_v47, %v5457_v47 }
 0x1e5   :  { %v1045_v51 = vpop.f32.mrf.mxu1  ;;  %v1128_v53 = vpop.f32.mrf.mxu0 }
 0x1e6   :  { %v1046_v52 = vadd.f32 %v1045_v51, %v997_v48  ;;  %v5453_v54 = vadd.f32 %v1128_v53, %v1080_v6  ;;  %v1201_v10 = vsel %vm154_vm0, %v1172_v35, 0.0  ;;  %v7252_v6 = vlaneseq }
 0x1e7   :  { %v4800_v53 = vmov 0.0  }
 0x1e8   :  { %v1095_v17 = vadd.f32 %v1094_v50, %v1046_v52  ;;  %v1167_v43 = vmul.f32 %v5453_v54, %v5453_v54  ;;  %155 = vst.msk [vmem:[#allocation2] sm:$0xff] %vm154_vm0, %v4800_v53  ;;  %v5501_v52 = vshrl.u32 %v7252_v6, 7 }
 0x1e9   :  { %156 = vst.msk [vmem:[#allocation2 + $0x8] sm:$0xff] %vm154_vm0, %v4800_v53 }
 0x1ea   :  { %v5459_v63 = vadd.f32 %v1143_v23, %v1095_v17  ;;  %v1186_v1 = vsel %vm154_vm0, %v1167_v43, 0.0  ;;  %v1156_v42 = vpop.f32.mrf.mxu3  ;;  %157 = vst.msk [vmem:[#allocation2 + $0x10] sm:$0xff] %vm154_vm0, %v4800_v53  ;;  %vm2276_vm2 = vcmp.eq.s32.totalorder %v5501_v52, %v5506_v41 }
 0x1eb   :  { %1187 = vadd.xlane.f32.xlu0 %v1186_v1  ;;  %v1107_v40 = vpop.f32.mrf.mxu2  ;;  %158 = vst.msk [vmem:[#allocation2 + $0x18] sm:$0xff] %vm154_vm0, %v4800_v53  ;;  %v1012_v1 = vadd.f32 %v5404_v45, %v5406_v49 }
 0x1ec   :  { %v1173_v4 = vmul.f32 %v5459_v63, %v5459_v63  ;;  %159 = vst.msk [vmem:[#allocation2 + $0x20] sm:$0xff] %vm154_vm0, %v4800_v53 }
 0x1ed   :  { %v1048_v3 = vpop.f32.mrf.mxu1  ;;  %160 = vst.msk [vmem:[#allocation2 + $0x28] sm:$0xff] %vm154_vm0, %v4800_v53 }
 0x1ee   :  { %v1049_v56 = vadd.f32 %v1048_v3, %v1000_v2  ;;  %v1204_v28 = vsel %vm154_vm0, %v1173_v4, 0.0  ;;  %161 = vst.msk [vmem:[#allocation2 + $0x30] sm:$0xff] %vm154_vm0, %v4800_v53 }
 0x1ef   :  { %1205 = vadd.xlane.f32.xlu1 %v1204_v28  ;;  %162 = vst.msk [vmem:[#allocation2 + $0x38] sm:$0xff] %vm154_vm0, %v4800_v53 }
 0x1f0   :  { %v1098_v7 = vadd.f32 %v1097_v39, %v1049_v56  ;;  %163 = vst.msk [vmem:[#allocation2 + $0x40] sm:$0xff] %vm154_vm0, %v4800_v53 }
 0x1f1   :  { %164 = vst.msk [vmem:[#allocation2 + $0x48] sm:$0xff] %vm154_vm0, %v4800_v53 }
 0x1f2   :  { %v5469_v9 = vadd.f32 %v1146_v44, %v1098_v7  ;;  %v1158_v43 = vpop.f32.mrf.mxu3  ;;  %165 = vst.msk [vmem:[#allocation2 + $0x50] sm:$0xff] %vm154_vm0, %v4800_v53  ;;  %v1015_v7 = vadd.f32 %v5410_v32, %v5406_v49 }
 0x1f3   :  { %1202 = vadd.xlane.f32.xlu0 %v1201_v10  ;;  %v1109_v55 = vpop.f32.mrf.mxu2  ;;  %166 = vst.msk [vmem:[#allocation2 + $0x58] sm:$0xff] %vm154_vm0, %v4800_v53 }
 0x1f4   :  { %v1174_v8 = vmul.f32 %v5469_v9, %v5469_v9  ;;  %167 = vst.msk [vmem:[#allocation2 + $0x60] sm:$0xff] %vm154_vm0, %v4800_v53 }
 0x1f5   :  { %v1050_v13 = vpop.f32.mrf.mxu1  ;;  %168 = vst.msk [vmem:[#allocation2 + $0x68] sm:$0xff] %vm154_vm0, %v4800_v53 }
 0x1f6   :  { %v1051_v37 = vadd.f32 %v1050_v13, %v1002_v24  ;;  %v1207_v50 = vsel %vm154_vm0, %v1174_v8, 0.0  ;;  %169 = vst.msk [vmem:[#allocation2 + $0x70] sm:$0xff] %vm154_vm0, %v4800_v53 }
 0x1f7   :  { %1208 = vadd.xlane.f32.xlu2 %v1207_v50  ;;  %170 = vst.msk [vmem:[#allocation2 + $0x78] sm:$0xff] %vm154_vm0, %v4800_v53 }
 0x1f8   :  { %v1100_v21 = vadd.f32 %v1099_v58, %v1051_v37  ;;  %v5515_v58 = vadd.s32 8, %v5501_v52  ;;  %v1017_v37 = vadd.f32 %v5418_v0, %v5406_v49 }
 0x1fa   :  { %v5477_v30 = vadd.f32 %v1148_v16, %v1100_v21  ;;  %vm2277_vm1 = vcmp.eq.s32.totalorder %v5515_v58, %v5506_v41  ;;  %v1161_v24 = vpop.f32.mrf.mxu3  ;;  %v4191_v21 = vsel %vm2276_vm2, 1.0, %v4800_v53 }
 0x1fb   :  { %vm5540_vm3 = vmpackc.low %vm2277_vm1, %vm2276_vm2  ;;  %v1112_v35 = vpop.f32.mrf.mxu2 }
 0x1fc   :  { %v1175_v22 = vmul.f32 %v5477_v30, %v5477_v30 }
 0x1fd   :  { %v1053_v23 = vpop.f32.mrf.mxu1 }
 0x1fe   :  { %v1054_v61 = vadd.f32 %v1053_v23, %v1005_v15  ;;  %v1210_v25 = vsel %vm154_vm0, %v1175_v22, 0.0 }
 0x1ff   :  { %1211 = vadd.xlane.f32.xlu0 %v1210_v25 }
 0x200   :  { %v1103_v31 = vadd.f32 %v1102_v12, %v1054_v61  ;;  %v5581_v61 = vadd.s32 24, %v5501_v52 }
 0x202   :  { %v5484_v60 = vadd.f32 %v1151_v20, %v1103_v31  ;;  %v1163_v25 = vpop.f32.mrf.mxu3  ;;  %vm2279_vm4 = vcmp.eq.s32.totalorder %v5581_v61, %v5506_v41 }
 0x203   :  { %v1114_v22 = vpop.f32.mrf.mxu2 }
 0x204   :  { %v1176_v34 = vmul.f32 %v5484_v60, %v5484_v60 }
 0x205   :  { %v1055_v11 = vpop.f32.mrf.mxu1 }
 0x206   :  { %v1056_v36 = vadd.f32 %v1055_v11, %v1007_v33  ;;  %v1213_v39 = vsel %vm154_vm0, %v1176_v34, 0.0  ;;  %v4192_v33 = vsel %vm2277_vm1, 1.0, %v4800_v53  ;;  %v5597_v34 = vadd.s32 32, %v5501_v52 }
 0x207   :  { %1214 = vadd.xlane.f32.xlu1 %v1213_v39  ;;  %v4194_v11 = vsel %vm2279_vm4, 1.0, %v4800_v53 }
 0x208   :  { %v1105_v62 = vadd.f32 %v1104_v19, %v1056_v36  ;;  %vm2280_vm7 = vcmp.eq.s32.totalorder %v5597_v34, %v5506_v41 }
 0x20a   :  { %v5491_v44 = vadd.f32 %v1153_v26, %v1105_v62  ;;  %v5586_v26 = vadd.s32 16, %v5501_v52  ;;  %v4195_v62 = vsel %vm2280_vm7, 1.0, %v4800_v53 }
 0x20c   :  { %v1177_v18 = vmul.f32 %v5491_v44, %v5491_v44  ;;  %vm2278_vm5 = vcmp.eq.s32.totalorder %v5586_v26, %v5506_v41 }
 0x20d   :  { %v1058_v38 = vpop.f32.mrf.mxu1  ;;  %vm5603_vm6 = vmpackc.low %vm2279_vm4, %vm2278_vm5 }
 0x20e   :  { %v1059_v46 = vadd.f32 %v1058_v38, %v1010_v59  ;;  %v1216_v48 = vsel %vm154_vm0, %v1177_v18, 0.0  ;;  %v4017_v59 = vld [vmem:[%s7241_s6] sm:$0xf]  ;;  %v4315_v18 = vld [vmem:[%s7241_s6 + $0xc] sm:$0xf0] }
 0x20f   :  { %1217 = vadd.xlane.f32.xlu2 %v1216_v48  ;;  %v4313_v38 = vld [vmem:[%s7241_s6 + $0x4] sm:$0xf]  ;;  %v4019_v48 = vld [vmem:[%s7241_s6 + $0x10] sm:$0xf0] }
 0x210   :  { %v1108_v51 = vadd.f32 %v1107_v40, %v1059_v46  ;;  %v4193_v40 = vsel %vm2278_vm5, 1.0, %v4800_v53  ;;  %v4018_v46 = vor.u32 %v4315_v18, %v4017_v59 }
 0x212   :  { %v5510_v17 = vadd.f32 %v1156_v42, %v1108_v51  ;;  %v4025_v51 = vld [vmem:[%s7241_s6 + $0x8] sm:$0xf]  ;;  %1501 = vmatpush.bf16.msra.mxu0 %v4018_v46 }
 0x214   :  { %v1178_v16 = vmul.f32 %v5510_v17, %v5510_v17 }
 0x215   :  { %v1060_v2 = vpop.f32.mrf.mxu1 }
 0x216   :  { %v1061_v4 = vadd.f32 %v1060_v2, %v1012_v1  ;;  %v1219_v3 = vsel %vm154_vm0, %v1178_v16, 0.0  ;;  %v4314_v1 = vld [vmem:[%s7241_s6 + $0xc] sm:$0xf]  ;;  %v4027_v2 = vld [vmem:[%s7241_s6 + $0x18] sm:$0xf0] }
 0x217   :  { %1220 = vadd.xlane.f32.xlu0 %v1219_v3 }
 0x218   :  { %v1110_v56 = vadd.f32 %v1109_v55, %v1061_v4  ;;  %v4022_v55 = vor.u32 %v4313_v38, %v4019_v48  ;;  %v4030_v4 = vor.u32 %v4314_v1, %v4027_v2  ;;  %v5678_v1 = vadd.s32 56, %v5501_v52 }
 0x21a   :  { %v5550_v28 = vadd.f32 %v1158_v43, %v1110_v56  ;;  %v4316_v43 = vld [vmem:[%s7241_s6 + $0x14] sm:$0xf0]  ;;  %1550 = vmatpush.bf16.msrb.mxu1 %v4022_v55  ;;  %1648 = vmatpush.bf16.msra.mxu3 %v4030_v4  ;;  %vm2283_vm1 = vcmp.eq.s32.totalorder %v5678_v1, %v5506_v41 }
 0x21b   :  { %v4026_v16 = vor.u32 %v4316_v43, %v4025_v51 }
 0x21c   :  { %v1179_v10 = vmul.f32 %v5550_v28, %v5550_v28 }
 0x21d   :  { %v1063_v12 = vpop.f32.mrf.mxu1  ;;  %1599 = vmatpush.bf16.msra.mxu2 %v4026_v16 }
 0x21e   :  { %v1064_v8 = vadd.f32 %v1063_v12, %v1015_v7  ;;  %v1222_v13 = vsel %vm154_vm0, %v1179_v10, 0.0  ;;  %v5641_v10 = vadd.s32 40, %v5501_v52 }
 0x21f   :  { %1223 = vadd.xlane.f32.xlu1 %v1222_v13 }
 0x220   :  { %v1113_v32 = vadd.f32 %v1112_v35, %v1064_v8  ;;  %vm7253_vm8 = vcmp.eq.s32.totalorder %v5641_v10, %v5506_v41 }
 0x222   :  { %v5569_v20 = vadd.f32 %v1161_v24, %v1113_v32  ;;  %v4196_v32 = vsel %vm7253_vm8, 1.0, %v4800_v53 }
 0x224   :  { %v1180_v50 = vmul.f32 %v5569_v20, %v5569_v20 }
 0x225   :  { %v1065_v15 = vpop.f32.mrf.mxu1 }
 0x226   :  { %v1066_v23 = vadd.f32 %v1065_v15, %v1017_v37  ;;  %v1225_v19 = vsel %vm154_vm0, %v1180_v50, 0.0 }
 0x227   :  { %1226 = vadd.xlane.f32.xlu2 %v1225_v19  ;;  %2445 = vadd.xlane.f32.xlu1 %v4191_v21 }
 0x228   :  { %v1115_v49 = vadd.f32 %v1114_v22, %v1066_v23  ;;  %v5654_v22 = vadd.s32 48, %v5501_v52 }
 0x22a   :  { %v5583_v0 = vadd.f32 %v1163_v25, %v1115_v49  ;;  %vm2282_vm9 = vcmp.eq.s32.totalorder %v5654_v22, %v5506_v41 }
 0x22c   :  { %v1181_v31 = vmul.f32 %v5583_v0, %v5583_v0 }
 0x22e   :  { %v1228_v36 = vsel %vm154_vm0, %v1181_v31, 0.0  ;;  %v4197_v31 = vsel %vm2282_vm9, 1.0, %v4800_v53 }
 0x22f   :  { %1229 = vadd.xlane.f32.xlu0 %v1228_v36  ;;  %2447 = vadd.xlane.f32.xlu2 %v4192_v33 }
 0x230   :  { %2451 = vadd.xlane.f32.xlu1 %v4194_v11 }
 0x237   :  { %2449 = vadd.xlane.f32.xlu0 %v4193_v40  ;;  %2453 = vadd.xlane.f32.xlu2 %v4195_v62 }
 0x23a   :  { %v1191_v42 = vpop.xlane.xlu1 %1190 }
 0x23b   :  { %v5645_v8 = vmax.f32 %v1191_v42, 1e-24 }
 0x23f   :  { %2455 = vadd.xlane.f32.xlu0 %v4196_v32  ;;  %2457 = vadd.xlane.f32.xlu2 %v4197_v31 }
 0x242   :  { %v1194_v35 = vpop.xlane.xlu1 %1193 }
 0x243   :  { %v5638_v7 = vmax.f32 %v1194_v35, 1e-24 }
 0x24a   :  { %v1197_v37 = vpop.xlane.xlu2 %1196 }
 0x24b   :  { %v5673_v48 = vmax.f32 %v1197_v37, 1e-24  ;;  %v4324_v37 = vld [vmem:[#allocation12 + $0x38] sm:$0xff] }
 0x24c   :  { %2045 = vmatpush.bf16.msrb.mxu0 %v4324_v37 }
 0x252   :  { %v1200_v36 = vpop.xlane.xlu2 %1199 }
 0x253   :  { %v5670_v18 = vmax.f32 %v1200_v36, 1e-24 }
 0x256   :  { %v1185_v3 = vpop.xlane.xlu0 %1184 }
 0x257   :  { %v1231_v56 = vmax.f32 %v1185_v3, 1e-24 }
 0x259   :  { %4395 = vrsqrt.f32 %v1231_v56  ;;  %vm1253_vm11 = vweird.f32 %v1231_v56 }
 0x25a   :  { %4397 = vrsqrt.f32 %v5638_v7 }
 0x25e   :  { %v1188_v12 = vpop.xlane.xlu0 %1187 }
 0x25f   :  { %v4396_v24 = vpop.eup %4395  ;;  %v1232_v13 = vmax.f32 %v1188_v12, 1e-24  ;;  %v4198_v12 = vsel %vm2283_vm1, 1.0, %v4800_v53 }
 0x260   :  { %v1248_v50 = vmul.f32 %v4396_v24, %v1231_v56  ;;  %v5656_v23 = vpop.eup %4397  ;;  %vm1254_vm10 = vweird.f32 %v4396_v24  ;;  %2459 = vadd.xlane.f32.xlu0 %v4198_v12 }
 0x261   :  { %4399 = vrsqrt.f32 %v1232_v13  ;;  %v1278_v11 = vmul.f32 %v5656_v23, %v5638_v7  ;;  %vm1255_vm13 = vmor %vm1253_vm11, %vm1254_vm10  ;;  %vm1263_vm14 = vweird.f32 %v1232_v13  ;;  %vm1284_vm2 = vweird.f32 %v5656_v23 }
 0x262   :  { %v1249_v21 = vmul.f32 %v4396_v24, %v1248_v50  ;;  %4401 = vrsqrt.f32 %v5645_v8  ;;  %vm1283_vm10 = vweird.f32 %v5638_v7  ;;  %v1206_v31 = vpop.xlane.xlu1 %1205 }
 0x263   :  { %v1279_v38 = vmul.f32 %v5656_v23, %v1278_v11  ;;  %4403 = vrsqrt.f32 %v5670_v18  ;;  %vm1285_vm11 = vmor %vm1283_vm10, %vm1284_vm2 }
 0x264   :  { %v1250_v15 = vmul.f32 0.5, %v1249_v21  ;;  %4405 = vrsqrt.f32 %v5673_v48  ;;  %vm5773_vm2 = vmpackc.low %vm2283_vm1, %vm2282_vm9  ;;  %vm1303_vm1 = vweird.f32 %v5670_v18 }
 0x265   :  { %v1280_v16 = vmul.f32 0.5, %v1279_v38 }
 0x266   :  { %v1251_v25 = vsub.f32 1.5, %v1250_v15  ;;  %v1203_v15 = vpop.xlane.xlu0 %1202 }
 0x267   :  { %v4400_v19 = vpop.eup %4399  ;;  %v5721_v11 = vmax.f32 %v1203_v15, 1e-24 }
 0x268   :  { %v1258_v49 = vmul.f32 %v4400_v19, %v1232_v13  ;;  %v5664_v33 = vpop.eup %4401  ;;  %v1252_v42 = vmul.f32 %v4396_v24, %v1251_v25  ;;  %vm1264_vm12 = vweird.f32 %v4400_v19 }
 0x269   :  { %v1268_v62 = vmul.f32 %v5664_v33, %v5645_v8  ;;  %vm1265_vm15 = vmor %vm1263_vm14, %vm1264_vm12  ;;  %v5691_v13 = vpop.eup %4403  ;;  %vm1274_vm5 = vweird.f32 %v5664_v33  ;;  %vm1273_vm12 = vweird.f32 %v5645_v8  ;;  %4407 = vrsqrt.f32 %v5721_v11  ;;  %v4323_v8 = vld [vmem:[#allocation12 + $0x30] sm:$0xff] }
 0x26a   :  { %v1259_v40 = vmul.f32 %v4400_v19, %v1258_v49  ;;  %v1256_v55 = vsel %vm1255_vm13, %v4396_v24, %v1252_v42  ;;  %v1281_v24 = vsub.f32 1.5, %v1280_v16  ;;  %v5704_v32 = vpop.eup %4405  ;;  %v1298_v21 = vmul.f32 %v5691_v13, %v5670_v18  ;;  %vm1275_vm13 = vmor %vm1273_vm12, %vm1274_vm5  ;;  %2046 = vmatpush.bf16.msrb.mxu0 %v4323_v8 }
 0x26b   :  { %v1269_v51 = vmul.f32 %v5664_v33, %v1268_v62  ;;  %v1407_v4 = vmul.f32 %v1256_v55, %v5441_v27  ;;  %v1288_v49 = vmul.f32 %v5704_v32, %v5673_v48  ;;  %v5726_v62 = vmax.f32 %v1206_v31, 1e-24  ;;  %v4322_v55 = vld [vmem:[#allocation12 + $0x28] sm:$0xff] }
 0x26c   :  { %v1260_v59 = vmul.f32 0.5, %v1259_v40  ;;  %v1282_v50 = vmul.f32 %v5656_v23, %v1281_v24  ;;  %v1299_v40 = vmul.f32 %v5691_v13, %v1298_v21  ;;  %vm1304_vm5 = vweird.f32 %v5691_v13 }
 0x26d   :  { %v1270_v56 = vmul.f32 0.5, %v1269_v51  ;;  %v1289_v7 = vmul.f32 %v5704_v32, %v1288_v49  ;;  %4409 = vrsqrt.f32 %v5726_v62  ;;  %vm1294_vm9 = vweird.f32 %v5704_v32  ;;  %vm1305_vm10 = vmor %vm1303_vm1, %vm1304_vm5 }
 0x26e   :  { %v1261_v46 = vsub.f32 1.5, %v1260_v59  ;;  %v1286_v36 = vsel %vm1285_vm11, %v5656_v23, %v1282_v50  ;;  %v5731_v59 = vadd.s32 72, %v5501_v52  ;;  %2047 = vmatpush.bf16.msrb.mxu0 %v4322_v55  ;;  %vm1293_vm11 = vweird.f32 %v5673_v48 }
 0x26f   :  { %v1271_v27 = vsub.f32 1.5, %v1270_v56  ;;  %v1410_v38 = vmul.f32 %v1286_v36, %v5421_v5  ;;  %v1290_v51 = vmul.f32 0.5, %v1289_v7  ;;  %v4321_v56 = vld [vmem:[#allocation12 + $0x20] sm:$0xff]  ;;  %vm1295_vm12 = vmor %vm1293_vm11, %vm1294_vm9  ;;  %vm1323_vm1 = vweird.f32 %v5726_v62 }
 0x270   :  { %v1262_v43 = vmul.f32 %v4400_v19, %v1261_v46  ;;  %v1300_v46 = vmul.f32 0.5, %v1299_v40  ;;  %vm2285_vm14 = vcmp.eq.s32.totalorder %v5731_v59, %v5506_v41 }
 0x271   :  { %v1272_v25 = vmul.f32 %v5664_v33, %v1271_v27  ;;  %v1291_v16 = vsub.f32 1.5, %v1290_v51  ;;  %v1209_v27 = vpop.xlane.xlu2 %1208  ;;  %v4318_v51 = vld [vmem:[#allocation12 + $0x8] sm:$0xff] }
 0x272   :  { %v1266_v2 = vsel %vm1265_vm15, %v4400_v19, %v1262_v43  ;;  %vm171_vm15 = vcmask 7168   ;;  %v5751_v43 = vpop.eup %4407  ;;  %2048 = vmatpush.bf16.msrb.mxu0 %v4321_v56  ;;  %v4560_v56 = vld [vmem:[%s7247_s12] sm:$0xff] }
 0x273   :  { %v1408_v3 = vmul.f32 %v1266_v2, %v5453_v54  ;;  %v5702_v54 = vadd.s32 64, %v5501_v52  ;;  %v1276_v42 = vsel %vm1275_vm13, %v5664_v33, %v1272_v25  ;;  %v4200_v33 = vsel %vm2285_vm14, 1.0, %v4800_v53  ;;  %173 = vst.msk [vmem:[#allocation3 + $0x8] sm:$0xff] %vm171_vm15, %v4800_v53  ;;  %v1212_v2 = vpop.xlane.xlu0 %1211  ;;  %v4320_v25 = vld [vmem:[#allocation12 + $0x18] sm:$0xff] }
 0x274   :  { %v1409_v23 = vmul.f32 %v1276_v42, %v5412_v57  ;;  %172 = vst.msk [vmem:[#allocation3] sm:$0xff] %vm171_vm15, %v4800_v53  ;;  %v1301_v57 = vsub.f32 1.5, %v1300_v46  ;;  %v1308_v24 = vmul.f32 %v5751_v43, %v5721_v11  ;;  %v5785_v50 = vmax.f32 %v1212_v2, 1e-24 }
 0x275   :  { %v5685_v35 = vpack.c.bf16 %v1408_v3, %v1407_v4  ;;  %vm2284_vm4 = vcmp.eq.s32.totalorder %v5702_v54, %v5506_v41  ;;  %174 = vst.msk [vmem:[#allocation3 + $0x10] sm:$0xff] %vm171_vm15, %v4800_v53  ;;  %v5765_v4 = vpop.eup %4409  ;;  %v1292_v21 = vmul.f32 %v5704_v32, %v1291_v16  ;;  %vm1314_vm5 = vweird.f32 %v5751_v43 }
 0x276   :  { %v4199_v19 = vsel %vm2284_vm4, 1.0, %v4800_v53  ;;  %v5745_v5 = vpack.c.bf16 %v1410_v38, %v1409_v23  ;;  %175 = vst.msk [vmem:[#allocation3 + $0x18] sm:$0xff] %vm171_vm15, %v4800_v53  ;;  %v1302_v12 = vmul.f32 %v5691_v13, %v1301_v57  ;;  %v1318_v15 = vmul.f32 %v5765_v4, %v5726_v62  ;;  %2049 = vmatpush.bf16.msrb.mxu0 %v4320_v25  ;;  %vm5850_vm13 = vmpackc.low %vm2285_vm14, %vm2284_vm4 }
 0x277   :  { %4031 = vmatmul.msk.bf16.vlgmr.msra.gmra.mxu0 %vm154_vm0, %v5685_v35  ;;  %4039 = vmatmul.msk.bf16.vlgmr.msrb.gmra.mxu1 %vm154_vm0, %v5685_v35  ;;  %176 = vst.msk [vmem:[#allocation3 + $0x20] sm:$0xff] %vm171_vm15, %v4800_v53  ;;  %v1309_v18 = vmul.f32 %v5751_v43, %v1308_v24  ;;  %4411 = vrsqrt.f32 %v5785_v50  ;;  %v1296_v31 = vsel %vm1295_vm12, %v5704_v32, %v1292_v21  ;;  %v4801_v24 = vmov 0  }
 0x278   :  { %4047 = vmatmul.msk.bf16.vlgmr.msra.gmra.mxu2 %vm154_vm0, %v5685_v35  ;;  %4055 = vmatmul.msk.bf16.vlgmr.msra.gmra.mxu3 %vm154_vm0, %v5685_v35  ;;  %177 = vst.msk [vmem:[#allocation3 + $0x28] sm:$0xff] %vm171_vm15, %v4800_v53  ;;  %v1306_v49 = vsel %vm1305_vm10, %v5691_v13, %v1302_v12  ;;  %v1319_v36 = vmul.f32 %v5765_v4, %v1318_v15  ;;  %v4319_v13 = vld [vmem:[#allocation12 + $0x10] sm:$0xff]  ;;  %vm1313_vm4 = vweird.f32 %v5721_v11  ;;  %vm1324_vm14 = vweird.f32 %v5765_v4 }
 0x279   :  { %2461 = vadd.xlane.f32.xlu0 %v4199_v19  ;;  %178 = vst.msk [vmem:[#allocation3 + $0x30] sm:$0xff] %vm171_vm15, %v4800_v53  ;;  %v5796_v19 = vmax.f32 %v1209_v27, 1e-24  ;;  %v1412_v48 = vmul.f32 %v1306_v49, %v5437_v14  ;;  %v1310_v40 = vmul.f32 0.5, %v1309_v18  ;;  %v1411_v32 = vmul.f32 %v1296_v31, %v5428_v29  ;;  %4390 = vset.pattern.permute.xlu2 %v4801_v24  ;;  %v4317_v18 = vld [vmem:[#allocation12] sm:$0xff]  ;;  %vm1315_vm9 = vmor %vm1313_vm4, %vm1314_vm5 }
 0x27a   :  { %v1215_v37 = vpop.xlane.xlu1 %1214  ;;  %179 = vst.msk [vmem:[#allocation3 + $0x38] sm:$0xff] %vm171_vm15, %v4800_v53  ;;  %v1320_v38 = vmul.f32 0.5, %v1319_v36  ;;  %2050 = vmatpush.bf16.msrb.mxu0 %v4319_v13  ;;  %4391 = vset.pattern.permute.xlu0 %v4801_v24  ;;  %vm1325_vm10 = vmor %vm1323_vm1, %vm1324_vm14  ;;  %vm1343_vm5 = vweird.f32 %v5785_v50 }
 0x27b   :  { %180 = vst.msk [vmem:[#allocation3 + $0x40] sm:$0xff] %vm171_vm15, %v4800_v53  ;;  %4413 = vrsqrt.f32 %v5796_v19  ;;  %v5823_v46 = vpack.c.bf16 %v1412_v48, %v1411_v32  ;;  %v2429_v12 = vld [vmem:[#allocation3] sm:$0xff]  ;;  %v5858_v15 = vmax.f32 %v1215_v37, 1e-24  ;;  %4392 = vset.pattern.permute.xlu1 %v4801_v24  ;;  %v2430_v32 = vld [vmem:[#allocation3 + $0x8] sm:$0xff]  ;;  %vm1333_vm4 = vweird.f32 %v5796_v19 }
 0x27c   :  { %181 = vst.msk [vmem:[#allocation3 + $0x48] sm:$0xff] %vm171_vm15, %v4800_v53  ;;  %v1321_v29 = vsub.f32 1.5, %v1320_v38 }
 0x27d   :  { %182 = vst.msk [vmem:[#allocation3 + $0x50] sm:$0xff] %vm171_vm15, %v4800_v53  ;;  %v5821_v8 = vpop.eup %4411 }
 0x27e   :  { %183 = vst.msk [vmem:[#allocation3 + $0x58] sm:$0xff] %vm171_vm15, %v4800_v53  ;;  %v1338_v16 = vmul.f32 %v5821_v8, %v5785_v50  ;;  %2051 = vmatpush.bf16.msrb.mxu0 %v4318_v51  ;;  %v1322_v48 = vmul.f32 %v5765_v4, %v1321_v29  ;;  %vm1344_vm11 = vweird.f32 %v5821_v8 }
 0x27f   :  { %184 = vst.msk [vmem:[#allocation3 + $0x60] sm:$0xff] %vm171_vm15, %v4800_v53  ;;  %vm5926_vm14 = vmor %vm1343_vm5, %vm1344_vm11 }
 0x280   :  { %185 = vst.msk [vmem:[#allocation3 + $0x68] sm:$0xff] %vm171_vm15, %v4800_v53  ;;  %v1339_v13 = vmul.f32 %v5821_v8, %v1338_v16 }
 0x281   :  { %2463 = vadd.xlane.f32.xlu0 %v4200_v33  ;;  %186 = vst.msk [vmem:[#allocation3 + $0x70] sm:$0xff] %vm171_vm15, %v4800_v53  ;;  %v1311_v33 = vsub.f32 1.5, %v1310_v40  ;;  %v5827_v55 = vpop.eup %4413 }
 0x282   :  { %v1218_v42 = vpop.xlane.xlu2 %1217  ;;  %187 = vst.msk [vmem:[#allocation3 + $0x78] sm:$0xff] %vm171_vm15, %v4800_v53  ;;  %v1328_v21 = vmul.f32 %v5827_v55, %v5796_v19  ;;  %2052 = vmatpush.bf16.msrb.mxu0 %v4317_v18  ;;  %vm1334_vm12 = vweird.f32 %v5827_v55 }
 0x283   :  { %v5837_v2 = vmax.f32 %v1218_v42, 1e-24  ;;  %v1312_v27 = vmul.f32 %v5751_v43, %v1311_v33  ;;  %v1326_v42 = vsel %vm1325_vm10, %v5765_v4, %v1322_v48  ;;  %v2432_v33 = vld [vmem:[#allocation3 + $0x18] sm:$0xff] }
 0x284   :  { %v1329_v37 = vmul.f32 %v5827_v55, %v1328_v21  ;;  %v1414_v24 = vmul.f32 %v1326_v42, %v5459_v63 }
 0x285   :  { %v1316_v11 = vsel %vm1315_vm9, %v5751_v43, %v1312_v27  ;;  %vm1335_vm9 = vmor %vm1333_vm4, %vm1334_vm12 }
 0x286   :  { %v1330_v43 = vmul.f32 0.5, %v1329_v37 }
 0x287   :  { %4032 = vmatmul.msk.bf16.gmra.mxu0 %vm154_vm0, %v5745_v5  ;;  %4040 = vmatmul.msk.bf16.gmra.mxu1 %vm154_vm0, %v5745_v5 }
 0x288   :  { %4048 = vmatmul.msk.bf16.gmra.mxu2 %vm154_vm0, %v5745_v5  ;;  %4056 = vmatmul.msk.bf16.gmra.mxu3 %vm154_vm0, %v5745_v5  ;;  %v1331_v63 = vsub.f32 1.5, %v1330_v43  ;;  %v2433_v43 = vld [vmem:[#allocation3 + $0x20] sm:$0xff] }
 0x28a   :  { %v1221_v14 = vpop.xlane.xlu0 %1220 }
 0x28b   :  { %v5829_v57 = vmax.f32 %v1221_v14, 1e-24  ;;  %v1413_v14 = vmul.f32 %v1316_v11, %v5457_v47 }
 0x28d   :  { %v5897_v48 = vpack.c.bf16 %v1414_v24, %v1413_v14 }
 0x292   :  { %v1224_v7 = vpop.xlane.xlu1 %1223 }
 0x293   :  { %v5825_v23 = vmax.f32 %v1224_v7, 1e-24  ;;  %v1340_v7 = vmul.f32 0.5, %v1339_v13 }
 0x295   :  { %4415 = vrsqrt.f32 %v5825_v23  ;;  %v1341_v47 = vsub.f32 1.5, %v1340_v7  ;;  %vm1383_vm4 = vweird.f32 %v5825_v23 }
 0x296   :  { %4417 = vrsqrt.f32 %v5829_v57 }
 0x297   :  { %4033 = vmatmul.msk.bf16.gmra.mxu0 %vm154_vm0, %v5823_v46  ;;  %4041 = vmatmul.msk.bf16.gmra.mxu1 %vm154_vm0, %v5823_v46  ;;  %4419 = vrsqrt.f32 %v5837_v2  ;;  %v1342_v7 = vmul.f32 %v5821_v8, %v1341_v47  ;;  %v4329_v47 = vld [vmem:[#allocation12 + $0x60] sm:$0xff] }
 0x298   :  { %4049 = vmatmul.msk.bf16.gmra.mxu2 %vm154_vm0, %v5823_v46  ;;  %4057 = vmatmul.msk.bf16.gmra.mxu3 %vm154_vm0, %v5823_v46 }
 0x299   :  { %v1346_v50 = vsel %vm5926_vm14, %v5821_v8, %v1342_v7 }
 0x29a   :  { %v1227_v25 = vpop.xlane.xlu2 %1226  ;;  %v2446_v49 = vpop.xlane.xlu1 %2445  ;;  %v1416_v8 = vmul.f32 %v1346_v50, %v5477_v30 }
 0x29b   :  { %v5862_v31 = vmax.f32 %v1227_v25, 1e-24  ;;  %v2477_v36 = vadd.f32 %v2446_v49, %v2429_v12  ;;  %v5876_v40 = vpop.eup %4415 }
 0x29c   :  { %v5879_v38 = vpop.eup %4417  ;;  %v1378_v51 = vmul.f32 %v5876_v40, %v5825_v23  ;;  %vm1384_vm10 = vweird.f32 %v5876_v40  ;;  %v3416_v23 = vld [vmem:[%s7247_s12] sm:$0xff]  ;;  %s4804_s12 = smov [#allocation16]  }
 0x29d   :  { %4421 = vrsqrt.f32 %v5862_v31  ;;  %2494 = vst.msk [vmem:[#allocation3] sm:$0xff] %vm171_vm15, %v2477_v36  ;;  %v5882_v62 = vpop.eup %4419  ;;  %v1368_v49 = vmul.f32 %v5879_v38, %v5829_v57  ;;  %vm1393_vm11 = vweird.f32 %v5862_v31  ;;  %vm1374_vm5 = vweird.f32 %v5879_v38  ;;  %s3715_s7 = sshll.u32 %s4804_s12, 4  ;;  %s3716_s7 = int_to_ptr.vmem [resolvable:$true] %s3715_s7 }
 0x29e   :  { %4423 = vrsqrt.f32 %v5858_v15  ;;  %v1358_v13 = vmul.f32 %v5882_v62, %v5837_v2  ;;  %v1379_v11 = vmul.f32 %v5876_v40, %v1378_v51 }
 0x2a0   :  { %v1359_v51 = vmul.f32 %v5882_v62, %v1358_v13 }
 0x2a2   :  { %v1230_v29 = vpop.xlane.xlu0 %1229  ;;  %v2448_v16 = vpop.xlane.xlu2 %2447  ;;  %v1360_v19 = vmul.f32 0.5, %v1359_v51 }
 0x2a3   :  { %v5886_v12 = vpop.eup %4421  ;;  %v5889_v4 = vmax.f32 %v1230_v29, 1e-24  ;;  %v2478_v27 = vadd.f32 %v2448_v16, %v2430_v32  ;;  %v2452_v21 = vpop.xlane.xlu1 %2451  ;;  %v1369_v32 = vmul.f32 %v5879_v38, %v1368_v49  ;;  %v1332_v29 = vmul.f32 %v5827_v55, %v1331_v63 }
 0x2a4   :  { %v5891_v25 = vpop.eup %4423  ;;  %v1388_v18 = vmul.f32 %v5886_v12, %v5862_v31  ;;  %v2480_v36 = vadd.f32 %v2452_v21, %v2432_v33  ;;  %v2431_v33 = vld [vmem:[#allocation3 + $0x10] sm:$0xff]  ;;  %v1380_v16 = vmul.f32 0.5, %v1379_v11  ;;  %vm1394_vm1 = vweird.f32 %v5886_v12 }
 0x2a5   :  { %4425 = vrsqrt.f32 %v5889_v4  ;;  %2495 = vst.msk [vmem:[#allocation3 + $0x8] sm:$0xff] %vm171_vm15, %v2478_v27  ;;  %v1348_v42 = vmul.f32 %v5891_v25, %v5858_v15  ;;  %v1370_v13 = vmul.f32 0.5, %v1369_v32  ;;  %vm5951_vm14 = vmor %vm1393_vm11, %vm1394_vm1  ;;  %vm1403_vm8 = vweird.f32 %v5889_v4 }
 0x2a6   :  { %v1389_v37 = vmul.f32 %v5886_v12, %v1388_v18  ;;  %2497 = vst.msk [vmem:[#allocation3 + $0x18] sm:$0xff] %vm171_vm15, %v2480_v36  ;;  %vm1364_vm1 = vweird.f32 %v5882_v62 }
 0x2a7   :  { %4034 = vmatmul.msk.bf16.gmra.mxu0 %vm154_vm0, %v5897_v48  ;;  %4042 = vmatmul.msk.bf16.gmra.mxu1 %vm154_vm0, %v5897_v48  ;;  %v1349_v49 = vmul.f32 %v5891_v25, %v1348_v42  ;;  %v1336_v42 = vsel %vm1335_vm9, %v5827_v55, %v1332_v29  ;;  %v1371_v32 = vsub.f32 1.5, %v1370_v13  ;;  %vm5956_vm9 = vmor %vm1383_vm4, %vm1384_vm10  ;;  %vm1373_vm10 = vweird.f32 %v5829_v57 }
 0x2a8   :  { %v1390_v14 = vmul.f32 0.5, %v1389_v37  ;;  %4050 = vmatmul.msk.bf16.gmra.mxu2 %vm154_vm0, %v5897_v48  ;;  %4058 = vmatmul.msk.bf16.gmra.mxu3 %vm154_vm0, %v5897_v48  ;;  %v1415_v51 = vmul.f32 %v1336_v42, %v5469_v9  ;;  %vm5976_vm4 = vmor %vm1373_vm10, %vm1374_vm5 }
 0x2a9   :  { %v1350_v7 = vmul.f32 0.5, %v1349_v49  ;;  %v1372_v9 = vmul.f32 %v5879_v38, %v1371_v32  ;;  %v4346_v49 = vld [vmem:[#allocation12 + $0xe8] sm:$0xff] }
 0x2aa   :  { %v2450_v24 = vpop.xlane.xlu0 %2449  ;;  %v2454_v27 = vpop.xlane.xlu2 %2453  ;;  %v1391_v63 = vsub.f32 1.5, %v1390_v14 }
 0x2ab   :  { %v4426_v21 = vpop.eup %4425  ;;  %v2479_v18 = vadd.f32 %v2450_v24, %v2431_v33  ;;  %v2481_v36 = vadd.f32 %v2454_v27, %v2433_v43  ;;  %v1381_v33 = vsub.f32 1.5, %v1380_v16  ;;  %v1361_v27 = vsub.f32 1.5, %v1360_v19 }
 0x2ac   :  { %v1398_v11 = vmul.f32 %v4426_v21, %v5889_v4  ;;  %v2514_v37 = vld [vmem:[#allocation3 + $0x8] sm:$0xff]  ;;  %v1392_v14 = vmul.f32 %v5886_v12, %v1391_v63  ;;  %vm1404_vm12 = vweird.f32 %v4426_v21  ;;  %v5947_v16 = vpack.c.bf16 %v1416_v8, %v1415_v51 }
 0x2ad   :  { %2496 = vst.msk [vmem:[#allocation3 + $0x10] sm:$0xff] %vm171_vm15, %v2479_v18  ;;  %v2546_v6 = vmax.f32 %v2514_v37, 1.0  ;;  %v1382_v55 = vmul.f32 %v5876_v40, %v1381_v33  ;;  %v2516_v30 = vld [vmem:[#allocation3 + $0x18] sm:$0xff]  ;;  %vm1405_vm11 = vmor %vm1403_vm8, %vm1404_vm12  ;;  %v3417_v63 = vmul.f32 %v3416_v23, %v3416_v23  ;;  %vm1354_vm8 = vweird.f32 %v5891_v25  ;;  %v4328_v23 = vld [vmem:[#allocation12 + $0x58] sm:$0xff] }
 0x2ae   :  { %v1399_v43 = vmul.f32 %v4426_v21, %v1398_v11  ;;  %2498 = vst.msk [vmem:[#allocation3 + $0x20] sm:$0xff] %vm171_vm15, %v2481_v36  ;;  %v1396_v31 = vsel %vm5951_vm14, %v5886_v12, %v1392_v14  ;;  %v2548_v13 = vmax.f32 %v2516_v30, 1.0  ;;  %v1362_v11 = vmul.f32 %v5882_v62, %v1361_v27  ;;  %v4340_v27 = vld [vmem:[#allocation12 + $0xb8] sm:$0xff] }
 0x2af   :  { %2568 = vperm.xlu2 %4390, %v2546_v6   ;;  %v1351_v6 = vsub.f32 1.5, %v1350_v7  ;;  %v1386_v12 = vsel %vm5956_vm9, %v5876_v40, %v1382_v55  ;;  %v1421_v19 = vmul.f32 %v1396_v31, %v5569_v20  ;;  %v3418_v57 = vsel %vm154_vm0, %v3417_v63, 0.0  ;;  %v4348_v55 = vld [vmem:[#allocation12 + $0xf8] sm:$0xff]  ;;  %2143 = vmatpush.bf16.msrb.mxu2 %v4340_v27 }
 0x2b0   :  { %v1400_v24 = vmul.f32 0.5, %v1399_v43  ;;  %vm1363_vm12 = vweird.f32 %v5837_v2  ;;  %v1376_v20 = vsel %vm5976_vm4, %v5879_v38, %v1372_v9  ;;  %v6007_v2 = vadd.s32 80, %v5501_v52  ;;  %v4332_v38 = vld [vmem:[#allocation12 + $0x78] sm:$0xff]  ;;  %3419 = vadd.xlane.f32.xlu1 %v3418_v57  ;;  %2192 = vmatpush.bf16.msrb.mxu3 %v4348_v55  ;;  %v4335_v57 = vld [vmem:[#allocation12 + $0x90] sm:$0xff] }
 0x2b1   :  { %v1352_v40 = vmul.f32 %v5891_v25, %v1351_v6  ;;  %vm5999_vm5 = vmor %vm1363_vm12, %vm1364_vm1  ;;  %vm1353_vm14 = vweird.f32 %v5858_v15  ;;  %2094 = vmatpush.bf16.msra.mxu1 %v4332_v38  ;;  %v6047_v51 = vadd.s32 96, %v5501_v52  ;;  %v6050_v30 = vadd.s32 104, %v5501_v52  ;;  %v4347_v6 = vld [vmem:[#allocation12 + $0xf0] sm:$0xff]  ;;  %v2434_v31 = vld [vmem:[#allocation3 + $0x28] sm:$0xff] }
 0x2b2   :  { %v1401_v29 = vsub.f32 1.5, %v1400_v24  ;;  %v1366_v43 = vsel %vm5999_vm5, %v5882_v62, %v1362_v11  ;;  %vm1355_vm9 = vmor %vm1353_vm14, %vm1354_vm8  ;;  %vm2286_vm1 = vcmp.eq.s32.totalorder %v6007_v2, %v5506_v41  ;;  %v2513_v63 = vld [vmem:[#allocation3] sm:$0xff]  ;;  %v2458_v37 = vpop.xlane.xlu2 %2457  ;;  %v4334_v38 = vld [vmem:[#allocation12 + $0x88] sm:$0xff] }
 0x2b3   :  { %v1356_v7 = vsel %vm1355_vm9, %v5891_v25, %v1352_v40  ;;  %v1418_v15 = vmul.f32 %v1366_v43, %v5491_v44  ;;  %v6027_v25 = vadd.s32 88, %v5501_v52  ;;  %vm2288_vm4 = vcmp.eq.s32.totalorder %v6047_v51, %v5506_v41  ;;  %v4327_v11 = vld [vmem:[#allocation12 + $0x50] sm:$0xff]  ;;  %v4342_v43 = vld [vmem:[#allocation12 + $0xc8] sm:$0xff] }
 0x2b4   :  { %v1402_v18 = vmul.f32 %v4426_v21, %v1401_v29  ;;  %v2515_v36 = vld [vmem:[#allocation3 + $0x10] sm:$0xff]  ;;  %v1417_v62 = vmul.f32 %v1356_v7, %v5484_v60  ;;  %v4331_v60 = vld [vmem:[#allocation12 + $0x70] sm:$0xff]  ;;  %vm2289_vm8 = vcmp.eq.s32.totalorder %v6050_v30, %v5506_v41  ;;  %2193 = vmatpush.bf16.msrb.mxu3 %v4347_v6 }
 0x2b5   :  { %v2547_v50 = vmax.f32 %v2515_v36, 1.0  ;;  %v2517_v8 = vld [vmem:[#allocation3 + $0x20] sm:$0xff]  ;;  %2095 = vmatpush.bf16.msra.mxu1 %v4331_v60  ;;  %v4330_v29 = vld [vmem:[#allocation12 + $0x68] sm:$0xff]  ;;  %vm6063_vm12 = vmpackc.low %vm2289_vm8, %vm2288_vm4  ;;  %v4204_v7 = vsel %vm2289_vm8, 1.0, %v4800_v53 }
 0x2b6   :  { %v1406_v4 = vsel %vm1405_vm11, %v4426_v21, %v1402_v18  ;;  %v1420_v21 = vmul.f32 %v1386_v12, %v5550_v28  ;;  %v1419_v28 = vmul.f32 %v1376_v20, %v5510_v17  ;;  %v2549_v14 = vmax.f32 %v2517_v8, 1.0  ;;  %v2456_v18 = vpop.xlane.xlu0 %2455  ;;  %v4344_v12 = vld [vmem:[#allocation12 + $0xd8] sm:$0xff]  ;;  %v4343_v40 = vld [vmem:[#allocation12 + $0xd0] sm:$0xff]  ;;  %v4333_v8 = vld [vmem:[#allocation12 + $0x80] sm:$0xff] }
 0x2b7   :  { %v1422_v42 = vmul.f32 %v1406_v4, %v5583_v0  ;;  %4035 = vmatmul.msk.bf16.gmra.mxu0 %vm154_vm0, %v5947_v16  ;;  %4043 = vmatmul.msk.bf16.gmra.mxu1 %vm154_vm0, %v5947_v16  ;;  %v4201_v17 = vsel %vm2286_vm1, 1.0, %v4800_v53  ;;  %v1428_v24 = vpack.c.bf16 %v1418_v15, %v1417_v62  ;;  %vm2287_vm11 = vcmp.eq.s32.totalorder %v6027_v25, %v5506_v41  ;;  %v4326_v4 = vld [vmem:[#allocation12 + $0x48] sm:$0xff] }
 0x2b8   :  { %4051 = vmatmul.msk.bf16.gmra.mxu2 %vm154_vm0, %v5947_v16  ;;  %4059 = vmatmul.msk.bf16.gmra.mxu3 %vm154_vm0, %v5947_v16  ;;  %v1429_v32 = vpack.c.bf16 %v1420_v21, %v1419_v28  ;;  %vm6042_vm10 = vmpackc.low %vm2287_vm11, %vm2286_vm1  ;;  %v2482_v36 = vadd.f32 %v2456_v18, %v2434_v31  ;;  %v4325_v21 = vld [vmem:[#allocation12 + $0x40] sm:$0xff]  ;;  %v4203_v15 = vsel %vm2288_vm4, 1.0, %v4800_v53 }
 0x2b9   :  { %v6004_v33 = vpack.c.bf16 %v1422_v42, %v1421_v19  ;;  %2573 = vperm.xlu0 %4391, %v2547_v50   ;;  %2578 = vperm.xlu2 %4390, %v2548_v13   ;;  %v4337_v50 = vld [vmem:[#allocation12 + $0xa0] sm:$0xff] }
 0x2ba   :  { %2465 = vadd.xlane.f32.xlu1 %v4201_v17  ;;  %2096 = vmatpush.bf16.msra.mxu1 %v4330_v29  ;;  %2499 = vst.msk [vmem:[#allocation3 + $0x28] sm:$0xff] %vm171_vm15, %v2482_v36  ;;  %v4345_v13 = vld [vmem:[#allocation12 + $0xe0] sm:$0xff] }
 0x2bb   :  { %2348 = vmatpush.bf16.msra.mxu0 %v6004_v33  ;;  %2194 = vmatpush.bf16.msrb.mxu3 %v4346_v49  ;;  %v2435_v19 = vld [vmem:[#allocation3 + $0x30] sm:$0xff] }
 0x2bc   :  { %v2483_v42 = vadd.f32 %v2458_v37, %v2435_v19  ;;  %v4341_v28 = vld [vmem:[#allocation12 + $0xc0] sm:$0xff] }
 0x2be   :  { %2097 = vmatpush.bf16.msra.mxu1 %v4329_v47  ;;  %2500 = vst.msk [vmem:[#allocation3 + $0x30] sm:$0xff] %vm171_vm15, %v2483_v42 }
 0x2bf   :  { %2349 = vmatpush.bf16.msra.mxu0 %v1429_v32  ;;  %2195 = vmatpush.bf16.msrb.mxu3 %v4345_v13 }
 0x2c1   :  { %2583 = vperm.xlu0 %4391, %v2549_v14   ;;  %v2518_v20 = vld [vmem:[#allocation3 + $0x28] sm:$0xff] }
 0x2c2   :  { %2098 = vmatpush.bf16.msra.mxu1 %v4328_v23  ;;  %v2550_v0 = vmax.f32 %v2518_v20, 1.0 }
 0x2c3   :  { %2350 = vmatpush.bf16.msra.mxu0 %v1428_v24  ;;  %2196 = vmatpush.bf16.msrb.mxu3 %v4344_v12 }
 0x2c5   :  { %v2519_v49 = vld [vmem:[#allocation3 + $0x30] sm:$0xff] }
 0x2c6   :  { %2099 = vmatpush.bf16.msra.mxu1 %v4327_v11 }
 0x2c7   :  { %4036 = vmatmul.msk.bf16.gmra.mxu0 %vm154_vm0, %v1428_v24  ;;  %4044 = vmatmul.msk.bf16.gmra.mxu1 %vm154_vm0, %v1428_v24 }
 0x2c8   :  { %4052 = vmatmul.msk.bf16.gmra.mxu2 %vm154_vm0, %v1428_v24  ;;  %4060 = vmatmul.msk.bf16.gmra.mxu3 %vm154_vm0, %v1428_v24 }
 0x2c9   :  { %2351 = vmatpush.bf16.msra.mxu0 %v5947_v16  ;;  %v4339_v16 = vld [vmem:[#allocation12 + $0xb0] sm:$0xff]  ;;  %2197 = vmatpush.bf16.msrb.mxu3 %v4343_v40 }
 0x2ca   :  { %2144 = vmatpush.bf16.msrb.mxu2 %v4339_v16  ;;  %2100 = vmatpush.bf16.msra.mxu1 %v4326_v4 }
 0x2cd   :  { %2352 = vmatpush.bf16.msra.mxu0 %v5897_v48  ;;  %v4338_v48 = vld [vmem:[#allocation12 + $0xa8] sm:$0xff]  ;;  %2198 = vmatpush.bf16.msrb.mxu3 %v4342_v43 }
 0x2ce   :  { %2145 = vmatpush.bf16.msrb.mxu2 %v4338_v48  ;;  %2101 = vmatpush.bf16.msra.mxu1 %v4325_v21 }
 0x2d1   :  { %2353 = vmatpush.bf16.msra.mxu0 %v5823_v46  ;;  %v2545_v46 = vmax.f32 %v2513_v63, 1.0  ;;  %2199 = vmatpush.bf16.msrb.mxu3 %v4341_v28  ;;  %v2551_v63 = vmax.f32 %v2519_v49, 1.0 }
 0x2d2   :  { %2146 = vmatpush.bf16.msrb.mxu2 %v4337_v50 }
 0x2d3   :  { %2563 = vperm.xlu1 %4392, %v2545_v46  }
 0x2d5   :  { %2354 = vmatpush.bf16.msra.mxu0 %v5745_v5  ;;  %v4336_v5 = vld [vmem:[#allocation12 + $0x98] sm:$0xff] }
 0x2d6   :  { %2147 = vmatpush.bf16.msrb.mxu2 %v4336_v5 }
 0x2d7   :  { %4037 = vmatmul.msk.bf16.gmra.mxu0 %vm154_vm0, %v1429_v32  ;;  %4045 = vmatmul.msk.bf16.gmra.mxu1 %vm154_vm0, %v1429_v32 }
 0x2d8   :  { %4053 = vmatmul.msk.bf16.gmra.mxu2 %vm154_vm0, %v1429_v32  ;;  %4061 = vmatmul.msk.bf16.gmra.mxu3 %vm154_vm0, %v1429_v32  ;;  %v1435_v32 = vld [vmem:[#allocation10] sm:$0xf] }
 0x2d9   :  { %2355 = vmatpush.bf16.msra.mxu0 %v5685_v35  ;;  %v4202_v35 = vsel %vm2287_vm11, 1.0, %v4800_v53  ;;  %v1436_v14 = vunpack.c.l.bf16 %v1435_v32 }
 0x2da   :  { %2148 = vmatpush.bf16.msrb.mxu2 %v4335_v57 }
 0x2db   :  { %2588 = vperm.xlu1 %4392, %v2550_v0   ;;  %v1438_v62 = vperm.slane %v1436_v14, 0  ;;  %v1439_v17 = vperm.slane %v1436_v14, 2  ;;  %v1441_v29 = vperm.slane %v1436_v14, 6 }
 0x2dd   :  { %v6096_v27 = vperm.slane %v1438_v62, 0  ;;  %v6098_v55 = vperm.slane %v1439_v17, 0  ;;  %v6106_v13 = vperm.slane %v1441_v29, 0 }
 0x2de   :  { %2149 = vmatpush.bf16.msrb.mxu2 %v4334_v38 }
 0x2e2   :  { %2467 = vadd.xlane.f32.xlu2 %v4202_v35  ;;  %2150 = vmatpush.bf16.msrb.mxu2 %v4333_v8 }
 0x2e7   :  { %4038 = vmatmul.msk.bf16.gmra.mxu0 %vm154_vm0, %v6004_v33  ;;  %4046 = vmatmul.msk.bf16.gmra.mxu1 %vm154_vm0, %v6004_v33 }
 0x2e8   :  { %4054 = vmatmul.msk.bf16.gmra.mxu2 %vm154_vm0, %v6004_v33  ;;  %4062 = vmatmul.msk.bf16.gmra.mxu3 %vm154_vm0, %v6004_v33  ;;  %v1440_v33 = vperm.slane %v1436_v14, 4  ;;  %v6118_v14 = vld [vmem:[%s7236_s1] ss:$0 sm:$0xff] }
 0x2ea   :  { %2471 = vadd.xlane.f32.xlu2 %v4204_v7  ;;  %v6104_v50 = vperm.slane %v1440_v33, 0  ;;  %v6113_v7 = vadd.s32 112, %v5501_v52 }
 0x2eb   :  { %2469 = vadd.xlane.f32.xlu0 %v4203_v15 }
 0x2ec   :  { %vm2290_vm5 = vcmp.eq.s32.totalorder %v6113_v7, %v6118_v14 }
 0x2ed   :  { %v4205_v17 = vsel %vm2290_vm5, 1.0, %v4800_v53 }
 0x2f4   :  { %v1503_v24 = vpop.f32.mrf.mxu0  ;;  %v1552_v60 = vpop.f32.mrf.mxu1 }
 0x2f5   :  { %v1504_v16 = vadd.f32 %v1503_v24, %v6096_v27  ;;  %v1553_v6 = vadd.f32 %v1552_v60, %v6098_v55 }
 0x2f7   :  { %v1690_v46 = vmax.f32 %v1504_v16, 0.0  ;;  %v1691_v11 = vmax.f32 %v1553_v6, 0.0 }
 0x2fb   :  { %v1601_v47 = vpop.f32.mrf.mxu2  ;;  %v1650_v48 = vpop.f32.mrf.mxu3 }
 0x2fc   :  { %v1505_v31 = vpop.f32.mrf.mxu0  ;;  %v1554_v18 = vpop.f32.mrf.mxu1  ;;  %v1602_v19 = vadd.f32 %v1601_v47, %v6104_v50  ;;  %v1651_v42 = vadd.f32 %v1650_v48, %v6106_v13 }
 0x2fd   :  { %v1506_v36 = vadd.f32 %v1505_v31, %v6096_v27  ;;  %v1555_v23 = vadd.f32 %v1554_v18, %v6098_v55 }
 0x2fe   :  { %v1692_v38 = vmax.f32 %v1602_v19, 0.0  ;;  %v1693_v43 = vmax.f32 %v1651_v42, 0.0 }
 0x2ff   :  { %v1694_v5 = vmax.f32 %v1506_v36, 0.0  ;;  %v1695_v12 = vmax.f32 %v1555_v23, 0.0  ;;  %v6131_v36 = vadd.s32 120, %v5501_v52 }
 0x301   :  { %v1754_v4 = vpack.c.bf16 %v1694_v5, %v1690_v46  ;;  %v1755_v37 = vpack.c.bf16 %v1695_v12, %v1691_v11  ;;  %vm2291_vm14 = vcmp.eq.s32.totalorder %v6131_v36, %v6118_v14 }
 0x302   :  { %2593 = vperm.xlu2 %4390, %v2551_v63   ;;  %vm6143_vm9 = vmpackc.low %vm2291_vm14, %vm2290_vm5 }
 0x303   :  { %v1603_v57 = vpop.f32.mrf.mxu2  ;;  %v1652_v40 = vpop.f32.mrf.mxu3  ;;  %2053 = vmatmul.bf16.vlgmr.msrb.gmra.mxu0 %v1754_v4  ;;  %2102 = vmatmul.bf16.vlgmr.msra.gmra.mxu1 %v1755_v37 }
 0x304   :  { %v1604_v20 = vadd.f32 %v1603_v57, %v6104_v50  ;;  %v1653_v35 = vadd.f32 %v1652_v40, %v6106_v13  ;;  %v1508_v0 = vpop.f32.mrf.mxu0  ;;  %v1557_v21 = vpop.f32.mrf.mxu1 }
 0x305   :  { %v1509_v62 = vadd.f32 %v1508_v0, %v6096_v27  ;;  %v1558_v24 = vadd.f32 %v1557_v21, %v6098_v55  ;;  %2473 = vadd.xlane.f32.xlu1 %v4205_v17  ;;  %v2460_v21 = vpop.xlane.xlu0 %2459 }
 0x306   :  { %v1696_v8 = vmax.f32 %v1604_v20, 0.0  ;;  %v1697_v28 = vmax.f32 %v1653_v35, 0.0 }
 0x307   :  { %v1698_v48 = vmax.f32 %v1509_v62, 0.0  ;;  %v1699_v49 = vmax.f32 %v1558_v24, 0.0 }
 0x308   :  { %v1756_v15 = vpack.c.bf16 %v1696_v8, %v1692_v38  ;;  %v1757_v32 = vpack.c.bf16 %v1697_v28, %v1693_v43  ;;  %v2436_v38 = vld [vmem:[#allocation3 + $0x38] sm:$0xff] }
 0x309   :  { %v2484_v28 = vadd.f32 %v2460_v21, %v2436_v38  ;;  %v2438_v38 = vld [vmem:[#allocation3 + $0x48] sm:$0xff] }
 0x30a   :  { %2151 = vmatmul.bf16.vlgmr.msrb.gmra.mxu2 %v1756_v15  ;;  %2200 = vmatmul.bf16.vlgmr.msrb.gmra.mxu3 %v1757_v32 }
 0x30b   :  { %v1606_v60 = vpop.f32.mrf.mxu2  ;;  %v1655_v33 = vpop.f32.mrf.mxu3  ;;  %2501 = vst.msk [vmem:[#allocation3 + $0x38] sm:$0xff] %vm171_vm15, %v2484_v28  ;;  %v4206_v28 = vsel %vm2291_vm14, 1.0, %v4800_v53 }
 0x30c   :  { %v1510_v29 = vpop.f32.mrf.mxu0  ;;  %v1559_v16 = vpop.f32.mrf.mxu1  ;;  %v1607_v46 = vadd.f32 %v1606_v60, %v6104_v50  ;;  %v1656_v11 = vadd.f32 %v1655_v33, %v6106_v13 }
 0x30d   :  { %v1511_v6 = vadd.f32 %v1510_v29, %v6096_v27  ;;  %v1560_v47 = vadd.f32 %v1559_v16, %v6098_v55  ;;  %v2462_v16 = vpop.xlane.xlu0 %2461 }
 0x30e   :  { %v1700_v40 = vmax.f32 %v1607_v46, 0.0  ;;  %v1701_v20 = vmax.f32 %v1656_v11, 0.0 }
 0x30f   :  { %v1702_v31 = vmax.f32 %v1511_v6, 0.0  ;;  %v1703_v18 = vmax.f32 %v1560_v47, 0.0 }
 0x311   :  { %v1758_v23 = vpack.c.bf16 %v1702_v31, %v1698_v48  ;;  %v1759_v63 = vpack.c.bf16 %v1703_v18, %v1699_v49 }
 0x313   :  { %v1608_v12 = vpop.f32.mrf.mxu2  ;;  %v1657_v4 = vpop.f32.mrf.mxu3  ;;  %2058 = vmatmul.bf16.gmra.mxu0 %v1758_v23  ;;  %2107 = vmatmul.bf16.gmra.mxu1 %v1759_v63  ;;  %v2437_v23 = vld [vmem:[#allocation3 + $0x40] sm:$0xff] }
 0x314   :  { %v1609_v37 = vadd.f32 %v1608_v12, %v6104_v50  ;;  %v1658_v19 = vadd.f32 %v1657_v4, %v6106_v13  ;;  %v1513_v42 = vpop.f32.mrf.mxu0  ;;  %v1562_v57 = vpop.f32.mrf.mxu1  ;;  %v2485_v11 = vadd.f32 %v2462_v16, %v2437_v23 }
 0x315   :  { %v1514_v15 = vadd.f32 %v1513_v42, %v6096_v27  ;;  %v1563_v32 = vadd.f32 %v1562_v57, %v6098_v55  ;;  %v2464_v21 = vpop.xlane.xlu0 %2463 }
 0x316   :  { %v1704_v35 = vmax.f32 %v1609_v37, 0.0  ;;  %v1705_v0 = vmax.f32 %v1658_v19, 0.0  ;;  %2502 = vst.msk [vmem:[#allocation3 + $0x40] sm:$0xff] %vm171_vm15, %v2485_v11 }
 0x317   :  { %v1706_v6 = vmax.f32 %v1514_v15, 0.0  ;;  %v1707_v47 = vmax.f32 %v1563_v32, 0.0  ;;  %v2486_v15 = vadd.f32 %v2464_v21, %v2438_v38 }
 0x318   :  { %v1760_v43 = vpack.c.bf16 %v1704_v35, %v1700_v40  ;;  %v1761_v8 = vpack.c.bf16 %v1705_v0, %v1701_v20 }
 0x319   :  { %2503 = vst.msk [vmem:[#allocation3 + $0x48] sm:$0xff] %vm171_vm15, %v2486_v15 }
 0x31a   :  { %2156 = vmatmul.bf16.gmra.mxu2 %v1760_v43  ;;  %2205 = vmatmul.bf16.gmra.mxu3 %v1761_v8 }
 0x31b   :  { %v1611_v62 = vpop.f32.mrf.mxu2  ;;  %v1660_v17 = vpop.f32.mrf.mxu3 }
 0x31c   :  { %v1515_v24 = vpop.f32.mrf.mxu0  ;;  %v1564_v60 = vpop.f32.mrf.mxu1  ;;  %v1612_v63 = vadd.f32 %v1611_v62, %v6104_v50  ;;  %v1661_v46 = vadd.f32 %v1660_v17, %v6106_v13 }
 0x31d   :  { %v1516_v33 = vadd.f32 %v1515_v24, %v6096_v27  ;;  %v1565_v29 = vadd.f32 %v1564_v60, %v6098_v55 }
 0x31e   :  { %v1708_v40 = vmax.f32 %v1612_v63, 0.0  ;;  %v1709_v20 = vmax.f32 %v1661_v46, 0.0 }
 0x31f   :  { %v1710_v48 = vmax.f32 %v1516_v33, 0.0  ;;  %v1711_v49 = vmax.f32 %v1565_v29, 0.0 }
 0x321   :  { %v1762_v31 = vpack.c.bf16 %v1710_v48, %v1706_v6  ;;  %v1763_v18 = vpack.c.bf16 %v1711_v49, %v1707_v47 }
 0x323   :  { %v1613_v12 = vpop.f32.mrf.mxu2  ;;  %v1662_v4 = vpop.f32.mrf.mxu3  ;;  %2063 = vmatmul.bf16.gmra.mxu0 %v1762_v31  ;;  %2112 = vmatmul.bf16.gmra.mxu1 %v1763_v18 }
 0x324   :  { %v1614_v37 = vadd.f32 %v1613_v12, %v6104_v50  ;;  %v1663_v19 = vadd.f32 %v1662_v4, %v6106_v13  ;;  %v1518_v42 = vpop.f32.mrf.mxu0  ;;  %v1567_v57 = vpop.f32.mrf.mxu1 }
 0x325   :  { %v1519_v32 = vadd.f32 %v1518_v42, %v6096_v27  ;;  %v1568_v62 = vadd.f32 %v1567_v57, %v6098_v55 }
 0x326   :  { %v1712_v35 = vmax.f32 %v1614_v37, 0.0  ;;  %v1713_v0 = vmax.f32 %v1663_v19, 0.0 }
 0x327   :  { %v1714_v14 = vmax.f32 %v1519_v32, 0.0  ;;  %v1715_v6 = vmax.f32 %v1568_v62, 0.0 }
 0x328   :  { %v1764_v43 = vpack.c.bf16 %v1712_v35, %v1708_v40  ;;  %v1765_v8 = vpack.c.bf16 %v1713_v0, %v1709_v20 }
 0x32a   :  { %2161 = vmatmul.bf16.gmra.mxu2 %v1764_v43  ;;  %2210 = vmatmul.bf16.gmra.mxu3 %v1765_v8 }
 0x32b   :  { %v1616_v17 = vpop.f32.mrf.mxu2  ;;  %v1665_v24 = vpop.f32.mrf.mxu3  ;;  %2475 = vadd.xlane.f32.xlu2 %v4206_v28 }
 0x32c   :  { %v1520_v60 = vpop.f32.mrf.mxu0  ;;  %v1569_v33 = vpop.f32.mrf.mxu1  ;;  %v1617_v18 = vadd.f32 %v1616_v17, %v6104_v50  ;;  %v1666_v23 = vadd.f32 %v1665_v24, %v6106_v13 }
 0x32d   :  { %v1521_v29 = vadd.f32 %v1520_v60, %v6096_v27  ;;  %v1570_v16 = vadd.f32 %v1569_v33, %v6098_v55 }
 0x32e   :  { %v1716_v19 = vmax.f32 %v1617_v18, 0.0  ;;  %v1717_v42 = vmax.f32 %v1666_v23, 0.0 }
 0x32f   :  { %v1718_v47 = vmax.f32 %v1521_v29, 0.0  ;;  %v1719_v48 = vmax.f32 %v1570_v16, 0.0 }
 0x331   :  { %v1766_v49 = vpack.c.bf16 %v1718_v47, %v1714_v14  ;;  %v1767_v31 = vpack.c.bf16 %v1719_v48, %v1715_v6 }
 0x333   :  { %v1618_v63 = vpop.f32.mrf.mxu2  ;;  %v1667_v46 = vpop.f32.mrf.mxu3  ;;  %2068 = vmatmul.bf16.gmra.mxu0 %v1766_v49  ;;  %2117 = vmatmul.bf16.gmra.mxu1 %v1767_v31 }
 0x334   :  { %v1619_v11 = vadd.f32 %v1618_v63, %v6104_v50  ;;  %v1668_v12 = vadd.f32 %v1667_v46, %v6106_v13  ;;  %v1523_v4 = vpop.f32.mrf.mxu0  ;;  %v1572_v37 = vpop.f32.mrf.mxu1 }
 0x335   :  { %v1524_v0 = vadd.f32 %v1523_v4, %v6096_v27  ;;  %v1573_v21 = vadd.f32 %v1572_v37, %v6098_v55  ;;  %v6180_v37 = vpop.permute.xlu0 %2573 }
 0x336   :  { %v1720_v57 = vmax.f32 %v1619_v11, 0.0  ;;  %v1721_v40 = vmax.f32 %v1668_v12, 0.0 }
 0x337   :  { %v1722_v62 = vmax.f32 %v1524_v0, 0.0  ;;  %v1723_v17 = vmax.f32 %v1573_v21, 0.0 }
 0x338   :  { %v1768_v20 = vpack.c.bf16 %v1720_v57, %v1716_v19  ;;  %v1769_v35 = vpack.c.bf16 %v1721_v40, %v1717_v42 }
 0x33a   :  { %2166 = vmatmul.bf16.gmra.mxu2 %v1768_v20  ;;  %2215 = vmatmul.bf16.gmra.mxu3 %v1769_v35 }
 0x33b   :  { %v1621_v38 = vpop.f32.mrf.mxu2  ;;  %v1670_v43 = vpop.f32.mrf.mxu3 }
 0x33c   :  { %v1525_v8 = vpop.f32.mrf.mxu0  ;;  %v1574_v28 = vpop.f32.mrf.mxu1  ;;  %v1622_v16 = vadd.f32 %v1621_v38, %v6104_v50  ;;  %v1671_v14 = vadd.f32 %v1670_v43, %v6106_v13 }
 0x33d   :  { %v1526_v15 = vadd.f32 %v1525_v8, %v6096_v27  ;;  %v1575_v32 = vadd.f32 %v1574_v28, %v6098_v55 }
 0x33e   :  { %v1724_v23 = vmax.f32 %v1622_v16, 0.0  ;;  %v1725_v63 = vmax.f32 %v1671_v14, 0.0 }
 0x33f   :  { %v1726_v24 = vmax.f32 %v1526_v15, 0.0  ;;  %v1727_v60 = vmax.f32 %v1575_v32, 0.0 }
 0x341   :  { %v1771_v33 = vpack.c.bf16 %v1727_v60, %v1723_v17  ;;  %v1770_v29 = vpack.c.bf16 %v1726_v24, %v1722_v62  ;;  %v6188_v24 = vpop.permute.xlu0 %2583 }
 0x343   :  { %v1623_v6 = vpop.f32.mrf.mxu2  ;;  %v1672_v47 = vpop.f32.mrf.mxu3  ;;  %2073 = vmatmul.bf16.gmra.mxu0 %v1770_v29  ;;  %2122 = vmatmul.bf16.gmra.mxu1 %v1771_v33 }
 0x344   :  { %v1624_v48 = vadd.f32 %v1623_v6, %v6104_v50  ;;  %v1673_v49 = vadd.f32 %v1672_v47, %v6106_v13  ;;  %v1528_v31 = vpop.f32.mrf.mxu0  ;;  %v1577_v18 = vpop.f32.mrf.mxu1 }
 0x345   :  { %v1529_v19 = vadd.f32 %v1528_v31, %v6096_v27  ;;  %v1578_v42 = vadd.f32 %v1577_v18, %v6098_v55 }
 0x346   :  { %v1728_v46 = vmax.f32 %v1624_v48, 0.0  ;;  %v1729_v11 = vmax.f32 %v1673_v49, 0.0 }
 0x347   :  { %v1730_v38 = vmax.f32 %v1529_v19, 0.0  ;;  %v1731_v43 = vmax.f32 %v1578_v42, 0.0 }
 0x348   :  { %v1772_v12 = vpack.c.bf16 %v1728_v46, %v1724_v23  ;;  %v1773_v4 = vpack.c.bf16 %v1729_v11, %v1725_v63  ;;  %v6193_v46 = vpop.xlane.xlu1 %3419  ;;  %v6195_v11 = vpop.permute.xlu2 %2568 }
 0x34a   :  { %2171 = vmatmul.bf16.gmra.mxu2 %v1772_v12  ;;  %2220 = vmatmul.bf16.gmra.mxu3 %v1773_v4 }
 0x34b   :  { %v1626_v57 = vpop.f32.mrf.mxu2  ;;  %v1675_v40 = vpop.f32.mrf.mxu3 }
 0x34c   :  { %v1530_v20 = vpop.f32.mrf.mxu0  ;;  %v1579_v35 = vpop.f32.mrf.mxu1  ;;  %v1627_v62 = vadd.f32 %v1626_v57, %v6104_v50  ;;  %v1676_v17 = vadd.f32 %v1675_v40, %v6106_v13  ;;  %v2441_v40 = vld [vmem:[#allocation3 + $0x60] sm:$0xff] }
 0x34d   :  { %v1531_v0 = vadd.f32 %v1530_v20, %v6096_v27  ;;  %v1580_v21 = vadd.f32 %v1579_v35, %v6098_v55 }
 0x34e   :  { %v1732_v47 = vmax.f32 %v1627_v62, 0.0  ;;  %v1733_v48 = vmax.f32 %v1676_v17, 0.0 }
 0x34f   :  { %v1734_v8 = vmax.f32 %v1531_v0, 0.0  ;;  %v1735_v28 = vmax.f32 %v1580_v21, 0.0 }
 0x351   :  { %v1775_v15 = vpack.c.bf16 %v1735_v28, %v1731_v43  ;;  %v1774_v32 = vpack.c.bf16 %v1734_v8, %v1730_v38 }
 0x353   :  { %v1628_v60 = vpop.f32.mrf.mxu2  ;;  %v1677_v33 = vpop.f32.mrf.mxu3  ;;  %2078 = vmatmul.bf16.gmra.mxu0 %v1774_v32  ;;  %2127 = vmatmul.bf16.gmra.mxu1 %v1775_v15 }
 0x354   :  { %v1629_v29 = vadd.f32 %v1628_v60, %v6104_v50  ;;  %v1678_v16 = vadd.f32 %v1677_v33, %v6106_v13  ;;  %v1533_v14 = vpop.f32.mrf.mxu0  ;;  %v1582_v6 = vpop.f32.mrf.mxu1 }
 0x355   :  { %v1534_v63 = vadd.f32 %v1533_v14, %v6096_v27  ;;  %v1583_v12 = vadd.f32 %v1582_v6, %v6098_v55 }
 0x356   :  { %v1736_v49 = vmax.f32 %v1629_v29, 0.0  ;;  %v1737_v31 = vmax.f32 %v1678_v16, 0.0  ;;  %v6203_v29 = vld [vmem:[#allocation15] ss:$0 sm:$0xff] }
 0x357   :  { %v1738_v0 = vmax.f32 %v1534_v63, 0.0  ;;  %v1739_v38 = vmax.f32 %v1583_v12, 0.0  ;;  %vm2901_vm1 = vcmp.eq.s32.totalorder %v5586_v26, %v6203_v29  ;;  %vm2902_vm11 = vcmp.eq.s32.totalorder %v5581_v61, %v6203_v29 }
 0x358   :  { %v1776_v18 = vpack.c.bf16 %v1736_v49, %v1732_v47  ;;  %v1777_v23 = vpack.c.bf16 %v1737_v31, %v1733_v48  ;;  %v2439_v48 = vld [vmem:[#allocation3 + $0x50] sm:$0xff]  ;;  %v2466_v31 = vpop.xlane.xlu1 %2465  ;;  %vm4227_vm4 = vmpackc.low %vm2902_vm11, %vm2901_vm1  ;;  %vm2899_vm8 = vcmp.eq.s32.totalorder %v5501_v52, %v6203_v29  ;;  %vm2900_vm5 = vcmp.eq.s32.totalorder %v5515_v58, %v6203_v29 }
 0x359   :  { %vm4229_vm14 = vmpackc.low %vm2900_vm5, %vm2899_vm8  ;;  %vm2661_vm11 = vweird.f32 %v6195_v11 }
 0x35a   :  { %2176 = vmatmul.bf16.gmra.mxu2 %v1776_v18  ;;  %2225 = vmatmul.bf16.gmra.mxu3 %v1777_v23  ;;  %v6209_v18 = vpop.permute.xlu2 %2578 }
 0x35b   :  { %v1631_v4 = vpop.f32.mrf.mxu2  ;;  %v1680_v19 = vpop.f32.mrf.mxu3 }
 0x35c   :  { %v1535_v42 = vpop.f32.mrf.mxu0  ;;  %v1584_v57 = vpop.f32.mrf.mxu1  ;;  %v1632_v15 = vadd.f32 %v1631_v4, %v6104_v50  ;;  %v1681_v17 = vadd.f32 %v1680_v19, %v6106_v13  ;;  %v2487_v4 = vadd.f32 %v2466_v31, %v2439_v48 }
 0x35d   :  { %v1536_v20 = vadd.f32 %v1535_v42, %v6096_v27  ;;  %v1585_v35 = vadd.f32 %v1584_v57, %v6098_v55 }
 0x35e   :  { %v2470_v21 = vpop.xlane.xlu0 %2469  ;;  %v1740_v49 = vmax.f32 %v1632_v15, 0.0  ;;  %v1741_v23 = vmax.f32 %v1681_v17, 0.0  ;;  %2504 = vst.msk [vmem:[#allocation3 + $0x50] sm:$0xff] %vm171_vm15, %v2487_v4 }
 0x35f   :  { %v1742_v43 = vmax.f32 %v1536_v20, 0.0  ;;  %v1743_v8 = vmax.f32 %v1585_v35, 0.0  ;;  %v2489_v28 = vadd.f32 %v2470_v21, %v2441_v40  ;;  %v4802_v40 = vmov 1.0|1.0   ;;  %v2521_v20 = vld [vmem:[#allocation3 + $0x40] sm:$0xff] }
 0x360   :  { %4228 = vmatpush.bf16.msk.msrb.mxu0 %vm4227_vm4, %v4802_v40 }
 0x361   :  { %v1779_v32 = vpack.c.bf16 %v1743_v8, %v1739_v38  ;;  %2506 = vst.msk [vmem:[#allocation3 + $0x60] sm:$0xff] %vm171_vm15, %v2489_v28  ;;  %v1778_v62 = vpack.c.bf16 %v1742_v43, %v1738_v0  ;;  %v2553_v0 = vmax.f32 %v2521_v20, 1.0 }
 0x362   :  { %v2468_v17 = vpop.xlane.xlu2 %2467 }
 0x363   :  { %v1633_v60 = vpop.f32.mrf.mxu2  ;;  %v1682_v33 = vpop.f32.mrf.mxu3  ;;  %2083 = vmatmul.bf16.gmra.mxu0 %v1778_v62  ;;  %2132 = vmatmul.bf16.gmra.mxu1 %v1779_v32 }
 0x364   :  { %v1634_v16 = vadd.f32 %v1633_v60, %v6104_v50  ;;  %v1683_v14 = vadd.f32 %v1682_v33, %v6106_v13  ;;  %v1538_v6 = vpop.f32.mrf.mxu0  ;;  %v1587_v47 = vpop.f32.mrf.mxu1  ;;  %2603 = vperm.xlu0 %4391, %v2553_v0   ;;  %4230 = vmatpush.bf16.msk.msrb.mxu0 %vm4229_vm14, %v4802_v40 }
 0x365   :  { %v1539_v21 = vadd.f32 %v1538_v6, %v6096_v27  ;;  %v1588_v38 = vadd.f32 %v1587_v47, %v6098_v55  ;;  %v6219_v60 = vpop.permute.xlu1 %2563  ;;  %v2522_v6 = vld [vmem:[#allocation3 + $0x48] sm:$0xff] }
 0x366   :  { %v1744_v63 = vmax.f32 %v1634_v16, 0.0  ;;  %v1745_v12 = vmax.f32 %v1683_v14, 0.0  ;;  %v2554_v31 = vmax.f32 %v2522_v6, 1.0 }
 0x367   :  { %v1746_v33 = vmax.f32 %v1539_v21, 0.0  ;;  %v1747_v16 = vmax.f32 %v1588_v38, 0.0  ;;  %v2442_v21 = vld [vmem:[#allocation3 + $0x68] sm:$0xff] }
 0x368   :  { %v1780_v19 = vpack.c.bf16 %v1744_v63, %v1740_v49  ;;  %v1781_v42 = vpack.c.bf16 %v1745_v12, %v1741_v23  ;;  %v2525_v57 = vld [vmem:[#allocation3 + $0x60] sm:$0xff]  ;;  %v2440_v12 = vld [vmem:[#allocation3 + $0x58] sm:$0xff] }
 0x369   :  { %v2557_v35 = vmax.f32 %v2525_v57, 1.0 }
 0x36a   :  { %2181 = vmatmul.bf16.gmra.mxu2 %v1780_v19  ;;  %2230 = vmatmul.bf16.gmra.mxu3 %v1781_v42  ;;  %v2472_v38 = vpop.xlane.xlu2 %2471 }
 0x36b   :  { %2623 = vperm.xlu2 %4390, %v2557_v35   ;;  %v1636_v43 = vpop.f32.mrf.mxu2  ;;  %v1685_v8 = vpop.f32.mrf.mxu3 }
 0x36c   :  { %v1540_v28 = vpop.f32.mrf.mxu0  ;;  %v1589_v15 = vpop.f32.mrf.mxu1  ;;  %v1637_v23 = vadd.f32 %v1636_v43, %v6104_v50  ;;  %v1686_v63 = vadd.f32 %v1685_v8, %v6106_v13  ;;  %2608 = vperm.xlu0 %4391, %v2554_v31   ;;  %v2490_v43 = vadd.f32 %v2472_v38, %v2442_v21 }
 0x36d   :  { %v1541_v32 = vadd.f32 %v1540_v28, %v6096_v27  ;;  %v1590_v62 = vadd.f32 %v1589_v15, %v6098_v55  ;;  %v2488_v55 = vadd.f32 %v2468_v17, %v2440_v12  ;;  %v6226_v8 = vpop.permute.xlu1 %2588  ;;  %v1850_v17 = vld [vmem:[#allocation13] sm:$0x1] }
 0x36e   :  { %v1748_v57 = vmax.f32 %v1637_v23, 0.0  ;;  %v1749_v20 = vmax.f32 %v1686_v63, 0.0  ;;  %2507 = vst.msk [vmem:[#allocation3 + $0x68] sm:$0xff] %vm171_vm15, %v2490_v43 }
 0x36f   :  { %v1750_v14 = vmax.f32 %v1541_v32, 0.0  ;;  %v1751_v48 = vmax.f32 %v1590_v62, 0.0  ;;  %2505 = vst.msk [vmem:[#allocation3 + $0x58] sm:$0xff] %vm171_vm15, %v2488_v55  ;;  %v2523_v32 = vld [vmem:[#allocation3 + $0x50] sm:$0xff]  ;;  %v2520_v62 = vld [vmem:[#allocation3 + $0x38] sm:$0xff] }
 0x371   :  { %v1783_v49 = vpack.c.bf16 %v1751_v48, %v1747_v16  ;;  %v1782_v47 = vpack.c.bf16 %v1750_v14, %v1746_v33  ;;  %v1851_v33 = vunpack.c.l.bf16 %v1850_v17  ;;  %v2443_v48 = vld [vmem:[#allocation3 + $0x70] sm:$0xff] }
 0x373   :  { %v1638_v4 = vpop.f32.mrf.mxu2  ;;  %v1687_v27 = vpop.f32.mrf.mxu3  ;;  %2088 = vmatmul.bf16.gmra.mxu0 %v1782_v47  ;;  %2137 = vmatmul.bf16.gmra.mxu1 %v1783_v49  ;;  %v6232_v23 = vperm.slane %v1851_v33, 0 }
 0x374   :  { %v1639_v19 = vadd.f32 %v1638_v4, %v6104_v50  ;;  %v1688_v42 = vadd.f32 %v1687_v27, %v6106_v13  ;;  %v2555_v50 = vmax.f32 %v2523_v32, 1.0  ;;  %v2552_v13 = vmax.f32 %v2520_v62, 1.0 }
 0x375   :  { %v2526_v49 = vld [vmem:[#allocation3 + $0x68] sm:$0xff] }
 0x376   :  { %v1752_v35 = vmax.f32 %v1639_v19, 0.0  ;;  %v1753_v0 = vmax.f32 %v1688_v42, 0.0  ;;  %2598 = vperm.xlu1 %4392, %v2552_v13   ;;  %2613 = vperm.xlu0 %4391, %v2555_v50   ;;  %v2524_v47 = vld [vmem:[#allocation3 + $0x58] sm:$0xff]  ;;  %v2558_v63 = vmax.f32 %v2526_v49, 1.0 }
 0x377   :  { %v2556_v12 = vmax.f32 %v2524_v47, 1.0 }
 0x378   :  { %v1784_v28 = vpack.c.bf16 %v1752_v35, %v1748_v57  ;;  %v1785_v15 = vpack.c.bf16 %v1753_v0, %v1749_v20  ;;  %v2474_v6 = vpop.xlane.xlu1 %2473 }
 0x379   :  { %v2491_v31 = vadd.f32 %v2474_v6, %v2443_v48  ;;  %v2444_v48 = vld [vmem:[#allocation3 + $0x78] sm:$0xff] }
 0x37a   :  { %2186 = vmatmul.bf16.gmra.mxu2 %v1784_v28  ;;  %2235 = vmatmul.bf16.gmra.mxu3 %v1785_v15  ;;  %v6240_v15 = vpop.permute.xlu2 %2593 }
 0x37b   :  { %2508 = vst.msk [vmem:[#allocation3 + $0x70] sm:$0xff] %vm171_vm15, %v2491_v31 }
 0x37e   :  { %2628 = vperm.xlu0 %4391, %v2558_v63   ;;  %2618 = vperm.xlu1 %4392, %v2556_v12  }
 0x380   :  { %v2054_v16 = vpop.f32.mrf.mxu0  ;;  %v2103_v14 = vpop.f32.mrf.mxu1 }
 0x381   :  { %v2055_v4 = vadd.f32 %v2054_v16, %v6232_v23 }
 0x382   :  { %v2527_v42 = vld [vmem:[#allocation3 + $0x70] sm:$0xff] }
 0x383   :  { %4208 = vmatmul.msk.bf16.vlgmr.msra.gmra.mxu0 %vm5540_vm3, %v4802_v40  ;;  %v2104_v19 = vadd.f32 %v2103_v14, %v2055_v4  ;;  %v2559_v35 = vmax.f32 %v2527_v42, 1.0  ;;  %vm7280_vm3 = vcmp.eq.s32.totalorder %v5641_v10, %v5506_v41 }
 0x386   :  { %2633 = vperm.xlu0 %4391, %v2559_v35  }
 0x388   :  { %v2056_v27 = vpop.f32.mrf.mxu0  ;;  %v2105_v55 = vpop.f32.mrf.mxu1 }
 0x389   :  { %v2057_v0 = vadd.f32 %v2056_v27, %v6232_v23 }
 0x38b   :  { %v2106_v28 = vadd.f32 %v2105_v55, %v2057_v0 }
 0x38d   :  { %v2152_v57 = vpop.f32.mrf.mxu2  ;;  %v2201_v20 = vpop.f32.mrf.mxu3 }
 0x38e   :  { %v2153_v45 = vadd.f32 %v2152_v57, %v2104_v19 }
 0x390   :  { %v2202_v21 = vadd.f32 %v2201_v20, %v2153_v45  ;;  %v2059_v38 = vpop.f32.mrf.mxu0  ;;  %v2108_v43 = vpop.f32.mrf.mxu1 }
 0x391   :  { %v2060_v13 = vadd.f32 %v2059_v38, %v6232_v23  ;;  %v3421_v38 = vmax.f32 %v6193_v46, 1e-24 }
 0x392   :  { %2241 = vst [vmem:[#allocation16] sm:$0xff] %v2202_v21 }
 0x393   :  { %4210 = vmatmul.msk.bf16.gmra.mxu0 %vm5603_vm6, %v4802_v40  ;;  %v2109_v14 = vadd.f32 %v2108_v43, %v2060_v13  ;;  %vm4211_vm6 = vmpackc.low %vm7280_vm3, %vm2280_vm7  ;;  %4427 = vrsqrt.f32 %v3421_v38  ;;  %vm3428_vm7 = vweird.f32 %v3421_v38 }
 0x394   :  { %4429 = vrcp.f32 %v6219_v60 }
 0x395   :  { %v2154_v32 = vpop.f32.mrf.mxu2  ;;  %v2203_v62 = vpop.f32.mrf.mxu3  ;;  %4431 = vrcp.f32 %v6195_v11 }
 0x396   :  { %v2155_v50 = vadd.f32 %v2154_v32, %v2106_v28  ;;  %4433 = vrcp.f32 %v6180_v37 }
 0x397   :  { %4435 = vrcp.f32 %v6209_v18 }
 0x398   :  { %v2204_v17 = vadd.f32 %v2203_v62, %v2155_v50  ;;  %v2061_v33 = vpop.f32.mrf.mxu0  ;;  %v2110_v16 = vpop.f32.mrf.mxu1  ;;  %4437 = vrcp.f32 %v6188_v24 }
 0x399   :  { %v2062_v63 = vadd.f32 %v2061_v33, %v6232_v23  ;;  %v4428_v33 = vpop.eup %4427  ;;  %4439 = vrcp.f32 %v6226_v8 }
 0x39a   :  { %2242 = vst [vmem:[#allocation16 + $0x8] sm:$0xff] %v2204_v17  ;;  %4441 = vrcp.f32 %v6240_v15 }
 0x39b   :  { %v2111_v55 = vadd.f32 %v2110_v16, %v2062_v63 }
 0x39d   :  { %v2157_v6 = vpop.f32.mrf.mxu2  ;;  %v2206_v49 = vpop.f32.mrf.mxu3 }
 0x39e   :  { %v2158_v47 = vadd.f32 %v2157_v6, %v2109_v14  ;;  %v2476_v31 = vpop.xlane.xlu2 %2475  ;;  %v3423_v6 = vmul.f32 %v4428_v33, %v3421_v38 }
 0x39f   :  { %v2492_v39 = vadd.f32 %v2476_v31, %v2444_v48 }
 0x3a0   :  { %v2207_v12 = vadd.f32 %v2206_v49, %v2158_v47  ;;  %v2064_v4 = vpop.f32.mrf.mxu0  ;;  %v2113_v27 = vpop.f32.mrf.mxu1  ;;  %v3424_v63 = vmul.f32 %v4428_v33, %v3423_v6 }
 0x3a1   :  { %2509 = vst.msk [vmem:[#allocation3 + $0x78] sm:$0xff] %vm171_vm15, %v2492_v39  ;;  %v2065_v57 = vadd.f32 %v2064_v4, %v6232_v23  ;;  %vm3429_vm15 = vweird.f32 %v4428_v33 }
 0x3a2   :  { %2243 = vst [vmem:[#allocation16 + $0x10] sm:$0xff] %v2207_v12 }
 0x3a3   :  { %4212 = vmatmul.msk.bf16.gmra.mxu0 %vm4211_vm6, %v4802_v40  ;;  %v2114_v43 = vadd.f32 %v2113_v27, %v2065_v57  ;;  %vm2676_vm6 = vweird.f32 %v6180_v37 }
 0x3a5   :  { %v2159_v41 = vpop.f32.mrf.mxu2  ;;  %v2208_v19 = vpop.f32.mrf.mxu3 }
 0x3a6   :  { %v2160_v42 = vadd.f32 %v2159_v41, %v2111_v55  ;;  %v3425_v41 = vmul.f32 0.5, %v3424_v63 }
 0x3a8   :  { %v2209_v20 = vadd.f32 %v2208_v19, %v2160_v42  ;;  %v2066_v35 = vpop.f32.mrf.mxu0  ;;  %v2115_v45 = vpop.f32.mrf.mxu1  ;;  %v2528_v0 = vld [vmem:[#allocation3 + $0x78] sm:$0xff] }
 0x3a9   :  { %v2560_v21 = vmax.f32 %v2528_v0, 1.0  ;;  %v2067_v62 = vadd.f32 %v2066_v35, %v6232_v23 }
 0x3aa   :  { %2244 = vst [vmem:[#allocation16 + $0x18] sm:$0xff] %v2209_v20  ;;  %v3426_v20 = vsub.f32 1.5, %v3425_v41 }
 0x3ab   :  { %2638 = vperm.xlu0 %4391, %v2560_v21   ;;  %v2116_v16 = vadd.f32 %v2115_v45, %v2067_v62 }
 0x3ac   :  { %v3427_v21 = vmul.f32 %v4428_v33, %v3426_v20 }
 0x3ad   :  { %v2162_v29 = vpop.f32.mrf.mxu2  ;;  %v2211_v28 = vpop.f32.mrf.mxu3 }
 0x3ae   :  { %v2163_v32 = vadd.f32 %v2162_v29, %v2114_v43 }
 0x3b0   :  { %v2212_v50 = vadd.f32 %v2211_v28, %v2163_v32  ;;  %v2069_v13 = vpop.f32.mrf.mxu0  ;;  %v2118_v17 = vpop.f32.mrf.mxu1 }
 0x3b1   :  { %v2070_v49 = vadd.f32 %v2069_v13, %v6232_v23 }
 0x3b2   :  { %2245 = vst [vmem:[#allocation16 + $0x20] sm:$0xff] %v2212_v50 }
 0x3b3   :  { %4214 = vmatmul.msk.bf16.gmra.mxu0 %vm5773_vm2, %v4802_v40  ;;  %v2119_v12 = vadd.f32 %v2118_v17, %v2070_v49  ;;  %vm3430_vm2 = vmor %vm3428_vm7, %vm3429_vm15  ;;  %vm2691_vm15 = vweird.f32 %v6209_v18 }
 0x3b4   :  { %v3431_v50 = vsel %vm3430_vm2, %v4428_v33, %v3427_v21 }
 0x3b5   :  { %v2164_v46 = vpop.f32.mrf.mxu2  ;;  %v2213_v14 = vpop.f32.mrf.mxu3  ;;  %v3432_v38 = vmul.f32 %v4560_v56, %v3431_v50 }
 0x3b6   :  { %v2165_v48 = vadd.f32 %v2164_v46, %v2116_v16 }
 0x3b8   :  { %v2214_v47 = vadd.f32 %v2213_v14, %v2165_v48  ;;  %v2071_v31 = vpop.f32.mrf.mxu0  ;;  %v2120_v39 = vpop.f32.mrf.mxu1  ;;  %v3441_v14 = vpack.c.bf16 %v3432_v38, %v3432_v38 }
 0x3b9   :  { %v2072_v57 = vadd.f32 %v2071_v31, %v6232_v23 }
 0x3ba   :  { %2246 = vst [vmem:[#allocation16 + $0x28] sm:$0xff] %v2214_v47  ;;  %v3467_v47 = vsel %vm154_vm0, %v3441_v14, 0  ;;  %v4430_v14 = vpop.eup %4429 }
 0x3bb   :  { %v2121_v35 = vadd.f32 %v2120_v39, %v2072_v57  ;;  %3476 = vmatpush.bf16.xpose.msra.mxu3 %v3467_v47 }
 0x3bd   :  { %v2167_v4 = vpop.f32.mrf.mxu2  ;;  %v2216_v27 = vpop.f32.mrf.mxu3 }
 0x3be   :  { %v2168_v55 = vadd.f32 %v2167_v4, %v2119_v12 }
 0x3c0   :  { %v2217_v3 = vadd.f32 %v2216_v27, %v2168_v55  ;;  %v2074_v19 = vpop.f32.mrf.mxu0  ;;  %v2123_v42 = vpop.f32.mrf.mxu1 }
 0x3c1   :  { %v2075_v29 = vadd.f32 %v2074_v19, %v6232_v23 }
 0x3c2   :  { %2247 = vst [vmem:[#allocation16 + $0x30] sm:$0xff] %v2217_v3 }
 0x3c3   :  { %4216 = vmatmul.msk.bf16.gmra.mxu0 %vm5850_vm13, %v4802_v40  ;;  %v2124_v13 = vadd.f32 %v2123_v42, %v2075_v29  ;;  %vm2915_vm13 = vcmask 261120  }
 0x3c5   :  { %v2169_v45 = vpop.f32.mrf.mxu2  ;;  %v2218_v0 = vpop.f32.mrf.mxu3 }
 0x3c6   :  { %v2170_v43 = vadd.f32 %v2169_v45, %v2121_v35 }
 0x3c8   :  { %v2076_v28 = vpop.f32.mrf.mxu0  ;;  %v2125_v32 = vpop.f32.mrf.mxu1  ;;  %v2219_v62 = vadd.f32 %v2218_v0, %v2170_v43 }
 0x3c9   :  { %v2077_v48 = vadd.f32 %v2076_v28, %v6232_v23 }
 0x3ca   :  { %2248 = vst [vmem:[#allocation16 + $0x38] sm:$0xff] %v2219_v62 }
 0x3cb   :  { %v2126_v33 = vadd.f32 %v2125_v32, %v2077_v48 }
 0x3cd   :  { %v2172_v17 = vpop.f32.mrf.mxu2  ;;  %v2221_v46 = vpop.f32.mrf.mxu3 }
 0x3ce   :  { %v2173_v16 = vadd.f32 %v2172_v17, %v2124_v13 }
 0x3d0   :  { %v2222_v6 = vadd.f32 %v2221_v46, %v2173_v16  ;;  %v2079_v49 = vpop.f32.mrf.mxu0  ;;  %v2128_v31 = vpop.f32.mrf.mxu1 }
 0x3d1   :  { %v2080_v4 = vadd.f32 %v2079_v49, %v6232_v23 }
 0x3d2   :  { %2249 = vst [vmem:[#allocation16 + $0x40] sm:$0xff] %v2222_v6 }
 0x3d3   :  { %4218 = vmatmul.msk.bf16.gmra.mxu0 %vm6042_vm10, %v4802_v40  ;;  %v2129_v3 = vadd.f32 %v2128_v31, %v2080_v4  ;;  %v2642_v31 = vmul.f32 %v4430_v14, %v6219_v60  ;;  %vm2646_vm10 = vweird.f32 %v6219_v60 }
 0x3d5   :  { %v2174_v39 = vpop.f32.mrf.mxu2  ;;  %v2223_v12 = vpop.f32.mrf.mxu3  ;;  %v2643_v4 = vsub.f32 1.0, %v2642_v31  ;;  %v2667_v31 = vand.u32 2147483648, %v6195_v11 }
 0x3d6   :  { %v2175_v63 = vadd.f32 %v2174_v39, %v2126_v33 }
 0x3d8   :  { %v2224_v27 = vadd.f32 %v2223_v12, %v2175_v63  ;;  %v2081_v55 = vpop.f32.mrf.mxu0  ;;  %v2130_v41 = vpop.f32.mrf.mxu1 }
 0x3d9   :  { %v2082_v20 = vadd.f32 %v2081_v55, %v6232_v23 }
 0x3da   :  { %2250 = vst [vmem:[#allocation16 + $0x48] sm:$0xff] %v2224_v27  ;;  %v6291_v27 = vpop.eup %4431 }
 0x3db   :  { %v2131_v44 = vadd.f32 %v2130_v41, %v2082_v20  ;;  %vm2662_vm4 = vweird.f32 %v6291_v27 }
 0x3dc   :  { %vm6325_vm3 = vmor %vm2661_vm11, %vm2662_vm4  ;;  %vm2721_vm4 = vweird.f32 %v6226_v8 }
 0x3dd   :  { %v2177_v19 = vpop.f32.mrf.mxu2  ;;  %v2226_v57 = vpop.f32.mrf.mxu3 }
 0x3de   :  { %v2178_v42 = vadd.f32 %v2177_v19, %v2129_v3  ;;  %v2324_v19 = vld [vmem:[#allocation2] sm:$0xff] }
 0x3e0   :  { %v2227_v35 = vadd.f32 %v2226_v57, %v2178_v42  ;;  %v2084_v45 = vpop.f32.mrf.mxu0  ;;  %v2133_v0 = vpop.f32.mrf.mxu1  ;;  %v2657_v42 = vmul.f32 %v6291_v27, %v6195_v11  ;;  %v2644_v57 = vmul.f32 %v4430_v14, %v2643_v4 }
 0x3e1   :  { %v2085_v28 = vadd.f32 %v2084_v45, %v6232_v23 }
 0x3e2   :  { %2251 = vst [vmem:[#allocation16 + $0x50] sm:$0xff] %v2227_v35 }
 0x3e3   :  { %4220 = vmatmul.msk.bf16.gmra.mxu0 %vm6063_vm12, %v4802_v40  ;;  %v2134_v50 = vadd.f32 %v2133_v0, %v2085_v28  ;;  %vm2647_vm12 = vweird.f32 %v4430_v14  ;;  %v2645_v28 = vadd.f32 %v4430_v14, %v2644_v57 }
 0x3e5   :  { %v2179_v21 = vpop.f32.mrf.mxu2  ;;  %v2228_v29 = vpop.f32.mrf.mxu3 }
 0x3e6   :  { %v2180_v43 = vadd.f32 %v2179_v21, %v2131_v44  ;;  %v6301_v21 = vpop.eup %4433 }
 0x3e7   :  { %v6322_v4 = vpop.eup %4435  ;;  %vm2677_vm8 = vweird.f32 %v6301_v21 }
 0x3e8   :  { %v2229_v32 = vadd.f32 %v2228_v29, %v2180_v43  ;;  %v2086_v62 = vpop.f32.mrf.mxu0  ;;  %v2135_v17 = vpop.f32.mrf.mxu1  ;;  %v2652_v43 = vand.u32 2147483648, %v6219_v60  ;;  %v2658_v29 = vsub.f32 1.0, %v2657_v42  ;;  %vm6346_vm14 = vmor %vm2676_vm6, %vm2677_vm8  ;;  %vm2692_vm2 = vweird.f32 %v6322_v4 }
 0x3e9   :  { %v2087_v9 = vadd.f32 %v2086_v62, %v6232_v23 }
 0x3ea   :  { %2252 = vst [vmem:[#allocation16 + $0x58] sm:$0xff] %v2229_v32  ;;  %v2650_v32 = vand.u32 2147483647, %v6219_v60  ;;  %v2659_v60 = vmul.f32 %v6291_v27, %v2658_v29 }
 0x3eb   :  { %v2136_v48 = vadd.f32 %v2135_v17, %v2087_v9  ;;  %v2325_v9 = vld [vmem:[#allocation2 + $0x8] sm:$0xff] }
 0x3ec   :  { %vm2651_vm1 = vcmp.eq.f32.partialorder %v2650_v32, 8.507059e+37 }
 0x3ed   :  { %v2182_v13 = vpop.f32.mrf.mxu2  ;;  %v2231_v38 = vpop.f32.mrf.mxu3 }
 0x3ee   :  { %v2183_v56 = vadd.f32 %v2182_v13, %v2134_v50  ;;  %v2672_v13 = vmul.f32 %v6301_v21, %v6180_v37 }
 0x3f0   :  { %v2232_v16 = vadd.f32 %v2231_v38, %v2183_v56  ;;  %v2089_v46 = vpop.f32.mrf.mxu0  ;;  %v2138_v12 = vpop.f32.mrf.mxu1  ;;  %v2653_v38 = vor.u32 1.1754944e-38, %v2652_v43 }
 0x3f1   :  { %v2090_v33 = vadd.f32 %v2089_v46, %v6232_v23 }
 0x3f2   :  { %2253 = vst [vmem:[#allocation16 + $0x60] sm:$0xff] %v2232_v16 }
 0x3f3   :  { %4222 = vmatmul.msk.bf16.gmra.mxu0 %vm6143_vm9, %v4802_v40  ;;  %v2139_v5 = vadd.f32 %v2138_v12, %v2090_v33  ;;  %v2903_v40 = vld [vmem:[%s7245_s10] sm:$0x3]  ;;  %vm6306_vm9 = vmor %vm2646_vm10, %vm2647_vm12  ;;  %v2665_v12 = vand.u32 2147483647, %v6195_v11  ;;  %v2668_v11 = vor.u32 1.1754944e-38, %v2667_v31  ;;  %vm2706_vm10 = vweird.f32 %v6188_v24 }
 0x3f4   :  { %v2904_v20 = vpack.c.bf16 %v2903_v40, %v2903_v40  ;;  %v2649_v16 = vsel %vm6306_vm9, %v4430_v14, %v2645_v28 }
 0x3f5   :  { %v2184_v6 = vpop.f32.mrf.mxu2  ;;  %v2233_v47 = vpop.f32.mrf.mxu3  ;;  %v2654_v33 = vsel %vm2651_vm1, %v2653_v38, %v2649_v16  ;;  %vm2666_vm5 = vcmp.eq.f32.partialorder %v2665_v12, 8.507059e+37  ;;  %v2695_v16 = vand.u32 2147483647, %v6209_v18 }
 0x3f6   :  { %v2185_v49 = vadd.f32 %v2184_v6, %v2136_v48 }
 0x3f7   :  { %vm2696_vm9 = vcmp.eq.f32.partialorder %v2695_v16, 8.507059e+37  ;;  %v2742_v16 = vand.u32 2147483648, %v6240_v15 }
 0x3f8   :  { %v2234_v39 = vadd.f32 %v2233_v47, %v2185_v49  ;;  %v2091_v63 = vpop.f32.mrf.mxu0  ;;  %v2140_v62 = vpop.f32.mrf.mxu1  ;;  %v2673_v49 = vsub.f32 1.0, %v2672_v13 }
 0x3f9   :  { %v2092_v35 = vadd.f32 %v2091_v63, %v6232_v23  ;;  %v2660_v63 = vadd.f32 %v6291_v27, %v2659_v60  ;;  %v2327_v23 = vld [vmem:[#allocation2 + $0x18] sm:$0xff] }
 0x3fa   :  { %2254 = vst [vmem:[#allocation16 + $0x68] sm:$0xff] %v2234_v39  ;;  %v2674_v40 = vmul.f32 %v6301_v21, %v2673_v49 }
 0x3fb   :  { %v2141_v50 = vadd.f32 %v2140_v62, %v2092_v35 }
 0x3fc   :  { %v2675_v57 = vadd.f32 %v6301_v21, %v2674_v40 }
 0x3fd   :  { %v2187_v55 = vpop.f32.mrf.mxu2  ;;  %v2236_v3 = vpop.f32.mrf.mxu3 }
 0x3fe   :  { %v2188_v41 = vadd.f32 %v2187_v55, %v2139_v5  ;;  %v2326_v55 = vld [vmem:[#allocation2 + $0x10] sm:$0xff]  ;;  %v2679_v32 = vsel %vm6346_vm14, %v6301_v21, %v2675_v57 }
 0x400   :  { %v2237_v45 = vadd.f32 %v2236_v3, %v2188_v41  ;;  %v2357_v44 = vpop.f32.mrf.mxu0  ;;  %v2664_v41 = vsel %vm6325_vm3, %v6291_v27, %v2660_v63  ;;  %v2687_v3 = vmul.f32 %v6322_v4, %v6209_v18 }
 0x401   :  { %v2397_v0 = vadd.f32 %v2357_v44, %v2324_v19  ;;  %v2682_v19 = vand.u32 2147483648, %v6180_v37 }
 0x402   :  { %2255 = vst [vmem:[#allocation16 + $0x70] sm:$0xff] %v2237_v45  ;;  %v6344_v45 = vpop.eup %4437  ;;  %v2688_v43 = vsub.f32 1.0, %v2687_v3 }
 0x403   :  { %2413 = vst.msk [vmem:[#allocation2] sm:$0xff] %vm154_vm0, %v2397_v0  ;;  %4231 = vmatmul.msk.bf16.vlgmr.msrb.gmra.mxu0 %vm2915_vm13, %v2904_v20  ;;  %v2680_v20 = vand.u32 2147483647, %v6180_v37  ;;  %v2669_v0 = vsel %vm2666_vm5, %v2668_v11, %v2664_v41  ;;  %v2683_v28 = vor.u32 1.1754944e-38, %v2682_v19  ;;  %v2702_v37 = vmul.f32 %v6344_v45, %v6188_v24  ;;  %vm6371_vm13 = vmor %vm2691_vm15, %vm2692_vm2 }
 0x404   :  { %vm2707_vm12 = vweird.f32 %v6344_v45  ;;  %vm2736_vm5 = vweird.f32 %v6240_v15 }
 0x405   :  { %v2189_v56 = vpop.f32.mrf.mxu2  ;;  %v2238_v46 = vpop.f32.mrf.mxu3  ;;  %vm2681_vm7 = vcmp.eq.f32.partialorder %v2680_v20, 8.507059e+37  ;;  %v2703_v21 = vsub.f32 1.0, %v2702_v37  ;;  %vm6391_vm1 = vmor %vm2706_vm10, %vm2707_vm12  ;;  %v2329_v20 = vld [vmem:[#allocation2 + $0x28] sm:$0xff]  ;;  %v2725_v37 = vand.u32 2147483647, %v6226_v8 }
 0x406   :  { %v2190_v17 = vadd.f32 %v2189_v56, %v2141_v50  ;;  %v2689_v50 = vmul.f32 %v6322_v4, %v2688_v43  ;;  %v2684_v56 = vsel %vm2681_vm7, %v2683_v28, %v2679_v32 }
 0x407   :  { %v2704_v49 = vmul.f32 %v6344_v45, %v2703_v21  ;;  %v2330_v21 = vld [vmem:[#allocation2 + $0x30] sm:$0xff]  ;;  %vm2726_vm8 = vcmp.eq.f32.partialorder %v2725_v37, 8.507059e+37 }
 0x408   :  { %v2239_v48 = vadd.f32 %v2238_v46, %v2190_v17  ;;  %v2359_v6 = vpop.f32.mrf.mxu0  ;;  %v2697_v17 = vand.u32 2147483648, %v6209_v18  ;;  %v2690_v60 = vadd.f32 %v6322_v4, %v2689_v50  ;;  %v2328_v18 = vld [vmem:[#allocation2 + $0x20] sm:$0xff] }
 0x409   :  { %v2398_v47 = vadd.f32 %v2359_v6, %v2325_v9  ;;  %v2705_v12 = vadd.f32 %v6344_v45, %v2704_v49 }
 0x40a   :  { %2256 = vst [vmem:[#allocation16 + $0x78] sm:$0xff] %v2239_v48  ;;  %v2529_v39 = vld [vmem:[#allocation2] sm:$0xff]  ;;  %v6369_v48 = vpop.eup %4439  ;;  %v2694_v31 = vsel %vm6371_vm13, %v6322_v4, %v2690_v60 }
 0x40b   :  { %2414 = vst.msk [vmem:[#allocation2 + $0x8] sm:$0xff] %vm154_vm0, %v2398_v47  ;;  %v2655_v14 = vmul.f32 %v2654_v33, %v2529_v39  ;;  %v2698_v47 = vor.u32 1.1754944e-38, %v2697_v17  ;;  %v2717_v33 = vmul.f32 %v6369_v48, %v6226_v8  ;;  %v2712_v39 = vand.u32 2147483648, %v6188_v24  ;;  %v6396_v3 = vpop.eup %4441  ;;  %3723 = dma.vmem_to_hbm [thread:$0]  %s3716_s7, 2048, %s3718_s4, [#allocation6], %s4793_s25, %s4793_s25, %s4794_s26  }
 0x40c   :  { %v2732_v44 = vmul.f32 %v6396_v3, %v6240_v15  ;;  %vm2722_vm3 = vweird.f32 %v6369_v48  ;;  %vm2737_vm14 = vweird.f32 %v6396_v3 }
 0x40d   :  { %2881 = vst.msk [vmem:[%s7250_s15] sm:$0xff] %vm154_vm0, %v2655_v14  ;;  %v2718_v41 = vsub.f32 1.0, %v2717_v33  ;;  %v2713_v19 = vor.u32 1.1754944e-38, %v2712_v39  ;;  %vm6422_vm6 = vmor %vm2721_vm4, %vm2722_vm3 }
 0x40e   :  { %vm6447_vm7 = vmor %vm2736_vm5, %vm2737_vm14 }
 0x410   :  { %v2362_v42 = vpop.f32.mrf.mxu0 }
 0x411   :  { %v2399_v35 = vadd.f32 %v2362_v42, %v2326_v55  ;;  %v2699_v55 = vsel %vm2696_vm9, %v2698_v47, %v2694_v31  ;;  %v2709_v42 = vsel %vm6391_vm1, %v6344_v45, %v2705_v12  ;;  %v2743_v12 = vor.u32 1.1754944e-38, %v2742_v16 }
 0x412   :  { %v2530_v27 = vld [vmem:[#allocation2 + $0x8] sm:$0xff] }
 0x413   :  { %2415 = vst.msk [vmem:[#allocation2 + $0x10] sm:$0xff] %vm154_vm0, %v2399_v35  ;;  %v2670_v29 = vmul.f32 %v2669_v0, %v2530_v27  ;;  %v2719_v35 = vmul.f32 %v6369_v48, %v2718_v41  ;;  %v6414_v27 = vpop.permute.xlu0 %2603 }
 0x414   :  { %vm2766_vm9 = vweird.f32 %v6414_v27 }
 0x415   :  { %2882 = vst.msk [vmem:[%s7250_s15 + $0x8] sm:$0xff] %vm154_vm0, %v2670_v29  ;;  %v3433_v62 = vpack.c.bf16 %v2670_v29, %v2655_v14  ;;  %v2710_v14 = vand.u32 2147483647, %v6188_v24  ;;  %v6401_v24 = vpop.permute.xlu1 %2598  ;;  %v2727_v29 = vand.u32 2147483648, %v6226_v8  ;;  %v2720_v32 = vadd.f32 %v6369_v48, %v2719_v35 }
 0x416   :  { %4443 = vrcp.f32 %v6401_v24  ;;  %vm2751_vm2 = vweird.f32 %v6401_v24  ;;  %v2757_v41 = vand.u32 2147483648, %v6401_v24 }
 0x417   :  { %4241 = vmatmul.msk.bf16.vlgmr.msra.gmra.mxu3 %vm154_vm0, %v3433_v62  ;;  %vm2711_vm11 = vcmp.eq.f32.partialorder %v2710_v14, 8.507059e+37  ;;  %v2733_v62 = vsub.f32 1.0, %v2732_v44  ;;  %4445 = vrcp.f32 %v6414_v27  ;;  %v2724_v8 = vsel %vm6422_vm6, %v6369_v48, %v2720_v32 }
 0x418   :  { %v2364_v13 = vpop.f32.mrf.mxu0  ;;  %v2714_v0 = vsel %vm2711_vm11, %v2713_v19, %v2709_v42  ;;  %v2740_v48 = vand.u32 2147483647, %v6240_v15  ;;  %v2331_v15 = vld [vmem:[#allocation2 + $0x38] sm:$0xff] }
 0x419   :  { %v2400_v38 = vadd.f32 %v2364_v13, %v2327_v23 }
 0x41a   :  { %v2531_v9 = vld [vmem:[#allocation2 + $0x10] sm:$0xff]  ;;  %vm2741_vm15 = vcmp.eq.f32.partialorder %v2740_v48, 8.507059e+37 }
 0x41b   :  { %2416 = vst.msk [vmem:[#allocation2 + $0x18] sm:$0xff] %vm154_vm0, %v2400_v38  ;;  %v2685_v46 = vmul.f32 %v2684_v56, %v2531_v9  ;;  %v2728_v56 = vor.u32 1.1754944e-38, %v2727_v29  ;;  %v2734_v38 = vmul.f32 %v6396_v3, %v2733_v62  ;;  %v6442_v47 = vpop.permute.xlu0 %2608  ;;  %v2772_v62 = vand.u32 2147483648, %v6414_v27 }
 0x41c   :  { %v6420_v50 = vpop.eup %4443  ;;  %4447 = vrcp.f32 %v6442_v47  ;;  %vm2781_vm3 = vweird.f32 %v6442_v47 }
 0x41d   :  { %2883 = vst.msk [vmem:[%s7250_s15 + $0x10] sm:$0xff] %vm154_vm0, %v2685_v46  ;;  %v2747_v17 = vmul.f32 %v6420_v50, %v6401_v24  ;;  %v2729_v6 = vsel %vm2726_vm8, %v2728_v56, %v2724_v8  ;;  %v2735_v49 = vadd.f32 %v6396_v3, %v2734_v38  ;;  %v6445_v33 = vpop.eup %4445  ;;  %vm2752_vm13 = vweird.f32 %v6420_v50  ;;  %v6493_v38 = vpop.permute.xlu1 %2618 }
 0x41e   :  { %vm6471_vm10 = vmor %vm2751_vm2, %vm2752_vm13  ;;  %vm2767_vm1 = vweird.f32 %v6445_v33  ;;  %v2773_v16 = vor.u32 1.1754944e-38, %v2772_v62  ;;  %vm2811_vm13 = vweird.f32 %v6493_v38 }
 0x41f   :  { %v2739_v14 = vsel %vm6447_vm7, %v6396_v3, %v2735_v49  ;;  %vm6498_vm11 = vmor %vm2766_vm9, %vm2767_vm1 }
 0x420   :  { %v2367_v63 = vpop.f32.mrf.mxu0  ;;  %v2744_v19 = vsel %vm2741_vm15, %v2743_v12, %v2739_v14  ;;  %v6517_v12 = vpop.permute.xlu2 %2623 }
 0x421   :  { %v2401_v5 = vadd.f32 %v2367_v63, %v2328_v18  ;;  %v2748_v18 = vsub.f32 1.0, %v2747_v17 }
 0x422   :  { %v2532_v11 = vld [vmem:[#allocation2 + $0x18] sm:$0xff]  ;;  %v6469_v35 = vpop.eup %4447 }
 0x423   :  { %2417 = vst.msk [vmem:[#allocation2 + $0x20] sm:$0xff] %vm154_vm0, %v2401_v5  ;;  %v2700_v4 = vmul.f32 %v2699_v55, %v2532_v11  ;;  %v2762_v5 = vmul.f32 %v6445_v33, %v6414_v27  ;;  %v2749_v40 = vmul.f32 %v6420_v50, %v2748_v18  ;;  %v2777_v29 = vmul.f32 %v6469_v35, %v6442_v47 }
 0x424   :  { %vm2782_vm6 = vweird.f32 %v6469_v35 }
 0x425   :  { %2884 = vst.msk [vmem:[%s7250_s15 + $0x18] sm:$0xff] %vm154_vm0, %v2700_v4  ;;  %v3434_v57 = vpack.c.bf16 %v2700_v4, %v2685_v46  ;;  %v2763_v42 = vsub.f32 1.0, %v2762_v5  ;;  %v2750_v3 = vadd.f32 %v6420_v50, %v2749_v40  ;;  %v2778_v8 = vsub.f32 1.0, %v2777_v29  ;;  %vm6524_vm8 = vmor %vm2781_vm3, %vm2782_vm6 }
 0x427   :  { %4242 = vmatmul.msk.bf16.gmra.mxu3 %vm154_vm0, %v3434_v57  ;;  %v2755_v57 = vand.u32 2147483647, %v6401_v24  ;;  %v2332_v24 = vld [vmem:[#allocation2 + $0x40] sm:$0xff] }
 0x428   :  { %v2369_v45 = vpop.f32.mrf.mxu0 }
 0x429   :  { %v2402_v43 = vadd.f32 %v2369_v45, %v2329_v20  ;;  %v6475_v45 = vpop.permute.xlu0 %2613  ;;  %vm2756_vm12 = vcmp.eq.f32.partialorder %v2755_v57, 8.507059e+37 }
 0x42a   :  { %v2533_v28 = vld [vmem:[#allocation2 + $0x20] sm:$0xff]  ;;  %4449 = vrcp.f32 %v6475_v45  ;;  %vm2796_vm14 = vweird.f32 %v6475_v45 }
 0x42b   :  { %2418 = vst.msk [vmem:[#allocation2 + $0x28] sm:$0xff] %vm154_vm0, %v2402_v43  ;;  %v2715_v23 = vmul.f32 %v2714_v0, %v2533_v28  ;;  %v2758_v0 = vor.u32 1.1754944e-38, %v2757_v41  ;;  %v2764_v43 = vmul.f32 %v6445_v33, %v2763_v42  ;;  %v2754_v28 = vsel %vm6471_vm10, %v6420_v50, %v2750_v3  ;;  %v2334_v41 = vld [vmem:[#allocation2 + $0x50] sm:$0xff] }
 0x42c   :  { %4451 = vrcp.f32 %v6493_v38 }
 0x42d   :  { %2885 = vst.msk [vmem:[%s7250_s15 + $0x20] sm:$0xff] %vm154_vm0, %v2715_v23  ;;  %v2759_v13 = vsel %vm2756_vm12, %v2758_v0, %v2754_v28  ;;  %v2765_v56 = vadd.f32 %v6445_v33, %v2764_v43  ;;  %4453 = vrcp.f32 %v6517_v12 }
 0x430   :  { %v2372_v9 = vpop.f32.mrf.mxu0  ;;  %v6496_v17 = vpop.eup %4449 }
 0x431   :  { %v2403_v60 = vadd.f32 %v2372_v9, %v2330_v21  ;;  %v2770_v21 = vand.u32 2147483647, %v6414_v27  ;;  %v2333_v27 = vld [vmem:[#allocation2 + $0x48] sm:$0xff]  ;;  %v2792_v49 = vmul.f32 %v6496_v17, %v6475_v45  ;;  %vm2797_vm7 = vweird.f32 %v6496_v17 }
 0x432   :  { %v2534_v46 = vld [vmem:[#allocation2 + $0x28] sm:$0xff]  ;;  %v6522_v40 = vpop.eup %4451  ;;  %vm6549_vm15 = vmor %vm2796_vm14, %vm2797_vm7  ;;  %v2817_v9 = vand.u32 2147483648, %v6493_v38 }
 0x433   :  { %2419 = vst.msk [vmem:[#allocation2 + $0x30] sm:$0xff] %vm154_vm0, %v2403_v60  ;;  %v2730_v31 = vmul.f32 %v2729_v6, %v2534_v46  ;;  %v2769_v46 = vsel %vm6498_vm11, %v6445_v33, %v2765_v56  ;;  %vm2771_vm4 = vcmp.eq.f32.partialorder %v2770_v21, 8.507059e+37  ;;  %v2779_v6 = vmul.f32 %v6469_v35, %v2778_v8  ;;  %v6547_v28 = vpop.eup %4453 }
 0x434   :  { %v2793_v14 = vsub.f32 1.0, %v2792_v49  ;;  %v2807_v42 = vmul.f32 %v6522_v40, %v6493_v38  ;;  %vm2812_vm10 = vweird.f32 %v6522_v40  ;;  %vm2827_vm1 = vweird.f32 %v6547_v28 }
 0x435   :  { %2886 = vst.msk [vmem:[%s7250_s15 + $0x28] sm:$0xff] %vm154_vm0, %v2730_v31  ;;  %v3435_v63 = vpack.c.bf16 %v2730_v31, %v2715_v23  ;;  %v2787_v31 = vand.u32 2147483648, %v6442_v47  ;;  %v2780_v33 = vadd.f32 %v6469_v35, %v2779_v6  ;;  %vm2813_vm12 = vmor %vm2811_vm13, %vm2812_vm10  ;;  %vm2826_vm11 = vweird.f32 %v6517_v12 }
 0x436   :  { %v2808_v43 = vsub.f32 1.0, %v2807_v42 }
 0x437   :  { %4243 = vmatmul.msk.bf16.gmra.mxu3 %vm154_vm0, %v3435_v63  ;;  %v2774_v63 = vsel %vm2771_vm4, %v2773_v16, %v2769_v46  ;;  %v2815_v46 = vand.u32 2147483647, %v6493_v38  ;;  %vm6598_vm4 = vmor %vm2826_vm11, %vm2827_vm1  ;;  %vm3053_vm11 = vcmask 1041408  }
 0x438   :  { %v2374_v11 = vpop.f32.mrf.mxu0  ;;  %v2809_v56 = vmul.f32 %v6522_v40, %v2808_v43 }
 0x439   :  { %v2404_v55 = vadd.f32 %v2374_v11, %v2331_v15  ;;  %v2785_v15 = vand.u32 2147483647, %v6442_v47  ;;  %v2784_v47 = vsel %vm6524_vm8, %v6469_v35, %v2780_v33  ;;  %vm2816_vm9 = vcmp.eq.f32.partialorder %v2815_v46, 8.507059e+37 }
 0x43a   :  { %v2535_v4 = vld [vmem:[#allocation2 + $0x30] sm:$0xff] }
 0x43b   :  { %2420 = vst.msk [vmem:[#allocation2 + $0x38] sm:$0xff] %vm154_vm0, %v2404_v55  ;;  %v2745_v20 = vmul.f32 %v2744_v19, %v2535_v4  ;;  %v2788_v55 = vor.u32 1.1754944e-38, %v2787_v31  ;;  %vm2786_vm5 = vcmp.eq.f32.partialorder %v2785_v15, 8.507059e+37  ;;  %v2794_v4 = vmul.f32 %v6496_v17, %v2793_v14  ;;  %v6537_v19 = vpop.permute.xlu0 %2628 }
 0x43c   :  { %4455 = vrcp.f32 %v6537_v19  ;;  %vm2841_vm6 = vweird.f32 %v6537_v19  ;;  %v2847_v43 = vand.u32 2147483648, %v6537_v19 }
 0x43d   :  { %2887 = vst.msk [vmem:[%s7250_s15 + $0x30] sm:$0xff] %vm154_vm0, %v2745_v20  ;;  %v2789_v0 = vsel %vm2786_vm5, %v2788_v55, %v2784_v47  ;;  %v2795_v35 = vadd.f32 %v6496_v17, %v2794_v4  ;;  %v2832_v4 = vand.u32 2147483648, %v6517_v12 }
 0x440   :  { %v2377_v32 = vpop.f32.mrf.mxu0 }
 0x441   :  { %v2405_v37 = vadd.f32 %v2377_v32, %v2332_v24  ;;  %v2800_v24 = vand.u32 2147483647, %v6475_v45 }
 0x442   :  { %v2536_v23 = vld [vmem:[#allocation2 + $0x38] sm:$0xff]  ;;  %v6573_v49 = vpop.eup %4455 }
 0x443   :  { %2421 = vst.msk [vmem:[#allocation2 + $0x40] sm:$0xff] %vm154_vm0, %v2405_v37  ;;  %v2760_v50 = vmul.f32 %v2759_v13, %v2536_v23  ;;  %v2822_v23 = vmul.f32 %v6547_v28, %v6517_v12  ;;  %v2799_v13 = vsel %vm6549_vm15, %v6496_v17, %v2795_v35  ;;  %vm2801_vm2 = vcmp.eq.f32.partialorder %v2800_v24, 8.507059e+37  ;;  %v6567_v8 = vpop.permute.xlu0 %2633 }
 0x444   :  { %v2810_v17 = vadd.f32 %v6522_v40, %v2809_v56  ;;  %4457 = vrcp.f32 %v6567_v8  ;;  %v2837_v38 = vmul.f32 %v6573_v49, %v6537_v19  ;;  %vm2842_vm8 = vweird.f32 %v6573_v49  ;;  %v2338_v56 = vld [vmem:[#allocation2 + $0x70] sm:$0xff] }
 0x445   :  { %2888 = vst.msk [vmem:[%s7250_s15 + $0x38] sm:$0xff] %vm154_vm0, %v2760_v50  ;;  %v3436_v60 = vpack.c.bf16 %v2760_v50, %v2745_v20  ;;  %v2802_v20 = vand.u32 2147483648, %v6475_v45  ;;  %v2335_v45 = vld [vmem:[#allocation2 + $0x58] sm:$0xff]  ;;  %vm2843_vm5 = vmor %vm2841_vm6, %vm2842_vm8  ;;  %vm2856_vm7 = vweird.f32 %v6567_v8 }
 0x446   :  { %v2838_v11 = vsub.f32 1.0, %v2837_v38 }
 0x447   :  { %4244 = vmatmul.msk.bf16.gmra.mxu3 %vm154_vm0, %v3436_v60  ;;  %v2803_v62 = vor.u32 1.1754944e-38, %v2802_v20 }
 0x448   :  { %v2379_v48 = vpop.f32.mrf.mxu0 }
 0x449   :  { %v2406_v18 = vadd.f32 %v2379_v48, %v2333_v27  ;;  %v2804_v16 = vsel %vm2801_vm2, %v2803_v62, %v2799_v13  ;;  %v2823_v27 = vsub.f32 1.0, %v2822_v23  ;;  %v2818_v48 = vor.u32 1.1754944e-38, %v2817_v9 }
 0x44a   :  { %v2537_v39 = vld [vmem:[#allocation2 + $0x40] sm:$0xff]  ;;  %v6589_v47 = vpop.eup %4457  ;;  %v2848_v13 = vor.u32 1.1754944e-38, %v2847_v43 }
 0x44b   :  { %2422 = vst.msk [vmem:[#allocation2 + $0x48] sm:$0xff] %vm154_vm0, %v2406_v18  ;;  %v2775_v5 = vmul.f32 %v2774_v63, %v2537_v39  ;;  %v2336_v18 = vld [vmem:[#allocation2 + $0x60] sm:$0xff]  ;;  %v2824_v31 = vmul.f32 %v6547_v28, %v2823_v27  ;;  %v2814_v39 = vsel %vm2813_vm12, %v6522_v40, %v2810_v17  ;;  %v6586_v55 = vpop.permute.xlu0 %2638  ;;  %v2830_v40 = vand.u32 2147483647, %v6517_v12 }
 0x44c   :  { %v2819_v14 = vsel %vm2816_vm9, %v2818_v48, %v2814_v39  ;;  %4459 = vrcp.f32 %v6586_v55  ;;  %v2852_v12 = vmul.f32 %v6589_v47, %v6567_v8  ;;  %vm2857_vm15 = vweird.f32 %v6589_v47 }
 0x44d   :  { %2889 = vst.msk [vmem:[%s7250_s15 + $0x40] sm:$0xff] %vm154_vm0, %v2775_v5  ;;  %vm2831_vm3 = vcmp.eq.f32.partialorder %v2830_v40, 8.507059e+37  ;;  %vm6629_vm2 = vmor %vm2856_vm7, %vm2857_vm15  ;;  %vm2871_vm10 = vweird.f32 %v6586_v55 }
 0x44e   :  { %v2853_v62 = vsub.f32 1.0, %v2852_v12 }
 0x450   :  { %v2382_v3 = vpop.f32.mrf.mxu0 }
 0x451   :  { %v2407_v57 = vadd.f32 %v2382_v3, %v2334_v41 }
 0x452   :  { %v2538_v44 = vld [vmem:[#allocation2 + $0x48] sm:$0xff]  ;;  %v4460_v23 = vpop.eup %4459 }
 0x453   :  { %2423 = vst.msk [vmem:[#allocation2 + $0x50] sm:$0xff] %vm154_vm0, %v2407_v57  ;;  %v2790_v29 = vmul.f32 %v2789_v0, %v2538_v44  ;;  %v2337_v57 = vld [vmem:[#allocation2 + $0x68] sm:$0xff]  ;;  %v2839_v44 = vmul.f32 %v6573_v49, %v2838_v11  ;;  %v2833_v0 = vor.u32 1.1754944e-38, %v2832_v4  ;;  %vm2872_vm12 = vweird.f32 %v4460_v23 }
 0x454   :  { %v2877_v11 = vand.u32 2147483648, %v6586_v55  ;;  %vm2873_vm9 = vmor %vm2871_vm10, %vm2872_vm12 }
 0x455   :  { %2890 = vst.msk [vmem:[%s7250_s15 + $0x48] sm:$0xff] %vm154_vm0, %v2790_v29  ;;  %v3437_v37 = vpack.c.bf16 %v2790_v29, %v2775_v5  ;;  %v2825_v5 = vadd.f32 %v6547_v28, %v2824_v31  ;;  %v4803_v31 = vmov 2.0  }
 0x456   :  { %4461 = vrcp.f32 %v4803_v31 }
 0x457   :  { %4245 = vmatmul.msk.bf16.gmra.mxu3 %vm154_vm0, %v3437_v37  ;;  %v2829_v20 = vsel %vm6598_vm4, %v6547_v28, %v2825_v5  ;;  %v2840_v28 = vadd.f32 %v6573_v49, %v2839_v44  ;;  %v2845_v37 = vand.u32 2147483647, %v6537_v19  ;;  %v2867_v19 = vmul.f32 %v4460_v23, %v6586_v55 }
 0x458   :  { %v2384_v21 = vpop.f32.mrf.mxu0  ;;  %v2834_v32 = vsel %vm2831_vm3, %v2833_v0, %v2829_v20  ;;  %vm2977_vm3 = vcmask 1040384  }
 0x459   :  { %v2408_v50 = vadd.f32 %v2384_v21, %v2335_v45  ;;  %v2844_v21 = vsel %vm2843_vm5, %v6573_v49, %v2840_v28  ;;  %vm2846_vm14 = vcmp.eq.f32.partialorder %v2845_v37, 8.507059e+37  ;;  %v2868_v49 = vsub.f32 1.0, %v2867_v19 }
 0x45a   :  { %v2539_v60 = vld [vmem:[#allocation2 + $0x50] sm:$0xff]  ;;  %v2849_v17 = vsel %vm2846_vm14, %v2848_v13, %v2844_v21  ;;  %v7307_v21 = vlaneseq }
 0x45b   :  { %2424 = vst.msk [vmem:[#allocation2 + $0x58] sm:$0xff] %vm154_vm0, %v2408_v50  ;;  %v2805_v6 = vmul.f32 %v2804_v16, %v2539_v60  ;;  %v2854_v50 = vmul.f32 %v6589_v47, %v2853_v62  ;;  %v2862_v16 = vand.u32 2147483648, %v6567_v8 }
 0x45c   :  { %v4462_v5 = vpop.eup %4461 }
 0x45d   :  { %2891 = vst.msk [vmem:[%s7250_s15 + $0x50] sm:$0xff] %vm154_vm0, %v2805_v6  ;;  %v2855_v46 = vadd.f32 %v6589_v47, %v2854_v50  ;;  %v2863_v39 = vor.u32 1.1754944e-38, %v2862_v16  ;;  %v3031_v3 = vmul.f32 2.0, %v4462_v5  ;;  %vm3035_vm6 = vweird.f32 %v4462_v5 }
 0x45e   :  { %v6656_v50 = vand.u32 127, %v7307_v21 }
 0x45f   :  { %v3032_v12 = vsub.f32 1.0, %v3031_v3 }
 0x460   :  { %v2387_v63 = vpop.f32.mrf.mxu0  ;;  %vm3064_vm8 = vcmp.eq.s32.totalorder %v5501_v52, %v6656_v50  ;;  %vm3066_vm5 = vcmp.eq.s32.totalorder %v5586_v26, %v6656_v50  ;;  %vm3068_vm14 = vcmp.eq.s32.totalorder %v5597_v34, %v6656_v50  ;;  %vm3065_vm7 = vcmp.eq.s32.totalorder %v5515_v58, %v6656_v50 }
 0x461   :  { %v2409_v33 = vadd.f32 %v2387_v63, %v2336_v18  ;;  %v2339_v63 = vld [vmem:[#allocation2 + $0x78] sm:$0xff]  ;;  %v3033_v28 = vmul.f32 %v4462_v5, %v3032_v12  ;;  %vm3070_vm15 = vcmp.eq.s32.totalorder %v5654_v22, %v6656_v50  ;;  %vm3069_vm10 = vcmp.eq.s32.totalorder %v5641_v10, %v6656_v50 }
 0x462   :  { %v2540_v15 = vld [vmem:[#allocation2 + $0x58] sm:$0xff]  ;;  %vm3074_vm12 = vcmp.eq.s32.totalorder %v6007_v2, %v6656_v50 }
 0x463   :  { %2425 = vst.msk [vmem:[#allocation2 + $0x60] sm:$0xff] %vm154_vm0, %v2409_v33  ;;  %v2820_v41 = vmul.f32 %v2819_v14, %v2540_v15  ;;  %v2869_v33 = vmul.f32 %v4460_v23, %v2868_v49  ;;  %v3034_v13 = vadd.f32 %v4462_v5, %v3033_v28 }
 0x465   :  { %2892 = vst.msk [vmem:[%s7250_s15 + $0x58] sm:$0xff] %vm154_vm0, %v2820_v41  ;;  %v3438_v42 = vpack.c.bf16 %v2820_v41, %v2805_v6  ;;  %v2860_v6 = vand.u32 2147483647, %v6567_v8  ;;  %v2859_v8 = vsel %vm6629_vm2, %v6589_v47, %v2855_v46  ;;  %v2870_v40 = vadd.f32 %v4460_v23, %v2869_v33 }
 0x466   :  { %vm3067_vm2 = vcmp.eq.s32.totalorder %v5581_v61, %v6656_v50 }
 0x467   :  { %4246 = vmatmul.msk.bf16.gmra.mxu3 %vm154_vm0, %v3438_v42  ;;  %vm2861_vm13 = vcmp.eq.f32.partialorder %v2860_v6, 8.507059e+37  ;;  %v2875_v42 = vand.u32 2147483647, %v6586_v55  ;;  %v2874_v20 = vsel %vm2873_vm9, %v4460_v23, %v2870_v40  ;;  %vm3071_vm9 = vcmp.eq.s32.totalorder %v5678_v1, %v6656_v50 }
 0x468   :  { %v2389_v35 = vpop.f32.mrf.mxu0  ;;  %v2864_v4 = vsel %vm2861_vm13, %v2863_v39, %v2859_v8  ;;  %vm3072_vm13 = vcmp.eq.s32.totalorder %v5702_v54, %v6656_v50 }
 0x469   :  { %v2410_v24 = vadd.f32 %v2389_v35, %v2337_v57  ;;  %v2878_v57 = vor.u32 1.1754944e-38, %v2877_v11  ;;  %vm2876_vm1 = vcmp.eq.f32.partialorder %v2875_v42, 8.507059e+37 }
 0x46a   :  { %v2541_v29 = vld [vmem:[#allocation2 + $0x60] sm:$0xff] }
 0x46b   :  { %2426 = vst.msk [vmem:[#allocation2 + $0x68] sm:$0xff] %vm154_vm0, %v2410_v24  ;;  %v2835_v45 = vmul.f32 %v2834_v32, %v2541_v29  ;;  %v2879_v35 = vsel %vm2876_vm1, %v2878_v57, %v2874_v20  ;;  %vm3076_vm1 = vcmp.eq.s32.totalorder %v6047_v51, %v6656_v50 }
 0x46d   :  { %2893 = vst.msk [vmem:[%s7250_s15 + $0x60] sm:$0xff] %vm154_vm0, %v2835_v45 }
 0x470   :  { %v2392_v9 = vpop.f32.mrf.mxu0 }
 0x471   :  { %v2411_v60 = vadd.f32 %v2392_v9, %v2338_v56  ;;  %v6658_v9 = vsel %vm3035_vm6, %v4462_v5, %v3034_v13  ;;  %vm3077_vm6 = vcmp.eq.s32.totalorder %v6050_v30, %v6656_v50 }
 0x472   :  { %v2542_v27 = vld [vmem:[#allocation2 + $0x68] sm:$0xff] }
 0x473   :  { %2427 = vst.msk [vmem:[#allocation2 + $0x70] sm:$0xff] %vm154_vm0, %v2411_v60  ;;  %v2850_v48 = vmul.f32 %v2849_v17, %v2542_v27 }
 0x475   :  { %2894 = vst.msk [vmem:[%s7250_s15 + $0x68] sm:$0xff] %vm154_vm0, %v2850_v48  ;;  %v3439_v38 = vpack.c.bf16 %v2850_v48, %v2835_v45 }
 0x477   :  { %4247 = vmatmul.msk.bf16.gmra.mxu3 %vm154_vm0, %v3439_v38 }
 0x478   :  { %v2394_v15 = vpop.f32.mrf.mxu0 }
 0x479   :  { %v2412_v14 = vadd.f32 %v2394_v15, %v2339_v63 }
 0x47a   :  { %v2543_v41 = vld [vmem:[#allocation2 + $0x70] sm:$0xff] }
 0x47b   :  { %2428 = vst.msk [vmem:[#allocation2 + $0x78] sm:$0xff] %vm154_vm0, %v2412_v14  ;;  %v2865_v47 = vmul.f32 %v2864_v4, %v2543_v41 }
 0x47d   :  { %2895 = vst.msk [vmem:[%s7250_s15 + $0x70] sm:$0xff] %vm154_vm0, %v2865_v47 }
 0x480   :  { %v2928_v44 = vpop.f32.mrf.mxu0 }
 0x481   :  { %vm2932_vm4 = vcmp.ne.f32.partialorder %v2928_v44, 0.0 }
 0x482   :  { %v4232_v0 = vsel %vm2932_vm4, 1.0, %v4800_v53  ;;  %v2544_v55 = vld [vmem:[#allocation2 + $0x78] sm:$0xff]  ;;  %vm3078_vm4 = vcmp.eq.s32.totalorder %v6113_v7, %v6656_v50 }
 0x483   :  { %v2935_v24 = vpack.c.bf16 %v4232_v0, %v4232_v0  ;;  %v3054_v43 = vsel %vm3053_vm11, %v4232_v0, 0.0  ;;  %v2880_v29 = vmul.f32 %v2879_v35, %v2544_v55  ;;  %vm3073_vm11 = vcmp.eq.s32.totalorder %v5731_v59, %v6656_v50 }
 0x484   :  { %v3055_v32 = vrot.slane %v3054_v43, 4 }
 0x485   :  { %2936 = vxpose.xlu1.c.b16.start.end [1/1] (short) %v2935_v24, 128  ;;  %v2979_v37 = vsel %vm2977_vm3, %v2935_v24, 0  ;;  %2896 = vst.msk [vmem:[%s7250_s15 + $0x78] sm:$0xff] %vm154_vm0, %v2880_v29  ;;  %v3440_v62 = vpack.c.bf16 %v2880_v29, %v2865_v47  ;;  %vm3075_vm3 = vcmp.eq.s32.totalorder %v6027_v25, %v6656_v50 }
 0x486   :  { %v3056_v45 = vadd.f32 %v3055_v32, %v3054_v43  ;;  %2988 = vmatpush.bf16.msra.mxu2 %v2979_v37 }
 0x487   :  { %4248 = vmatmul.msk.bf16.gmra.mxu3 %vm154_vm0, %v3440_v62  ;;  %vm3518_vm0 = vcmask 64512  }
 0x488   :  { %v3057_v53 = vrot.slane %v3056_v45, 2  ;;  %v2930_v23 = vpop.f32.mrf.mxu0 }
 0x48a   :  { %v3058_v56 = vadd.f32 %v3057_v53, %v3056_v45 }
 0x48c   :  { %v3059_v19 = vrot.slane %v3058_v56, 1 }
 0x48e   :  { %v3060_v60 = vadd.f32 %v3059_v19, %v3058_v56 }
 0x490   :  { %v6663_v16 = vmul.f32 %v3060_v60, %v6658_v9 }
 0x492   :  { %v3080_v27 = vsel %vm3064_vm8, %v6663_v16, 0.0  ;;  %v3082_v31 = vsel %vm3066_vm5, %v6663_v16, 0.0  ;;  %v3084_v63 = vsel %vm3068_vm14, %v6663_v16, 0.0  ;;  %v3081_v26 = vsel %vm3065_vm7, %v6663_v16, 0.0 }
 0x493   :  { %3096 = vadd.xlane.f32.xlu2 %v3080_v27  ;;  %v3086_v34 = vsel %vm3070_vm15, %v6663_v16, 0.0  ;;  %v3083_v58 = vsel %vm3067_vm2, %v6663_v16, 0.0  ;;  %v3088_v22 = vsel %vm3072_vm13, %v6663_v16, 0.0  ;;  %v3085_v61 = vsel %vm3069_vm10, %v6663_v16, 0.0 }
 0x494   :  { %v3090_v54 = vsel %vm3074_vm12, %v6663_v16, 0.0  ;;  %v3087_v10 = vsel %vm3071_vm9, %v6663_v16, 0.0  ;;  %v3092_v2 = vsel %vm3076_vm1, %v6663_v16, 0.0  ;;  %v3089_v1 = vsel %vm3073_vm11, %v6663_v16, 0.0 }
 0x495   :  { %v3094_v51 = vsel %vm3078_vm4, %v6663_v16, 0.0  ;;  %v3091_v59 = vsel %vm3075_vm3, %v6663_v16, 0.0  ;;  %v3093_v41 = vsel %vm3077_vm6, %v6663_v16, 0.0  ;;  %vm3079_vm8 = vcmp.eq.s32.totalorder %v6131_v36, %v6656_v50 }
 0x496   :  { %v3095_v4 = vsel %vm3079_vm8, %v6663_v16, 0.0  ;;  %vm2952_vm5 = vcmask 15360  }
 0x49a   :  { %v6666_v17 = vpop.f32.mrf.mxu3 }
 0x49b   :  { %v3519_v46 = vsel %vm3518_vm0, %v6666_v17, -inf }
 0x49c   :  { %3520 = vmax.xlane.f32.xlu0 %v3519_v46 }
 0x4a2   :  { %v6670_v6 = vpop.f32.mrf.mxu3 }
 0x4a3   :  { %v3522_v49 = vsel %vm3518_vm0, %v6670_v6, -inf }
 0x4a4   :  { %3523 = vmax.xlane.f32.xlu2 %v3522_v49 }
 0x4aa   :  { %v6674_v52 = vpop.f32.mrf.mxu3 }
 0x4ab   :  { %v3525_v48 = vsel %vm3518_vm0, %v6674_v52, -inf }
 0x4ac   :  { %3526 = vmax.xlane.f32.xlu0 %v3525_v48 }
 0x4b2   :  { %v6680_v18 = vpop.f32.mrf.mxu3 }
 0x4b3   :  { %v3528_v38 = vsel %vm3518_vm0, %v6680_v18, -inf }
 0x4b4   :  { %3100 = vadd.xlane.f32.xlu0 %v3082_v31  ;;  %3529 = vmax.xlane.f32.xlu2 %v3528_v38 }
 0x4ba   :  { %v6689_v39 = vpop.f32.mrf.mxu3 }
 0x4bc   :  { %3104 = vadd.xlane.f32.xlu0 %v3084_v63  ;;  %3098 = vadd.xlane.f32.xlu2 %v3081_v26 }
 0x4c2   :  { %v6697_v8 = vpop.f32.mrf.mxu3 }
 0x4c3   :  { %v3534_v7 = vsel %vm3518_vm0, %v6697_v8, -inf }
 0x4c4   :  { %3108 = vadd.xlane.f32.xlu0 %v3086_v34  ;;  %3102 = vadd.xlane.f32.xlu2 %v3083_v58 }
 0x4ca   :  { %v6705_v33 = vpop.f32.mrf.mxu3 }
 0x4cb   :  { %v3537_v42 = vsel %vm3518_vm0, %v6705_v33, -inf }
 0x4cc   :  { %3112 = vadd.xlane.f32.xlu0 %v3088_v22  ;;  %3106 = vadd.xlane.f32.xlu2 %v3085_v61 }
 0x4d2   :  { %v6713_v15 = vpop.f32.mrf.mxu3 }
 0x4d3   :  { %v3540_v40 = vsel %vm3518_vm0, %v6713_v15, -inf }
 0x4d4   :  { %3116 = vadd.xlane.f32.xlu0 %v3090_v54  ;;  %3110 = vadd.xlane.f32.xlu2 %v3087_v10 }
 0x4da   :  { %v6721_v14 = vpop.f32.mrf.mxu3 }
 0x4db   :  { %v3543_v3 = vsel %vm3518_vm0, %v6721_v14, -inf }
 0x4dc   :  { %3120 = vadd.xlane.f32.xlu0 %v3092_v2  ;;  %3114 = vadd.xlane.f32.xlu2 %v3089_v1 }
 0x4e2   :  { %v6729_v5 = vpop.f32.mrf.mxu3 }
 0x4e3   :  { %v3546_v47 = vsel %vm3518_vm0, %v6729_v5, -inf }
 0x4e4   :  { %3124 = vadd.xlane.f32.xlu0 %v3094_v51  ;;  %3118 = vadd.xlane.f32.xlu2 %v3091_v59  ;;  %v3531_v51 = vsel %vm3518_vm0, %v6689_v39, -inf }
 0x4ea   :  { %v6735_v11 = vpop.f32.mrf.mxu3 }
 0x4eb   :  { %v3549_v44 = vsel %vm3518_vm0, %v6735_v11, -inf }
 0x4ec   :  { %3122 = vadd.xlane.f32.xlu2 %v3093_v41  ;;  %3535 = vmax.xlane.f32.xlu0 %v3534_v7 }
 0x4f2   :  { %v6742_v25 = vpop.f32.mrf.mxu3 }
 0x4f3   :  { %v3552_v57 = vsel %vm3518_vm0, %v6742_v25, -inf }
 0x4f4   :  { %3126 = vadd.xlane.f32.xlu2 %v3095_v4  ;;  %3541 = vmax.xlane.f32.xlu0 %v3540_v40 }
 0x4fa   :  { %v6747_v30 = vpop.f32.mrf.mxu3 }
 0x4fb   :  { %v3555_v29 = vsel %vm3518_vm0, %v6747_v30, -inf }
 0x4fc   :  { %3538 = vmax.xlane.f32.xlu2 %v3537_v42  ;;  %3547 = vmax.xlane.f32.xlu0 %v3546_v47 }
 0x502   :  { %v6753_v36 = vpop.f32.mrf.mxu3 }
 0x503   :  { %v3558_v12 = vsel %vm3518_vm0, %v6753_v36, -inf }
 0x504   :  { %3544 = vmax.xlane.f32.xlu2 %v3543_v3  ;;  %3553 = vmax.xlane.f32.xlu0 %v3552_v57 }
 0x506   :  { %v6765_v0 = vpop.xlane.xlu2 %3096 }
 0x50a   :  { %v6759_v20 = vpop.f32.mrf.mxu3 }
 0x50b   :  { %v3561_v53 = vsel %vm3518_vm0, %v6759_v20, -inf }
 0x50c   :  { %3550 = vmax.xlane.f32.xlu2 %v3549_v44  ;;  %3559 = vmax.xlane.f32.xlu0 %v3558_v12 }
 0x50f   :  { %v3521_v55 = vpop.xlane.xlu0 %3520 }
 0x510   :  { %v3567_v35 = vsub.f32 %v6666_v17, %v3521_v55 }
 0x512   :  { %v3583_v24 = vmul.f32 1.442695, %v3567_v35  ;;  %v6768_v43 = vpop.f32.mrf.mxu3 }
 0x513   :  { %v3564_v32 = vsel %vm3518_vm0, %v6768_v43, -inf }
 0x514   :  { %4463 = vpow2.f32 %v3583_v24  ;;  %3556 = vmax.xlane.f32.xlu2 %v3555_v29  ;;  %3565 = vmax.xlane.f32.xlu0 %v3564_v32 }
 0x517   :  { %v3524_v28 = vpop.xlane.xlu2 %3523 }
 0x518   :  { %v3568_v37 = vsub.f32 %v6670_v6, %v3524_v28 }
 0x51a   :  { %v6775_v62 = vpop.eup %4463  ;;  %v3585_v45 = vmul.f32 1.442695, %v3568_v37 }
 0x51b   :  { %v3615_v23 = vsel %vm3518_vm0, %v6775_v62, 0.0 }
 0x51c   :  { %4465 = vpow2.f32 %v3585_v45  ;;  %3562 = vmax.xlane.f32.xlu2 %v3561_v53  ;;  %3616 = vadd.xlane.f32.xlu0 %v3615_v23 }
 0x51f   :  { %v3527_v13 = vpop.xlane.xlu0 %3526 }
 0x520   :  { %v3569_v56 = vsub.f32 %v6674_v52, %v3527_v13 }
 0x522   :  { %v6782_v21 = vpop.eup %4465  ;;  %v3587_v50 = vmul.f32 1.442695, %v3569_v56 }
 0x523   :  { %v3618_v19 = vsel %vm3518_vm0, %v6782_v21, 0.0 }
 0x524   :  { %4467 = vpow2.f32 %v3587_v50  ;;  %3619 = vadd.xlane.f32.xlu2 %v3618_v19 }
 0x527   :  { %v6786_v60 = vpop.xlane.xlu0 %3100  ;;  %v3530_v27 = vpop.xlane.xlu2 %3529 }
 0x528   :  { %v3570_v17 = vsub.f32 %v6680_v18, %v3530_v27 }
 0x52a   :  { %v6789_v46 = vpop.eup %4467  ;;  %v3589_v6 = vmul.f32 1.442695, %v3570_v17 }
 0x52b   :  { %v3621_v49 = vsel %vm3518_vm0, %v6789_v46, 0.0 }
 0x52c   :  { %3622 = vadd.xlane.f32.xlu0 %v3621_v49  ;;  %4469 = vpow2.f32 %v3589_v6 }
 0x52f   :  { %v6793_v52 = vpop.xlane.xlu0 %3104  ;;  %v6795_v48 = vpop.xlane.xlu2 %3098 }
 0x531   :  { %v2944_v31 = vpop.trf.xlu1 }
 0x532   :  { %4233 = vmatmul.msk.bf16.vlgmr.msra.gmra.mxu2 %vm2952_vm5, %v2944_v31  ;;  %v6798_v38 = vpop.eup %4469 }
 0x533   :  { %v3624_v18 = vsel %vm3518_vm0, %v6798_v38, 0.0 }
 0x534   :  { %3625 = vadd.xlane.f32.xlu2 %v3624_v18 }
 0x537   :  { %v6802_v63 = vpop.xlane.xlu0 %3108  ;;  %v6804_v26 = vpop.xlane.xlu2 %3102 }
 0x53f   :  { %v6806_v34 = vpop.xlane.xlu0 %3112  ;;  %v6808_v58 = vpop.xlane.xlu2 %3106 }
 0x541   :  { %v2945_v22 = vpop.trf.xlu1 }
 0x542   :  { %4234 = vmatmul.msk.bf16.gmra.mxu2 %vm2952_vm5, %v2945_v22 }
 0x547   :  { %v6811_v61 = vpop.xlane.xlu0 %3116  ;;  %v6813_v54 = vpop.xlane.xlu2 %3110 }
 0x54f   :  { %v6815_v10 = vpop.xlane.xlu0 %3120  ;;  %v6817_v2 = vpop.xlane.xlu2 %3114 }
 0x551   :  { %v2946_v1 = vpop.trf.xlu1 }
 0x552   :  { %4235 = vmatmul.msk.bf16.gmra.mxu2 %vm2952_vm5, %v2946_v1 }
 0x555   :  { %3532 = vmax.xlane.f32.xlu1 %v3531_v51 }
 0x557   :  { %v6822_v59 = vpop.xlane.xlu0 %3124  ;;  %v6824_v41 = vpop.xlane.xlu2 %3118 }
 0x55f   :  { %v6826_v7 = vpop.xlane.xlu2 %3122  ;;  %v3536_v4 = vpop.xlane.xlu0 %3535 }
 0x560   :  { %v3572_v40 = vsub.f32 %v6697_v8, %v3536_v4 }
 0x561   :  { %v2947_v42 = vpop.trf.xlu1 }
 0x562   :  { %v3593_v47 = vmul.f32 1.442695, %v3572_v40  ;;  %4236 = vmatmul.msk.bf16.gmra.mxu2 %vm2952_vm5, %v2947_v42 }
 0x564   :  { %4471 = vpow2.f32 %v3593_v47 }
 0x567   :  { %v6830_v3 = vpop.xlane.xlu2 %3126  ;;  %v3542_v57 = vpop.xlane.xlu0 %3541 }
 0x568   :  { %v3574_v44 = vsub.f32 %v6713_v15, %v3542_v57 }
 0x56a   :  { %v3597_v12 = vmul.f32 1.442695, %v3574_v44  ;;  %v6833_v55 = vpop.eup %4471 }
 0x56b   :  { %v3630_v35 = vsel %vm3518_vm0, %v6833_v55, 0.0 }
 0x56c   :  { %4473 = vpow2.f32 %v3597_v12  ;;  %3631 = vadd.xlane.f32.xlu2 %v3630_v35 }
 0x56f   :  { %v6837_v24 = vpop.xlane.xlu2 %3538  ;;  %v3548_v8 = vpop.xlane.xlu0 %3547 }
 0x570   :  { %v3576_v29 = vsub.f32 %v6729_v5, %v3548_v8 }
 0x571   :  { %v2948_v32 = vpop.trf.xlu1 }
 0x572   :  { %v3601_v28 = vmul.f32 1.442695, %v3576_v29  ;;  %4237 = vmatmul.msk.bf16.gmra.mxu2 %vm2952_vm5, %v2948_v32  ;;  %v6841_v37 = vpop.eup %4473  ;;  %v3129_v29 = vmul.f32 %v6795_v48, %v6663_v16 }
 0x573   :  { %v3636_v15 = vsel %vm3518_vm0, %v6841_v37, 0.0 }
 0x574   :  { %4475 = vpow2.f32 %v3601_v28  ;;  %3637 = vadd.xlane.f32.xlu2 %v3636_v15  ;;  %v6883_v32 = vmax.f32 %v3129_v29, 1e-12 }
 0x576   :  { %vm3180_vm10 = vweird.f32 %v6883_v32 }
 0x577   :  { %v6845_v45 = vpop.xlane.xlu2 %3544  ;;  %v3554_v53 = vpop.xlane.xlu0 %3553 }
 0x578   :  { %v3578_v23 = vsub.f32 %v6742_v25, %v3554_v53 }
 0x57a   :  { %v3605_v13 = vmul.f32 1.442695, %v3578_v23  ;;  %v6848_v56 = vpop.eup %4475  ;;  %v3130_v23 = vmul.f32 %v6786_v60, %v6663_v16  ;;  %v3131_v60 = vmul.f32 %v6804_v26, %v6663_v16 }
 0x57b   :  { %v3642_v5 = vsel %vm3518_vm0, %v6848_v56, 0.0 }
 0x57c   :  { %4477 = vpow2.f32 %v3605_v13  ;;  %3643 = vadd.xlane.f32.xlu2 %v3642_v5  ;;  %v6894_v5 = vmax.f32 %v3130_v23, 1e-12  ;;  %v3186_v23 = vand.u32 2147483648, %v6883_v32 }
 0x57e   :  { %vm3195_vm11 = vweird.f32 %v6894_v5 }
 0x57f   :  { %v6852_v50 = vpop.xlane.xlu2 %3550  ;;  %v3560_v19 = vpop.xlane.xlu0 %3559 }
 0x580   :  { %v3580_v27 = vsub.f32 %v6753_v36, %v3560_v19 }
 0x581   :  { %v2949_v17 = vpop.trf.xlu1 }
 0x582   :  { %v3609_v6 = vmul.f32 1.442695, %v3580_v27  ;;  %4238 = vmatmul.msk.bf16.gmra.mxu2 %vm2952_vm5, %v2949_v17  ;;  %v6856_v49 = vpop.eup %4477 }
 0x583   :  { %v3648_v25 = vsel %vm3518_vm0, %v6856_v49, 0.0 }
 0x584   :  { %4479 = vpow2.f32 %v3609_v6  ;;  %3649 = vadd.xlane.f32.xlu2 %v3648_v25 }
 0x587   :  { %v6860_v31 = vpop.xlane.xlu2 %3556  ;;  %v3566_v18 = vpop.xlane.xlu0 %3565 }
 0x588   :  { %v3582_v22 = vsub.f32 %v6768_v43, %v3566_v18  ;;  %v3128_v43 = vmul.f32 %v6765_v0, %v6663_v16 }
 0x58a   :  { %v3613_v1 = vmul.f32 1.442695, %v3582_v22  ;;  %v6863_v51 = vpop.eup %4479  ;;  %v3144_v12 = vmax.f32 %v3128_v43, 1e-12  ;;  %v6905_v22 = vmax.f32 %v3131_v60, 1e-12  ;;  %v3132_v43 = vmul.f32 %v6793_v52, %v6663_v16 }
 0x58b   :  { %v3654_v36 = vsel %vm3518_vm0, %v6863_v51, 0.0  ;;  %v3187_v60 = vor.u32 1.1754944e-38, %v3186_v23  ;;  %v3135_v23 = vmul.f32 %v6813_v54, %v6663_v16 }
 0x58c   :  { %4481 = vpow2.f32 %v3613_v1  ;;  %3655 = vadd.xlane.f32.xlu2 %v3654_v36  ;;  %vm3165_vm7 = vweird.f32 %v3144_v12  ;;  %v3169_v26 = vand.u32 2147483647, %v3144_v12  ;;  %vm3210_vm8 = vweird.f32 %v6905_v22 }
 0x58e   :  { %vm3170_vm2 = vcmp.eq.f32.partialorder %v3169_v26, 8.507059e+37 }
 0x58f   :  { %v6867_v4 = vpop.xlane.xlu2 %3562  ;;  %v3617_v40 = vpop.xlane.xlu0 %3616 }
 0x590   :  { %4483 = vrcp.f32 %v3617_v40 }
 0x591   :  { %v2950_v42 = vpop.trf.xlu1 }
 0x592   :  { %4239 = vmatmul.msk.bf16.gmra.mxu2 %vm2952_vm5, %v2950_v42  ;;  %v6870_v47 = vpop.eup %4481  ;;  %v3171_v42 = vand.u32 2147483648, %v3144_v12 }
 0x593   :  { %v3660_v57 = vsel %vm3518_vm0, %v6870_v47, 0.0 }
 0x594   :  { %3661 = vadd.xlane.f32.xlu2 %v3660_v57 }
 0x596   :  { %v4484_v44 = vpop.eup %4483 }
 0x597   :  { %v3679_v35 = vmul.f32 %v4484_v44, %v6775_v62  ;;  %v3620_v8 = vpop.xlane.xlu2 %3619 }
 0x598   :  { %4485 = vrcp.f32 %v3620_v8  ;;  %v3172_v8 = vor.u32 1.1754944e-38, %v3171_v42  ;;  %v3134_v42 = vmul.f32 %v6802_v63, %v6663_v16 }
 0x599   :  { %3695 = vst.msk [vmem:[%s7251_s16] sm:$0xff] %vm3518_vm0, %v3679_v35  ;;  %4487 = vrcp.f32 %v3144_v12 }
 0x59e   :  { %v4486_v0 = vpop.eup %4485 }
 0x59f   :  { %v3680_v28 = vmul.f32 %v4486_v0, %v6782_v21  ;;  %v3623_v15 = vpop.xlane.xlu0 %3622  ;;  %v4488_v53 = vpop.eup %4487  ;;  %v6917_v0 = vmax.f32 %v3132_v43, 1e-12 }
 0x5a0   :  { %4489 = vrcp.f32 %v3623_v15  ;;  %v3161_v48 = vmul.f32 %v4488_v53, %v3144_v12  ;;  %vm3166_vm14 = vweird.f32 %v4488_v53 }
 0x5a1   :  { %3696 = vst.msk [vmem:[%s7251_s16 + $0x8] sm:$0xff] %vm3518_vm0, %v3680_v28  ;;  %v2951_v62 = vpop.trf.xlu1  ;;  %4491 = vrcp.f32 %v6883_v32  ;;  %vm3167_vm15 = vmor %vm3165_vm7, %vm3166_vm14 }
 0x5a2   :  { %4240 = vmatmul.msk.bf16.gmra.mxu2 %vm2952_vm5, %v2951_v62  ;;  %v3162_v19 = vsub.f32 1.0, %v3161_v48  ;;  %v3133_v48 = vmul.f32 %v6808_v58, %v6663_v16  ;;  %v3201_v58 = vand.u32 2147483648, %v6894_v5 }
 0x5a4   :  { %v3163_v25 = vmul.f32 %v4488_v53, %v3162_v19 }
 0x5a6   :  { %v4490_v13 = vpop.eup %4489  ;;  %v3164_v36 = vadd.f32 %v4488_v53, %v3163_v25  ;;  %v6930_v25 = vmax.f32 %v3133_v48, 1e-12  ;;  %v3573_v48 = vsub.f32 %v6705_v33, %v6837_v24 }
 0x5a7   :  { %v3681_v21 = vmul.f32 %v4490_v13, %v6789_v46  ;;  %v3626_v27 = vpop.xlane.xlu2 %3625  ;;  %v4492_v17 = vpop.eup %4491 }
 0x5a8   :  { %4493 = vrcp.f32 %v3626_v27  ;;  %v3176_v6 = vmul.f32 %v4492_v17, %v6883_v32  ;;  %vm3181_vm13 = vweird.f32 %v4492_v17 }
 0x5a9   :  { %3697 = vst.msk [vmem:[%s7251_s16 + $0x10] sm:$0xff] %vm3518_vm0, %v3681_v21  ;;  %4495 = vrcp.f32 %v6894_v5  ;;  %vm3182_vm12 = vmor %vm3180_vm10, %vm3181_vm13 }
 0x5aa   :  { %v3177_v46 = vsub.f32 1.0, %v3176_v6  ;;  %4497 = vrcp.f32 %v6905_v22 }
 0x5ab   :  { %4499 = vrcp.f32 %v6917_v0 }
 0x5ac   :  { %v3178_v44 = vmul.f32 %v4492_v17, %v3177_v46  ;;  %4501 = vrcp.f32 %v6930_v25 }
 0x5ae   :  { %v4494_v18 = vpop.eup %4493  ;;  %v3179_v62 = vadd.f32 %v4492_v17, %v3178_v44  ;;  %v3202_v44 = vor.u32 1.1754944e-38, %v3201_v58  ;;  %v3229_v58 = vand.u32 2147483647, %v6917_v0 }
 0x5af   :  { %v3682_v1 = vmul.f32 %v4494_v18, %v6798_v38  ;;  %v4496_v40 = vpop.eup %4495  ;;  %v3168_v38 = vsel %vm3167_vm15, %v4488_v53, %v3164_v36  ;;  %v3184_v53 = vand.u32 2147483647, %v6883_v32  ;;  %vm3225_vm15 = vweird.f32 %v6917_v0 }
 0x5b0   :  { %v3191_v57 = vmul.f32 %v4496_v40, %v6894_v5  ;;  %v3173_v28 = vsel %vm3170_vm2, %v3172_v8, %v3168_v38  ;;  %v6919_v52 = vpop.eup %4497  ;;  %v3183_v21 = vsel %vm3182_vm12, %v4492_v17, %v3179_v62  ;;  %vm3196_vm1 = vweird.f32 %v4496_v40 }
 0x5b1   :  { %3698 = vst.msk [vmem:[%s7251_s16 + $0x18] sm:$0xff] %vm3518_vm0, %v3682_v1  ;;  %v3206_v13 = vmul.f32 %v6919_v52, %v6905_v22  ;;  %vm3185_vm9 = vcmp.eq.f32.partialorder %v3184_v53, 8.507059e+37  ;;  %v6932_v36 = vpop.eup %4499  ;;  %v3199_v17 = vand.u32 2147483647, %v6894_v5  ;;  %vm3197_vm4 = vmor %vm3195_vm11, %vm3196_vm1  ;;  %v6944_v8 = vmax.f32 %v3134_v42, 1e-12 }
 0x5b2   :  { %v3192_v15 = vsub.f32 1.0, %v3191_v57  ;;  %v3188_v18 = vsel %vm3185_vm9, %v3187_v60, %v3183_v21  ;;  %v3221_v26 = vmul.f32 %v6932_v36, %v6917_v0  ;;  %vm3211_vm6 = vweird.f32 %v6919_v52 }
 0x5b3   :  { %v3207_v32 = vsub.f32 1.0, %v3206_v13  ;;  %vm3200_vm3 = vcmp.eq.f32.partialorder %v3199_v17, 8.507059e+37  ;;  %v3216_v62 = vand.u32 2147483648, %v6905_v22  ;;  %v3214_v53 = vand.u32 2147483647, %v6905_v22  ;;  %vm3212_vm5 = vmor %vm3210_vm8, %vm3211_vm6 }
 0x5b4   :  { %v3193_v19 = vmul.f32 %v4496_v40, %v3192_v15  ;;  %4503 = vrcp.f32 %v6944_v8  ;;  %v6963_v60 = vmax.f32 %v3135_v23, 1e-12  ;;  %vm3226_vm7 = vweird.f32 %v6932_v36 }
 0x5b5   :  { %v2990_v35 = vpop.f32.mrf.mxu2  ;;  %v3208_v57 = vmul.f32 %v6919_v52, %v3207_v32  ;;  %vm3215_vm14 = vcmp.eq.f32.partialorder %v3214_v53, 8.507059e+37  ;;  %v3575_v42 = vsub.f32 %v6721_v14, %v6845_v45  ;;  %vm3227_vm2 = vmor %vm3225_vm15, %vm3226_vm7  ;;  %vm3230_vm13 = vcmp.eq.f32.partialorder %v3229_v58, 8.507059e+37 }
 0x5b6   :  { %v3037_v29 = vmul.f32 %v6658_v9, %v2990_v35  ;;  %v3194_v1 = vadd.f32 %v4496_v40, %v3193_v19  ;;  %vm3240_vm12 = vweird.f32 %v6930_v25  ;;  %v3577_v23 = vsub.f32 %v6735_v11, %v6852_v50 }
 0x5b7   :  { %v3209_v15 = vadd.f32 %v6919_v52, %v3208_v57  ;;  %v3599_v14 = vmul.f32 1.442695, %v3575_v42 }
 0x5b8   :  { %v3174_v12 = vmul.f32 %v3173_v28, %v3037_v29  ;;  %v3198_v43 = vsel %vm3197_vm4, %v4496_v40, %v3194_v1  ;;  %v3222_v29 = vsub.f32 1.0, %v3221_v26  ;;  %v3136_v1 = vmul.f32 %v6806_v34, %v6663_v16 }
 0x5b9   :  { %v3203_v5 = vsel %vm3200_vm3, %v3202_v44, %v3198_v43  ;;  %v3213_v21 = vsel %vm3212_vm5, %v6919_v52, %v3209_v15  ;;  %v3231_v52 = vand.u32 2147483648, %v6917_v0  ;;  %v3246_v15 = vand.u32 2147483648, %v6930_v25 }
 0x5ba   :  { %3400 = vst [vmem:[#allocation17] sm:$0xff] %v3174_v12  ;;  %v6948_v12 = vpop.eup %4501  ;;  %v3223_v19 = vmul.f32 %v6932_v36, %v3222_v29  ;;  %v6986_v0 = vmax.f32 %v3136_v1, 1e-12  ;;  %v3603_v11 = vmul.f32 1.442695, %v3577_v23  ;;  %vm3255_vm4 = vweird.f32 %v6944_v8 }
 0x5bb   :  { %v3232_v44 = vor.u32 1.1754944e-38, %v3231_v52  ;;  %vm3241_vm10 = vweird.f32 %v6948_v12  ;;  %v3579_v1 = vsub.f32 %v6747_v30, %v6860_v31  ;;  %vm3270_vm5 = vweird.f32 %v6963_v60 }
 0x5bc   :  { %v3224_v32 = vadd.f32 %v6932_v36, %v3223_v19  ;;  %vm3242_vm9 = vmor %vm3240_vm12, %vm3241_vm10 }
 0x5bd   :  { %v2992_v27 = vpop.f32.mrf.mxu2 }
 0x5be   :  { %v3038_v6 = vmul.f32 %v6658_v9, %v2992_v27  ;;  %v3217_v27 = vor.u32 1.1754944e-38, %v3216_v62  ;;  %v3228_v43 = vsel %vm3227_vm2, %v6932_v36, %v3224_v32  ;;  %v3244_v62 = vand.u32 2147483647, %v6930_v25 }
 0x5bf   :  { %v3233_v45 = vsel %vm3230_vm13, %v3232_v44, %v3228_v43  ;;  %v3259_v32 = vand.u32 2147483647, %v6944_v8  ;;  %v3607_v44 = vmul.f32 1.442695, %v3579_v1  ;;  %vm3285_vm2 = vweird.f32 %v6986_v0 }
 0x5c0   :  { %v3189_v46 = vmul.f32 %v3188_v18, %v3038_v6  ;;  %v3595_v6 = vmul.f32 1.442695, %v3573_v48  ;;  %v3218_v18 = vsel %vm3215_vm14, %v3217_v27, %v3213_v21  ;;  %v3247_v21 = vor.u32 1.1754944e-38, %v3246_v15 }
 0x5c1   :  { %vm3245_vm1 = vcmp.eq.f32.partialorder %v3244_v62, 8.507059e+37  ;;  %vm3260_vm6 = vcmp.eq.f32.partialorder %v3259_v32, 8.507059e+37  ;;  %v3581_v15 = vsub.f32 %v6759_v20, %v6867_v4 }
 0x5c2   :  { %3401 = vst [vmem:[#allocation17 + $0x8] sm:$0xff] %v3189_v46  ;;  %v6968_v46 = vpop.eup %4503 }
 0x5c3   :  { %v3251_v26 = vmul.f32 %v6968_v46, %v6944_v8  ;;  %vm3256_vm11 = vweird.f32 %v6968_v46  ;;  %v3611_v4 = vmul.f32 1.442695, %v3581_v15 }
 0x5c4   :  { %vm3257_vm3 = vmor %vm3255_vm4, %vm3256_vm11 }
 0x5c5   :  { %v2995_v38 = vpop.f32.mrf.mxu2  ;;  %v3252_v29 = vsub.f32 1.0, %v3251_v26 }
 0x5c6   :  { %v3039_v35 = vmul.f32 %v6658_v9, %v2995_v38 }
 0x5c8   :  { %v3204_v28 = vmul.f32 %v3203_v5, %v3039_v35  ;;  %v3533_v63 = vpop.xlane.xlu1 %3532 }
 0x5c9   :  { %v3571_v40 = vsub.f32 %v6689_v39, %v3533_v63  ;;  %v3236_v39 = vmul.f32 %v6948_v12, %v6930_v25 }
 0x5ca   :  { %3402 = vst [vmem:[#allocation17 + $0x10] sm:$0xff] %v3204_v28 }
 0x5cb   :  { %v3591_v13 = vmul.f32 1.442695, %v3571_v40  ;;  %v3237_v33 = vsub.f32 1.0, %v3236_v39  ;;  %v3137_v40 = vmul.f32 %v6817_v2, %v6663_v16  ;;  %v3253_v2 = vmul.f32 %v6968_v46, %v3252_v29 }
 0x5cd   :  { %4505 = vpow2.f32 %v3591_v13  ;;  %v2997_v54 = vpop.f32.mrf.mxu2  ;;  %v3238_v57 = vmul.f32 %v6948_v12, %v3237_v33  ;;  %v7009_v19 = vmax.f32 %v3137_v40, 1e-12  ;;  %v3261_v33 = vand.u32 2147483648, %v6944_v8 }
 0x5ce   :  { %v3040_v22 = vmul.f32 %v6658_v9, %v2997_v54  ;;  %4507 = vrcp.f32 %v6963_v60 }
 0x5cf   :  { %4509 = vpow2.f32 %v3595_v6  ;;  %v3239_v36 = vadd.f32 %v6948_v12, %v3238_v57  ;;  %v3254_v6 = vadd.f32 %v6968_v46, %v3253_v2  ;;  %v3262_v43 = vor.u32 1.1754944e-38, %v3261_v33 }
 0x5d0   :  { %v3219_v24 = vmul.f32 %v3218_v18, %v3040_v22  ;;  %4511 = vrcp.f32 %v6986_v0 }
 0x5d1   :  { %4513 = vpow2.f32 %v3599_v14  ;;  %v3243_v48 = vsel %vm3242_vm9, %v6948_v12, %v3239_v36  ;;  %v3258_v58 = vsel %vm3257_vm3, %v6968_v46, %v3254_v6  ;;  %v3139_v36 = vmul.f32 %v6824_v41, %v6663_v16 }
 0x5d2   :  { %3403 = vst [vmem:[#allocation17 + $0x18] sm:$0xff] %v3219_v24  ;;  %v3248_v50 = vsel %vm3245_vm1, %v3247_v21, %v3243_v48  ;;  %v3138_v24 = vmul.f32 %v6811_v61, %v6663_v16  ;;  %v3263_v30 = vsel %vm3260_vm6, %v3262_v43, %v3258_v58  ;;  %vm3300_vm9 = vweird.f32 %v7009_v19 }
 0x5d3   :  { %v6976_v17 = vpop.eup %4505 }
 0x5d4   :  { %v3627_v34 = vsel %vm3518_vm0, %v6976_v17, 0.0  ;;  %v6989_v5 = vpop.eup %4507 }
 0x5d5   :  { %v3000_v38 = vpop.f32.mrf.mxu2  ;;  %3628 = vadd.xlane.f32.xlu0 %v3627_v34  ;;  %v6993_v63 = vpop.eup %4509  ;;  %v3266_v53 = vmul.f32 %v6989_v5, %v6963_v60  ;;  %v7032_v34 = vmax.f32 %v3138_v24, 1e-12  ;;  %vm3271_vm8 = vweird.f32 %v6989_v5 }
 0x5d6   :  { %v3041_v35 = vmul.f32 %v6658_v9, %v3000_v38  ;;  %v3633_v13 = vsel %vm3518_vm0, %v6993_v63, 0.0  ;;  %v7012_v54 = vpop.eup %4511  ;;  %vm3272_vm14 = vmor %vm3270_vm5, %vm3271_vm8 }
 0x5d7   :  { %v3267_v27 = vsub.f32 1.0, %v3266_v53  ;;  %v7016_v18 = vpop.eup %4513  ;;  %v3281_v52 = vmul.f32 %v7012_v54, %v6986_v0  ;;  %vm3286_vm15 = vweird.f32 %v7012_v54  ;;  %vm3315_vm3 = vweird.f32 %v7032_v34 }
 0x5d8   :  { %v3234_v28 = vmul.f32 %v3233_v45, %v3041_v35  ;;  %v3639_v61 = vsel %vm3518_vm0, %v7016_v18, 0.0  ;;  %vm3287_vm13 = vmor %vm3285_vm2, %vm3286_vm15 }
 0x5d9   :  { %v3268_v42 = vmul.f32 %v6989_v5, %v3267_v27  ;;  %v3282_v38 = vsub.f32 1.0, %v3281_v52 }
 0x5da   :  { %3404 = vst [vmem:[#allocation17 + $0x20] sm:$0xff] %v3234_v28  ;;  %v3276_v28 = vand.u32 2147483648, %v6963_v60 }
 0x5db   :  { %v3269_v45 = vadd.f32 %v6989_v5, %v3268_v42  ;;  %v3283_v23 = vmul.f32 %v7012_v54, %v3282_v38 }
 0x5dc   :  { %v3277_v48 = vor.u32 1.1754944e-38, %v3276_v28 }
 0x5dd   :  { %v3002_v39 = vpop.f32.mrf.mxu2  ;;  %3634 = vadd.xlane.f32.xlu0 %v3633_v13  ;;  %v3273_v41 = vsel %vm3272_vm14, %v6989_v5, %v3269_v45 }
 0x5de   :  { %v3042_v25 = vmul.f32 %v6658_v9, %v3002_v39 }
 0x5df   :  { %v3632_v12 = vpop.xlane.xlu2 %3631 }
 0x5e0   :  { %v3249_v22 = vmul.f32 %v3248_v50, %v3042_v25  ;;  %4515 = vrcp.f32 %v3632_v12  ;;  %v3284_v50 = vadd.f32 %v7012_v54, %v3283_v23  ;;  %v3140_v12 = vmul.f32 %v6815_v10, %v6663_v16 }
 0x5e1   :  { %4517 = vrcp.f32 %v7009_v19 }
 0x5e2   :  { %3405 = vst [vmem:[#allocation17 + $0x28] sm:$0xff] %v3249_v22  ;;  %4519 = vpow2.f32 %v3603_v11  ;;  %v3291_v22 = vand.u32 2147483648, %v6986_v0  ;;  %v3288_v10 = vsel %vm3287_vm13, %v7012_v54, %v3284_v50  ;;  %v7088_v1 = vmax.f32 %v3140_v12, 1e-12 }
 0x5e4   :  { %v3292_v52 = vor.u32 1.1754944e-38, %v3291_v22  ;;  %vm3345_vm13 = vweird.f32 %v7088_v1 }
 0x5e5   :  { %v3005_v26 = vpop.f32.mrf.mxu2  ;;  %3640 = vadd.xlane.f32.xlu0 %v3639_v61 }
 0x5e6   :  { %v3043_v8 = vmul.f32 %v6658_v9, %v3005_v26  ;;  %v4516_v57 = vpop.eup %4515 }
 0x5e7   :  { %v7035_v31 = vpop.eup %4517  ;;  %v3684_v46 = vmul.f32 %v4516_v57, %v6833_v55  ;;  %v3638_v14 = vpop.xlane.xlu2 %3637  ;;  %v3274_v55 = vand.u32 2147483647, %v6963_v60  ;;  %v7060_v60 = vmax.f32 %v3139_v36, 1e-12 }
 0x5e8   :  { %v3264_v35 = vmul.f32 %v3263_v30, %v3043_v8  ;;  %v7040_v29 = vpop.eup %4519  ;;  %4521 = vrcp.f32 %v3638_v14  ;;  %v3296_v40 = vmul.f32 %v7035_v31, %v7009_v19  ;;  %vm3301_vm12 = vweird.f32 %v7035_v31 }
 0x5e9   :  { %4523 = vrcp.f32 %v7032_v34  ;;  %3700 = vst.msk [vmem:[%s7251_s16 + $0x28] sm:$0xff] %vm3518_vm0, %v3684_v46  ;;  %v3645_v62 = vsel %vm3518_vm0, %v7040_v29, 0.0  ;;  %vm3275_vm7 = vcmp.eq.f32.partialorder %v3274_v55, 8.507059e+37  ;;  %v3141_v30 = vmul.f32 %v6826_v7, %v6663_v16  ;;  %vm7111_vm1 = vmor %vm3300_vm9, %vm3301_vm12 }
 0x5ea   :  { %4525 = vpow2.f32 %v3607_v44  ;;  %3406 = vst [vmem:[#allocation17 + $0x30] sm:$0xff] %v3264_v35  ;;  %v3278_v2 = vsel %vm3275_vm7, %v3277_v48, %v3273_v41  ;;  %v3297_v5 = vsub.f32 1.0, %v3296_v40  ;;  %v3306_v44 = vand.u32 2147483648, %v7009_v19 }
 0x5eb   :  { %v7127_v15 = vmax.f32 %v3141_v30, 1e-12  ;;  %vm3330_vm14 = vweird.f32 %v7060_v60 }
 0x5ec   :  { %v3298_v24 = vmul.f32 %v7035_v31, %v3297_v5  ;;  %v3307_v28 = vor.u32 1.1754944e-38, %v3306_v44  ;;  %v3351_v44 = vand.u32 2147483648, %v7088_v1 }
 0x5ed   :  { %v3007_v53 = vpop.f32.mrf.mxu2  ;;  %3646 = vadd.xlane.f32.xlu0 %v3645_v62 }
 0x5ee   :  { %v3044_v13 = vmul.f32 %v6658_v9, %v3007_v53  ;;  %v4522_v20 = vpop.eup %4521  ;;  %v3299_v57 = vadd.f32 %v7035_v31, %v3298_v24  ;;  %v3334_v24 = vand.u32 2147483647, %v7060_v60 }
 0x5ef   :  { %v7064_v39 = vpop.eup %4523  ;;  %v3686_v21 = vmul.f32 %v4522_v20, %v6841_v37  ;;  %v3644_v11 = vpop.xlane.xlu2 %3643  ;;  %v3289_v37 = vand.u32 2147483647, %v6986_v0  ;;  %v3319_v20 = vand.u32 2147483647, %v7032_v34 }
 0x5f0   :  { %v3279_v25 = vmul.f32 %v3278_v2, %v3044_v13  ;;  %v7068_v27 = vpop.eup %4525  ;;  %4527 = vrcp.f32 %v3644_v11  ;;  %v3311_v6 = vmul.f32 %v7064_v39, %v7032_v34  ;;  %vm3316_vm4 = vweird.f32 %v7064_v39 }
 0x5f1   :  { %4529 = vrcp.f32 %v7060_v60  ;;  %3702 = vst.msk [vmem:[%s7251_s16 + $0x38] sm:$0xff] %vm3518_vm0, %v3686_v21  ;;  %v3651_v33 = vsel %vm3518_vm0, %v7068_v27, 0.0  ;;  %vm3290_vm10 = vcmp.eq.f32.partialorder %v3289_v37, 8.507059e+37  ;;  %v3321_v13 = vand.u32 2147483648, %v7032_v34  ;;  %vm3317_vm6 = vmor %vm3315_vm3, %vm3316_vm4 }
 0x5f2   :  { %4531 = vpow2.f32 %v3611_v4  ;;  %3407 = vst [vmem:[#allocation17 + $0x38] sm:$0xff] %v3279_v25  ;;  %v3312_v61 = vsub.f32 1.0, %v3311_v6  ;;  %v3293_v42 = vsel %vm3290_vm10, %v3292_v52, %v3288_v10  ;;  %vm3320_vm8 = vcmp.eq.f32.partialorder %v3319_v20, 8.507059e+37 }
 0x5f3   :  { %v3322_v25 = vor.u32 1.1754944e-38, %v3321_v13  ;;  %vm3335_vm15 = vcmp.eq.f32.partialorder %v3334_v24, 8.507059e+37 }
 0x5f4   :  { %v3313_v7 = vmul.f32 %v7064_v39, %v3312_v61 }
 0x5f5   :  { %v3010_v32 = vpop.f32.mrf.mxu2  ;;  %3652 = vadd.xlane.f32.xlu0 %v3651_v33  ;;  %v3336_v33 = vand.u32 2147483648, %v7060_v60 }
 0x5f6   :  { %v3045_v0 = vmul.f32 %v6658_v9, %v3010_v32  ;;  %v4528_v58 = vpop.eup %4527  ;;  %v3314_v48 = vadd.f32 %v7064_v39, %v3313_v7 }
 0x5f7   :  { %v7091_v26 = vpop.eup %4529  ;;  %v3688_v54 = vmul.f32 %v4528_v58, %v6848_v56  ;;  %v3650_v8 = vpop.xlane.xlu2 %3649  ;;  %v3304_v56 = vand.u32 2147483647, %v7009_v19  ;;  %v3303_v19 = vsel %vm7111_vm1, %v7035_v31, %v3299_v57  ;;  %v3337_v61 = vor.u32 1.1754944e-38, %v3336_v33 }
 0x5f8   :  { %v3294_v43 = vmul.f32 %v3293_v42, %v3045_v0  ;;  %v7096_v38 = vpop.eup %4531  ;;  %4533 = vrcp.f32 %v3650_v8  ;;  %v3326_v35 = vmul.f32 %v7091_v26, %v7060_v60  ;;  %v3318_v2 = vsel %vm3317_vm6, %v7064_v39, %v3314_v48 }
 0x5f9   :  { %4535 = vrcp.f32 %v7088_v1  ;;  %3704 = vst.msk [vmem:[%s7251_s16 + $0x48] sm:$0xff] %vm3518_vm0, %v3688_v54  ;;  %v3657_v14 = vsel %vm3518_vm0, %v7096_v38, 0.0  ;;  %vm3305_vm11 = vcmp.eq.f32.partialorder %v3304_v56, 8.507059e+37  ;;  %vm3331_vm5 = vweird.f32 %v7091_v26 }
 0x5fa   :  { %3408 = vst [vmem:[#allocation17 + $0x40] sm:$0xff] %v3294_v43  ;;  %v3308_v31 = vsel %vm3305_vm11, %v3307_v28, %v3303_v19  ;;  %v3327_v41 = vsub.f32 1.0, %v3326_v35  ;;  %vm3332_vm7 = vmor %vm3330_vm14, %vm3331_vm5  ;;  %v3349_v56 = vand.u32 2147483647, %v7088_v1  ;;  %v3352_v19 = vor.u32 1.1754944e-38, %v3351_v44 }
 0x5fb   :  { %vm3360_vm1 = vweird.f32 %v7127_v15 }
 0x5fc   :  { %v3328_v5 = vmul.f32 %v7091_v26, %v3327_v41  ;;  %vm3350_vm12 = vcmp.eq.f32.partialorder %v3349_v56, 8.507059e+37 }
 0x5fd   :  { %v3012_v45 = vpop.f32.mrf.mxu2  ;;  %3658 = vadd.xlane.f32.xlu0 %v3657_v14 }
 0x5fe   :  { %v3046_v36 = vmul.f32 %v6658_v9, %v3012_v45  ;;  %v4534_v55 = vpop.eup %4533  ;;  %v3329_v10 = vadd.f32 %v7091_v26, %v3328_v5 }
 0x5ff   :  { %v7130_v40 = vpop.eup %4535  ;;  %v3690_v62 = vmul.f32 %v4534_v55, %v6856_v49  ;;  %v3656_v53 = vpop.xlane.xlu2 %3655  ;;  %v3142_v49 = vmul.f32 %v6822_v59, %v6663_v16  ;;  %v3323_v59 = vsel %vm3320_vm8, %v3322_v25, %v3318_v2  ;;  %v3366_v55 = vand.u32 2147483648, %v7127_v15 }
 0x600   :  { %v3309_v23 = vmul.f32 %v3308_v31, %v3046_v36  ;;  %4537 = vrcp.f32 %v3656_v53  ;;  %v3341_v4 = vmul.f32 %v7130_v40, %v7088_v1  ;;  %v3333_v52 = vsel %vm3332_vm7, %v7091_v26, %v3329_v10 }
 0x601   :  { %3706 = vst.msk [vmem:[%s7251_s16 + $0x58] sm:$0xff] %vm3518_vm0, %v3690_v62  ;;  %4539 = vrcp.f32 %v7127_v15  ;;  %v7151_v22 = vmax.f32 %v3142_v49, 1e-12  ;;  %v3338_v43 = vsel %vm3335_vm15, %v3337_v61, %v3333_v52  ;;  %vm3346_vm2 = vweird.f32 %v7130_v40 }
 0x602   :  { %3409 = vst [vmem:[#allocation17 + $0x48] sm:$0xff] %v3309_v23  ;;  %v3342_v50 = vsub.f32 1.0, %v3341_v4  ;;  %vm3347_vm10 = vmor %vm3345_vm13, %vm3346_vm2  ;;  %v3364_v31 = vand.u32 2147483647, %v7127_v15  ;;  %v3367_v53 = vor.u32 1.1754944e-38, %v3366_v55 }
 0x603   :  { %v3381_v2 = vand.u32 2147483648, %v7151_v22  ;;  %vm3375_vm6 = vweird.f32 %v7151_v22 }
 0x604   :  { %v3343_v0 = vmul.f32 %v7130_v40, %v3342_v50  ;;  %vm3365_vm4 = vcmp.eq.f32.partialorder %v3364_v31, 8.507059e+37 }
 0x605   :  { %v3015_v21 = vpop.f32.mrf.mxu2 }
 0x606   :  { %v3047_v34 = vmul.f32 %v6658_v9, %v3015_v21  ;;  %v4538_v11 = vpop.eup %4537  ;;  %v3344_v57 = vadd.f32 %v7130_v40, %v3343_v0 }
 0x607   :  { %v3692_v12 = vmul.f32 %v4538_v11, %v6863_v51  ;;  %v3662_v6 = vpop.xlane.xlu2 %3661  ;;  %v4540_v39 = vpop.eup %4539  ;;  %v3143_v51 = vmul.f32 %v6830_v3, %v6663_v16 }
 0x608   :  { %v3324_v37 = vmul.f32 %v3323_v59, %v3047_v34  ;;  %4541 = vrcp.f32 %v3662_v6  ;;  %v3356_v32 = vmul.f32 %v4540_v39, %v7127_v15  ;;  %v3348_v30 = vsel %vm3347_vm10, %v7130_v40, %v3344_v57 }
 0x609   :  { %3708 = vst.msk [vmem:[%s7251_s16 + $0x68] sm:$0xff] %vm3518_vm0, %v3692_v12  ;;  %4543 = vrcp.f32 %v7151_v22  ;;  %v7170_v60 = vmax.f32 %v3143_v51, 1e-12  ;;  %v3353_v7 = vsel %vm3350_vm12, %v3352_v19, %v3348_v30  ;;  %vm3361_vm9 = vweird.f32 %v4540_v39 }
 0x60a   :  { %3410 = vst [vmem:[#allocation17 + $0x50] sm:$0xff] %v3324_v37  ;;  %v3357_v16 = vsub.f32 1.0, %v3356_v32  ;;  %vm3362_vm11 = vmor %vm3360_vm1, %vm3361_vm9  ;;  %v3379_v15 = vand.u32 2147483647, %v7151_v22  ;;  %v3382_v34 = vor.u32 1.1754944e-38, %v3381_v2 }
 0x60b   :  { %4545 = vrcp.f32 %v7170_v60  ;;  %v3396_v37 = vand.u32 2147483648, %v7170_v60  ;;  %vm3390_vm7 = vweird.f32 %v7170_v60  ;;  %v3394_v6 = vand.u32 2147483647, %v7170_v60 }
 0x60c   :  { %v3358_v46 = vmul.f32 %v4540_v39, %v3357_v16  ;;  %vm3380_vm5 = vcmp.eq.f32.partialorder %v3379_v15, 8.507059e+37 }
 0x60d   :  { %v3017_v58 = vpop.f32.mrf.mxu2  ;;  %vm3395_vm2 = vcmp.eq.f32.partialorder %v3394_v6, 8.507059e+37 }
 0x60e   :  { %v3048_v42 = vmul.f32 %v6658_v9, %v3017_v58  ;;  %v4542_v54 = vpop.eup %4541  ;;  %v3359_v36 = vadd.f32 %v4540_v39, %v3358_v46 }
 0x60f   :  { %v3694_v3 = vmul.f32 %v4542_v54, %v6870_v47  ;;  %v4544_v26 = vpop.eup %4543 }
 0x610   :  { %v3339_v8 = vmul.f32 %v3338_v43, %v3048_v42  ;;  %v3371_v47 = vmul.f32 %v4544_v26, %v7151_v22  ;;  %v3363_v41 = vsel %vm3362_vm11, %v4540_v39, %v3359_v36  ;;  %vm3376_vm3 = vweird.f32 %v4544_v26 }
 0x611   :  { %3710 = vst.msk [vmem:[%s7251_s16 + $0x78] sm:$0xff] %vm3518_vm0, %v3694_v3  ;;  %v4546_v1 = vpop.eup %4545  ;;  %v3368_v13 = vsel %vm3365_vm4, %v3367_v53, %v3363_v41  ;;  %vm3377_vm8 = vmor %vm3375_vm6, %vm3376_vm3  ;;  %v3397_v39 = vor.u32 1.1754944e-38, %v3396_v37 }
 0x612   :  { %3411 = vst [vmem:[#allocation17 + $0x58] sm:$0xff] %v3339_v8  ;;  %v3372_v45 = vsub.f32 1.0, %v3371_v47  ;;  %v3386_v40 = vmul.f32 %v4546_v1, %v7170_v60  ;;  %vm3391_vm14 = vweird.f32 %v4546_v1 }
 0x613   :  { %vm3392_vm15 = vmor %vm3390_vm7, %vm3391_vm14 }
 0x614   :  { %v3373_v62 = vmul.f32 %v4544_v26, %v3372_v45  ;;  %v3387_v20 = vsub.f32 1.0, %v3386_v40 }
 0x615   :  { %v3020_v35 = vpop.f32.mrf.mxu2 }
 0x616   :  { %v3049_v14 = vmul.f32 %v6658_v9, %v3020_v35  ;;  %v3374_v49 = vadd.f32 %v4544_v26, %v3373_v62  ;;  %v3388_v21 = vmul.f32 %v4546_v1, %v3387_v20 }
 0x618   :  { %v3354_v28 = vmul.f32 %v3353_v7, %v3049_v14  ;;  %v3378_v5 = vsel %vm3377_vm8, %v4544_v26, %v3374_v49  ;;  %v3389_v12 = vadd.f32 %v4546_v1, %v3388_v21 }
 0x619   :  { %v3383_v50 = vsel %vm3380_vm5, %v3382_v34, %v3378_v5 }
 0x61a   :  { %3412 = vst [vmem:[#allocation17 + $0x60] sm:$0xff] %v3354_v28  ;;  %v3393_v22 = vsel %vm3392_vm15, %v4546_v1, %v3389_v12 }
 0x61b   :  { %v3398_v24 = vsel %vm3395_vm2, %v3397_v39, %v3393_v22 }
 0x61d   :  { %v3022_v23 = vpop.f32.mrf.mxu2 }
 0x61e   :  { %v3050_v48 = vmul.f32 %v6658_v9, %v3022_v23 }
 0x620   :  { %v3369_v4 = vmul.f32 %v3368_v13, %v3050_v48 }
 0x622   :  { %3413 = vst [vmem:[#allocation17 + $0x68] sm:$0xff] %v3369_v4 }
 0x625   :  { %v3025_v25 = vpop.f32.mrf.mxu2 }
 0x626   :  { %v3051_v11 = vmul.f32 %v6658_v9, %v3025_v25 }
 0x628   :  { %v3384_v59 = vmul.f32 %v3383_v50, %v3051_v11 }
 0x62a   :  { %3414 = vst [vmem:[#allocation17 + $0x70] sm:$0xff] %v3384_v59 }
 0x62d   :  { %v3027_v10 = vpop.f32.mrf.mxu2 }
 0x62e   :  { %v3052_v33 = vmul.f32 %v6658_v9, %v3027_v10 }
 0x630   :  { %v3399_v51 = vmul.f32 %v3398_v24, %v3052_v33 }
 0x632   :  { %3415 = vst [vmem:[#allocation17 + $0x78] sm:$0xff] %v3399_v51 }
 0x633   :  { %3736 = dma.vmem_to_hbm [thread:$0]  %s3729_s11, 2048, %s3731_s30, [#allocation18], %s4793_s25, %s4793_s25, %s4794_s26  }
 0x648   :  { %v3629_v32 = vpop.xlane.xlu0 %3628 }
 0x649   :  { %4547 = vrcp.f32 %v3629_v32 }
 0x64f   :  { %v4548_v52 = vpop.eup %4547 }
 0x650   :  { %v3683_v0 = vmul.f32 %v4548_v52, %v6976_v17  ;;  %v3635_v58 = vpop.xlane.xlu0 %3634 }
 0x651   :  { %4549 = vrcp.f32 %v3635_v58 }
 0x652   :  { %3699 = vst.msk [vmem:[%s7251_s16 + $0x20] sm:$0xff] %vm3518_vm0, %v3683_v0 }
 0x657   :  { %v4550_v9 = vpop.eup %4549 }
 0x658   :  { %v3685_v61 = vmul.f32 %v4550_v9, %v6993_v63  ;;  %v3641_v42 = vpop.xlane.xlu0 %3640 }
 0x659   :  { %4551 = vrcp.f32 %v3641_v42 }
 0x65a   :  { %3701 = vst.msk [vmem:[%s7251_s16 + $0x30] sm:$0xff] %vm3518_vm0, %v3685_v61 }
 0x65f   :  { %v4552_v54 = vpop.eup %4551 }
 0x660   :  { %v3687_v17 = vmul.f32 %v4552_v54, %v7016_v18  ;;  %v3647_v60 = vpop.xlane.xlu0 %3646 }
 0x661   :  { %4553 = vrcp.f32 %v3647_v60 }
 0x662   :  { %3703 = vst.msk [vmem:[%s7251_s16 + $0x40] sm:$0xff] %vm3518_vm0, %v3687_v17 }
 0x667   :  { %v4554_v43 = vpop.eup %4553 }
 0x668   :  { %v3689_v63 = vmul.f32 %v4554_v43, %v7040_v29  ;;  %v3653_v16 = vpop.xlane.xlu0 %3652 }
 0x669   :  { %4555 = vrcp.f32 %v3653_v16 }
 0x66a   :  { %3705 = vst.msk [vmem:[%s7251_s16 + $0x50] sm:$0xff] %vm3518_vm0, %v3689_v63 }
 0x66f   :  { %v4556_v3 = vpop.eup %4555 }
 0x670   :  { %v3691_v18 = vmul.f32 %v4556_v3, %v7068_v27  ;;  %v3659_v8 = vpop.xlane.xlu0 %3658 }
 0x671   :  { %4557 = vrcp.f32 %v3659_v8 }
 0x672   :  { %3707 = vst.msk [vmem:[%s7251_s16 + $0x60] sm:$0xff] %vm3518_vm0, %v3691_v18 }
 0x677   :  { %v4558_v57 = vpop.eup %4557 }
 0x678   :  { %v3693_v29 = vmul.f32 %v4558_v57, %v7096_v38 }
 0x67a   :  { %3709 = vst.msk [vmem:[%s7251_s16 + $0x70] sm:$0xff] %vm3518_vm0, %v3693_v29 }
 0x67b   :  { %4785 = dma.done.wait [#allocation6], 2048  }
 0x67c   :  { %4786 = vsyncadd [#allocation6], 4294965248 }
 0x67d   :  { %4787 = dma.done.wait [#allocation18], 2048  }
 0x67e   :  { %4788 = vsyncadd [#allocation18], 4294965248 }
 0x67f   :  { %3753 = vsyncpa [#allocation5], 1 }
 0x680   :  { %3754 = vsyncpa [#allocation8], 1 }
 0x681   :  { %3755 = vsyncpa [#allocation11], 1 }
 0x682   :  { %3756 = vsyncpa [#allocation14], 1 }
 0x683   :  { %3757 = vsyncpa [#allocation6], 1 }
 0x684   :  { %3758 = vsyncpa [#allocation18], 1 }

</bundles_post_ra>
